<compile_context>
chip_gen: v5e
topology: v5e:2x2
jax: 0.10.0
libtpu: 0.0.40
codegen_flags: <defaults>
</compile_context>

<pallas_src>
import functools

import jax
import jax.numpy as jnp
from jax import lax
from jax.experimental import pallas as pl
from jax.experimental.pallas import tpu as pltpu

# <= ~48 MiB keeps headroom on v7x (64 MiB physical); v5e/v6e (128 MiB) can
# raise this further at real model sizes for deeper buffering.
_VMEM_LIMIT = 48 * 1024 * 1024


# ---------------------------------------------------------------------------
# Fused decoder-layer kernel (one grid step = one batch element)
# ---------------------------------------------------------------------------

def _decoder_layer_kernel(*refs, nhead, eps, use_qpos, matmul_dtype):
    (tgt_ref, qpos_ref, qsine_ref, mem_ref, pos_ref,
     w_sa_qc, b_sa_qc, w_sa_qp, b_sa_qp, w_sa_kc, b_sa_kc, w_sa_kp, b_sa_kp,
     w_sa_v, b_sa_v, w_sa_o, b_sa_o, g1, be1,
     w_ca_qc, b_ca_qc, w_ca_qp, b_ca_qp, w_ca_kc, b_ca_kc, w_ca_kp, b_ca_kp,
     w_ca_v, b_ca_v, w_ca_qs, b_ca_qs, w_ca_o, b_ca_o, g2, be2,
     w1, b1, w2, b2, g3, be3,
     out_ref) = refs

    f32 = jnp.float32

    def mx(x):
        # Optional bf16 MXU operands; accumulation is always f32.
        return x.astype(matmul_dtype) if matmul_dtype is not None else x

    def dot_nt(a, b):
        # a (m, k) . b (n, k)^T -> (m, n) f32. Weights stay in native
        # (dout, din) layout; the MXU handles the transposed RHS natively.
        return lax.dot_general(mx(a), mx(b), (((1,), (1,)), ((), ())),
                               preferred_element_type=f32)

    def dot_nn(a, b):
        return lax.dot_general(mx(a), mx(b), (((1,), (0,)), ((), ())),
                               preferred_element_type=f32)

    def lin(x, w_ref, b_ref):
        return dot_nt(x, w_ref[...]) + b_ref[...].astype(f32)

    def layer_norm(y, g_ref, bt_ref):
        mu = jnp.mean(y, axis=-1, keepdims=True)
        var = jnp.mean((y - mu) ** 2, axis=-1, keepdims=True)
        yn = (y - mu) * lax.rsqrt(var + eps)
        return yn * g_ref[...].astype(f32) + bt_ref[...].astype(f32)

    def attention(q_parts, k_parts, v, w_o):
        # Heads stay packed along the lane axis. Per-head scores are the sum
        # of contractions of matching (q, k) parts (== concatenating the
        # parts per head, but without materializing any concat). Each head's
        # output is pushed straight through its out_proj weight columns and
        # accumulated, so the merged + projected (Lq, d) result appears with
        # no reshape / concat / interleave.
        # TODO(synk): at real sizes (hw >~ 1k, v7x) tile the key axis with an
        # online softmax instead of full (Lq, Lk) scores per head.
        hd = q_parts[0].shape[-1] // nhead
        hdv = v.shape[-1] // nhead
        acc = None
        for h in range(nhead):
            sq = slice(h * hd, (h + 1) * hd)
            sv = slice(h * hdv, (h + 1) * hdv)
            s = None
            for qq, kk in zip(q_parts, k_parts):
                part = dot_nt(qq[:, sq], kk[:, sq])          # (Lq, Lk) f32
                s = part if s is None else s + part
            s = s - jnp.max(s, axis=-1, keepdims=True)
            p = jnp.exp(s)
            p = p * pl.reciprocal(jnp.sum(p, axis=-1, keepdims=True),
                                  approx=False)
            oh = dot_nn(p, v[:, sv])                          # (Lq, hdv)
            acc_h = dot_nt(oh, w_o[:, sv])                    # (Lq, d)
            acc = acc_h if acc is None else acc + acc_h
        return acc

    tgt = tgt_ref[...]
    qpos = qpos_ref[...]
    mem = mem_ref[...]
    pos = pos_ref[...]

    d = tgt.shape[-1]
    hd = d // nhead
    x = tgt.astype(f32)

    # ---------------- self attention ----------------
    q = lin(tgt, w_sa_qc, b_sa_qc) + lin(qpos, w_sa_qp, b_sa_qp)
    k = lin(tgt, w_sa_kc, b_sa_kc) + lin(qpos, w_sa_kp, b_sa_kp)
    v = lin(tgt, w_sa_v, b_sa_v)
    sa_scale = float(hd) ** -0.5
    tgt2 = attention([q * sa_scale], [k], v, w_sa_o[...]) \
        + b_sa_o[...].astype(f32)
    x = layer_norm(x + tgt2, g1, be1)

    # ---------------- cross attention ----------------
    q_content = lin(x, w_ca_qc, b_ca_qc)
    k_content = lin(mem, w_ca_kc, b_ca_kc)
    v_c = lin(mem, w_ca_v, b_ca_v)
    k_pos = lin(pos, w_ca_kp, b_ca_kp)
    if use_qpos:
        q_c = q_content + lin(qpos, w_ca_qp, b_ca_qp)
        k_c = k_content + k_pos
    else:
        q_c = q_content
        k_c = k_content
    sine = lin(qsine_ref[...], w_ca_qs, b_ca_qs)
    ca_scale = float(2 * hd) ** -0.5
    # score_h = [q_c|sine]_h . [k_c|k_pos]_h^T  ==  q_c_h.k_c_h^T + sine_h.k_pos_h^T
    tgt2 = attention([q_c * ca_scale, sine * ca_scale], [k_c, k_pos], v_c,
                     w_ca_o[...]) + b_ca_o[...].astype(f32)
    x = layer_norm(x + tgt2, g2, be2)

    # ---------------- feed forward ----------------
    h1 = jnp.maximum(dot_nt(x, w1[...]) + b1[...].astype(f32), 0.0)
    # TODO(synk): at real sizes (dff ~ 2048, big row counts) chunk the dff axis
    # so the intermediate stays in vregs instead of spilling to VMEM.
    tgt2 = dot_nt(h1, w2[...]) + b2[...].astype(f32)
    x = layer_norm(x + tgt2, g3, be3)

    out_ref[...] = x.astype(out_ref.dtype)


# ---------------------------------------------------------------------------
# Wrapper
# ---------------------------------------------------------------------------

def decoder_layer_forward(tgt, memory, weights, extnorms, pos, query_pos,
                          query_sine_embed, is_first=False, nhead=4,
                          keep_query_pos=True, eps=1e-5, matmul_dtype=None):
    """Eval-mode forward of hyperTransformerDecoderLayer as one Pallas kernel.

    tgt/query_pos/query_sine_embed: (nq, bs, d); memory/pos: (hw, bs, d).
    Weights are passed in their native PyTorch (dout, din) layout; no
    per-forward transpose / concat / interleave preprocessing is done.
    """
    nq, bs, d = tgt.shape
    hw = memory.shape[0]
    assert d % nhead == 0

    # Batch-major so each grid step owns one batch element with lane-dense
    # (L, d) blocks; heads stay packed along the lane axis.
    to_b = lambda x: jnp.transpose(x, (1, 0, 2))
    tgt_b, qpos_b, qsine_b = to_b(tgt), to_b(query_pos), to_b(query_sine_embed)
    mem_b, pos_b = to_b(memory), to_b(pos)

    sa = weights["self_attention"]
    ca = weights["cross_attention"]
    ff = weights["feedforward"]
    row = lambda v: v.reshape(1, -1)

    def wb(p):
        return [p["w"], row(p["b"])]   # native (dout, din) weight, (1, dout) bias

    acts = [tgt_b, qpos_b, qsine_b, mem_b, pos_b]
    params = (
        wb(sa["sa_qcontent_proj"]) + wb(sa["sa_qpos_proj"])
        + wb(sa["sa_kcontent_proj"]) + wb(sa["sa_kpos_proj"])
        + wb(sa["sa_v_proj"]) + wb(sa["self_attn"])
        + [row(extnorms[0]["gamma"]), row(extnorms[0]["beta"])]
        + wb(ca["ca_qcontent_proj"]) + wb(ca["ca_qpos_proj"])
        + wb(ca["ca_kcontent_proj"]) + wb(ca["ca_kpos_proj"])
        + wb(ca["ca_v_proj"]) + wb(ca["ca_qpos_sine_proj"]) + wb(ca["cross_attn"])
        + [row(extnorms[1]["gamma"]), row(extnorms[1]["beta"])]
        + wb(ff["linear1"]) + wb(ff["linear2"])
        + [row(extnorms[2]["gamma"]), row(extnorms[2]["beta"])]
    )

    def act_spec(a):
        return pl.BlockSpec((None,) + a.shape[1:], lambda b: (b, 0, 0))

    def param_spec(p):
        return pl.BlockSpec(p.shape, lambda b: (0, 0))

    in_specs = [act_spec(a) for a in acts] + [param_spec(p) for p in params]

    kernel = functools.partial(
        _decoder_layer_kernel, nhead=nhead, eps=eps,
        use_qpos=bool(is_first or keep_query_pos), matmul_dtype=matmul_dtype)

    out_b = pl.pallas_call(
        kernel,
        out_shape=jax.ShapeDtypeStruct((bs, nq, d), tgt.dtype),
        grid=(bs,),
        in_specs=in_specs,
        out_specs=pl.BlockSpec((None, nq, d), lambda b: (b, 0, 0)),
        compiler_params=pltpu.CompilerParams(
            dimension_semantics=("parallel",), vmem_limit_bytes=_VMEM_LIMIT),
    )(*acts, *params)
    return jnp.transpose(out_b, (1, 0, 2))


# ---------------------------------------------------------------------------
# Pure-JAX reference (mirrors the PyTorch module in eval mode)
# ---------------------------------------------------------------------------

def reference_forward(tgt, memory, weights, extnorms, pos, query_pos,
                      query_sine_embed, is_first, nhead, keep_query_pos, eps=1e-5):
    def lin(x, p):
        return x @ p["w"].T + p["b"]

    def lnorm(x, p):
        mu = jnp.mean(x, -1, keepdims=True)
        var = jnp.mean((x - mu) ** 2, -1, keepdims=True)
        return (x - mu) / jnp.sqrt(var + eps) * p["gamma"] + p["beta"]

    def mha(q, k, v, scale):
        L, B, C = q.shape
        Lk, Cv = k.shape[0], v.shape[2]
        hd, hdv = C // nhead, Cv // nhead
        qh = q.reshape(L, B, nhead, hd).transpose(1, 2, 0, 3)
        kh = k.reshape(Lk, B, nhead, hd).transpose(1, 2, 0, 3)
        vh = v.reshape(Lk, B, nhead, hdv).transpose(1, 2, 0, 3)
        s = jnp.einsum("bhqd,bhkd->bhqk", qh, kh) * scale
        p = jax.nn.softmax(s, axis=-1)
        o = jnp.einsum("bhqk,bhkd->bhqd", p, vh)
        return o.transpose(2, 0, 1, 3).reshape(L, B, Cv)

    nq, bs, d = tgt.shape
    hw = memory.shape[0]
    hd = d // nhead

    sa = weights["self_attention"]
    q = lin(tgt, sa["sa_qcontent_proj"]) + lin(query_pos, sa["sa_qpos_proj"])
    k = lin(tgt, sa["sa_kcontent_proj"]) + lin(query_pos, sa["sa_kpos_proj"])
    v = lin(tgt, sa["sa_v_proj"])
    tgt2 = lin(mha(q, k, v, float(hd) ** -0.5), sa["self_attn"])
    tgt = lnorm(tgt + tgt2, extnorms[0])

    ca = weights["cross_attention"]
    q_content = lin(tgt, ca["ca_qcontent_proj"])
    k_content = lin(memory, ca["ca_kcontent_proj"])
    v = lin(memory, ca["ca_v_proj"])
    k_pos = lin(pos, ca["ca_kpos_proj"])
    if is_first or keep_query_pos:
        q_pos = lin(query_pos, ca["ca_qpos_proj"])
        q = q_content + q_pos
        k = k_content + k_pos
    else:
        q = q_content
        k = k_content
    qse = lin(query_sine_embed, ca["ca_qpos_sine_proj"])
    q = jnp.concatenate([q.reshape(nq, bs, nhead, hd),
                         qse.reshape(nq, bs, nhead, hd)], axis=3).reshape(nq, bs, 2 * d)
    k = jnp.concatenate([k.reshape(hw, bs, nhead, hd),
                         k_pos.reshape(hw, bs, nhead, hd)], axis=3).reshape(hw, bs, 2 * d)
    tgt2 = lin(mha(q, k, v, float((2 * d) // nhead) ** -0.5), ca["cross_attn"])
    tgt = lnorm(tgt + tgt2, extnorms[1])

    ff = weights["feedforward"]
    h = jnp.maximum(lin(tgt, ff["linear1"]), 0.0)
    tgt2 = lin(h, ff["linear2"])
    return lnorm(tgt + tgt2, extnorms[2])


# ---------------------------------------------------------------------------
# Deterministic parameter construction
# ---------------------------------------------------------------------------

def init_params(key, d_model, nhead, dff):
    keys = iter(jax.random.split(key, 64))

    def lin_p(din, dout):
        w = jax.random.normal(next(keys), (dout, din), jnp.float32) * (din ** -0.5)
        b = jax.random.normal(next(keys), (dout,), jnp.float32) * 0.02
        return {"w": w, "b": b}

    weights = {
        "self_attention": {
            "sa_qcontent_proj": lin_p(d_model, d_model),
            "sa_qpos_proj": lin_p(d_model, d_model),
            "sa_kcontent_proj": lin_p(d_model, d_model),
            "sa_kpos_proj": lin_p(d_model, d_model),
            "sa_v_proj": lin_p(d_model, d_model),
            "self_attn": lin_p(d_model, d_model),      # MHA out_proj
        },
        "cross_attention": {
            "ca_qcontent_proj": lin_p(d_model, d_model),
            "ca_qpos_proj": lin_p(d_model, d_model),
            "ca_kcontent_proj": lin_p(d_model, d_model),
            "ca_kpos_proj": lin_p(d_model, d_model),
            "ca_v_proj": lin_p(d_model, d_model),
            "ca_qpos_sine_proj": lin_p(d_model, d_model),
            "cross_attn": lin_p(d_model, d_model),     # MHA out_proj (vdim->vdim)
        },
        "feedforward": {
            "linear1": lin_p(d_model, dff),
            "linear2": lin_p(dff, d_model),
        },
    }

    extnorms = []
    for _ in range(3):
        gamma = 1.0 + 0.1 * jax.random.normal(next(keys), (d_model,), jnp.float32)
        beta = 0.05 * jax.random.normal(next(keys), (d_model,), jnp.float32)
        extnorms.append({"gamma": gamma, "beta": beta})
    return weights, extnorms


# ---------------------------------------------------------------------------
# Demo
# ---------------------------------------------------------------------------

if __name__ == "__main__":
    d_model, nhead, dff = 32, 4, 64
    num_queries, bs, hw = 8, 2, 16

    key = jax.random.PRNGKey(0)
    k1, k2, k3, k4, k5, kp = jax.random.split(key, 6)
    tgt = jax.random.normal(k1, (num_queries, bs, d_model), jnp.float32)
    memory = jax.random.normal(k2, (hw, bs, d_model), jnp.float32)
    pos = jax.random.normal(k3, (hw, bs, d_model), jnp.float32)
    query_pos = jax.random.normal(k4, (num_queries, bs, d_model), jnp.float32)
    query_sine_embed = jax.random.normal(k5, (num_queries, bs, d_model), jnp.float32)

    weights, extnorms = init_params(kp, d_model, nhead, dff)

    # TODO(synk): use_local_attn=True path (index_pair MultiheadAttentionLocal),
    # attn / key-padding masks and train-mode dropout are not implemented.
    ref = reference_forward(
        tgt, memory, weights, extnorms, pos, query_pos, query_sine_embed,
        is_first=False, nhead=nhead, keep_query_pos=True)
    ref = jax.block_until_ready(ref)

    # f32 MXU operands: tight correctness check (exact softmax reciprocal).
    out = decoder_layer_forward(
        tgt, memory, weights, extnorms, pos, query_pos, query_sine_embed,
        is_first=False, nhead=nhead, keep_query_pos=True, matmul_dtype=None)
    out = jax.block_until_ready(out)
    assert out.shape == (num_queries, bs, d_model)
    assert jnp.all(jnp.isfinite(out))
    assert jnp.allclose(out, ref, atol=2e-3, rtol=2e-3), float(
        jnp.max(jnp.abs(out - ref)))

    # bf16 MXU operands (f32 accumulation; softmax/LN stay f32): loose check.
    out_bf16 = decoder_layer_forward(
        tgt, memory, weights, extnorms, pos, query_pos, query_sine_embed,
        is_first=False, nhead=nhead, keep_query_pos=True,
        matmul_dtype=jnp.bfloat16)
    out_bf16 = jax.block_until_ready(out_bf16)
    assert jnp.all(jnp.isfinite(out_bf16))
    assert jnp.allclose(out_bf16, ref, atol=1e-1, rtol=1e-1), float(
        jnp.max(jnp.abs(out_bf16 - ref)))

    print("KERNEL_OK")
</pallas_src>

<mosaic_0001>
module attributes {stable_mosaic.version = 11 : i64} {
  func.func @_decoder_layer_kernel(%arg0: i32, %arg1: memref<1x8x32xf32, #tpu.memory_space<vmem>>, %arg2: memref<1x8x32xf32, #tpu.memory_space<vmem>>, %arg3: memref<1x8x32xf32, #tpu.memory_space<vmem>>, %arg4: memref<1x16x32xf32, #tpu.memory_space<vmem>>, %arg5: memref<1x16x32xf32, #tpu.memory_space<vmem>>, %arg6: memref<32x32xf32, #tpu.memory_space<vmem>>, %arg7: memref<1x32xf32, #tpu.memory_space<vmem>>, %arg8: memref<32x32xf32, #tpu.memory_space<vmem>>, %arg9: memref<1x32xf32, #tpu.memory_space<vmem>>, %arg10: memref<32x32xf32, #tpu.memory_space<vmem>>, %arg11: memref<1x32xf32, #tpu.memory_space<vmem>>, %arg12: memref<32x32xf32, #tpu.memory_space<vmem>>, %arg13: memref<1x32xf32, #tpu.memory_space<vmem>>, %arg14: memref<32x32xf32, #tpu.memory_space<vmem>>, %arg15: memref<1x32xf32, #tpu.memory_space<vmem>>, %arg16: memref<32x32xf32, #tpu.memory_space<vmem>>, %arg17: memref<1x32xf32, #tpu.memory_space<vmem>>, %arg18: memref<1x32xf32, #tpu.memory_space<vmem>>, %arg19: memref<1x32xf32, #tpu.memory_space<vmem>>, %arg20: memref<32x32xf32, #tpu.memory_space<vmem>>, %arg21: memref<1x32xf32, #tpu.memory_space<vmem>>, %arg22: memref<32x32xf32, #tpu.memory_space<vmem>>, %arg23: memref<1x32xf32, #tpu.memory_space<vmem>>, %arg24: memref<32x32xf32, #tpu.memory_space<vmem>>, %arg25: memref<1x32xf32, #tpu.memory_space<vmem>>, %arg26: memref<32x32xf32, #tpu.memory_space<vmem>>, %arg27: memref<1x32xf32, #tpu.memory_space<vmem>>, %arg28: memref<32x32xf32, #tpu.memory_space<vmem>>, %arg29: memref<1x32xf32, #tpu.memory_space<vmem>>, %arg30: memref<32x32xf32, #tpu.memory_space<vmem>>, %arg31: memref<1x32xf32, #tpu.memory_space<vmem>>, %arg32: memref<32x32xf32, #tpu.memory_space<vmem>>, %arg33: memref<1x32xf32, #tpu.memory_space<vmem>>, %arg34: memref<1x32xf32, #tpu.memory_space<vmem>>, %arg35: memref<1x32xf32, #tpu.memory_space<vmem>>, %arg36: memref<64x32xf32, #tpu.memory_space<vmem>>, %arg37: memref<1x64xf32, #tpu.memory_space<vmem>>, %arg38: memref<32x64xf32, #tpu.memory_space<vmem>>, %arg39: memref<1x32xf32, #tpu.memory_space<vmem>>, %arg40: memref<1x32xf32, #tpu.memory_space<vmem>>, %arg41: memref<1x32xf32, #tpu.memory_space<vmem>>, %arg42: memref<1x8x32xf32, #tpu.memory_space<vmem>>) attributes {dimension_semantics = [#tpu.dimension_semantics<parallel>], iteration_bounds = array<i64: 2>, scalar_prefetch = 0 : i64, scratch_operands = 0 : i64, tpu.core_type = #tpu.core_type<tc>, window_params = [{transform_indices = @transform_0, window_bounds = array<i64: 1, 8, 32>}, {transform_indices = @transform_1, window_bounds = array<i64: 1, 8, 32>}, {transform_indices = @transform_2, window_bounds = array<i64: 1, 8, 32>}, {transform_indices = @transform_3, window_bounds = array<i64: 1, 16, 32>}, {transform_indices = @transform_4, window_bounds = array<i64: 1, 16, 32>}, {pipeline_mode = #tpu.pipeline_mode<synchronous>, transform_indices = @transform_5, window_bounds = array<i64: 32, 32>}, {pipeline_mode = #tpu.pipeline_mode<synchronous>, transform_indices = @transform_6, window_bounds = array<i64: 1, 32>}, {pipeline_mode = #tpu.pipeline_mode<synchronous>, transform_indices = @transform_7, window_bounds = array<i64: 32, 32>}, {pipeline_mode = #tpu.pipeline_mode<synchronous>, transform_indices = @transform_8, window_bounds = array<i64: 1, 32>}, {pipeline_mode = #tpu.pipeline_mode<synchronous>, transform_indices = @transform_9, window_bounds = array<i64: 32, 32>}, {pipeline_mode = #tpu.pipeline_mode<synchronous>, transform_indices = @transform_10, window_bounds = array<i64: 1, 32>}, {pipeline_mode = #tpu.pipeline_mode<synchronous>, transform_indices = @transform_11, window_bounds = array<i64: 32, 32>}, {pipeline_mode = #tpu.pipeline_mode<synchronous>, transform_indices = @transform_12, window_bounds = array<i64: 1, 32>}, {pipeline_mode = #tpu.pipeline_mode<synchronous>, transform_indices = @transform_13, window_bounds = array<i64: 32, 32>}, {pipeline_mode = #tpu.pipeline_mode<synchronous>, transform_indices = @transform_14, window_bounds = array<i64: 1, 32>}, {pipeline_mode = #tpu.pipeline_mode<synchronous>, transform_indices = @transform_15, window_bounds = array<i64: 32, 32>}, {pipeline_mode = #tpu.pipeline_mode<synchronous>, transform_indices = @transform_16, window_bounds = array<i64: 1, 32>}, {pipeline_mode = #tpu.pipeline_mode<synchronous>, transform_indices = @transform_17, window_bounds = array<i64: 1, 32>}, {pipeline_mode = #tpu.pipeline_mode<synchronous>, transform_indices = @transform_18, window_bounds = array<i64: 1, 32>}, {pipeline_mode = #tpu.pipeline_mode<synchronous>, transform_indices = @transform_19, window_bounds = array<i64: 32, 32>}, {pipeline_mode = #tpu.pipeline_mode<synchronous>, transform_indices = @transform_20, window_bounds = array<i64: 1, 32>}, {pipeline_mode = #tpu.pipeline_mode<synchronous>, transform_indices = @transform_21, window_bounds = array<i64: 32, 32>}, {pipeline_mode = #tpu.pipeline_mode<synchronous>, transform_indices = @transform_22, window_bounds = array<i64: 1, 32>}, {pipeline_mode = #tpu.pipeline_mode<synchronous>, transform_indices = @transform_23, window_bounds = array<i64: 32, 32>}, {pipeline_mode = #tpu.pipeline_mode<synchronous>, transform_indices = @transform_24, window_bounds = array<i64: 1, 32>}, {pipeline_mode = #tpu.pipeline_mode<synchronous>, transform_indices = @transform_25, window_bounds = array<i64: 32, 32>}, {pipeline_mode = #tpu.pipeline_mode<synchronous>, transform_indices = @transform_26, window_bounds = array<i64: 1, 32>}, {pipeline_mode = #tpu.pipeline_mode<synchronous>, transform_indices = @transform_27, window_bounds = array<i64: 32, 32>}, {pipeline_mode = #tpu.pipeline_mode<synchronous>, transform_indices = @transform_28, window_bounds = array<i64: 1, 32>}, {pipeline_mode = #tpu.pipeline_mode<synchronous>, transform_indices = @transform_29, window_bounds = array<i64: 32, 32>}, {pipeline_mode = #tpu.pipeline_mode<synchronous>, transform_indices = @transform_30, window_bounds = array<i64: 1, 32>}, {pipeline_mode = #tpu.pipeline_mode<synchronous>, transform_indices = @transform_31, window_bounds = array<i64: 32, 32>}, {pipeline_mode = #tpu.pipeline_mode<synchronous>, transform_indices = @transform_32, window_bounds = array<i64: 1, 32>}, {pipeline_mode = #tpu.pipeline_mode<synchronous>, transform_indices = @transform_33, window_bounds = array<i64: 1, 32>}, {pipeline_mode = #tpu.pipeline_mode<synchronous>, transform_indices = @transform_34, window_bounds = array<i64: 1, 32>}, {pipeline_mode = #tpu.pipeline_mode<synchronous>, transform_indices = @transform_35, window_bounds = array<i64: 64, 32>}, {pipeline_mode = #tpu.pipeline_mode<synchronous>, transform_indices = @transform_36, window_bounds = array<i64: 1, 64>}, {pipeline_mode = #tpu.pipeline_mode<synchronous>, transform_indices = @transform_37, window_bounds = array<i64: 32, 64>}, {pipeline_mode = #tpu.pipeline_mode<synchronous>, transform_indices = @transform_38, window_bounds = array<i64: 1, 32>}, {pipeline_mode = #tpu.pipeline_mode<synchronous>, transform_indices = @transform_39, window_bounds = array<i64: 1, 32>}, {pipeline_mode = #tpu.pipeline_mode<synchronous>, transform_indices = @transform_40, window_bounds = array<i64: 1, 32>}, {transform_indices = @transform_41, window_bounds = array<i64: 1, 8, 32>}]} {
    %c0 = arith.constant 0 : index
    %c0_0 = arith.constant 0 : index
    %c0_1 = arith.constant 0 : index
    %0 = vector.load %arg1[%c0, %c0_0, %c0_1] : memref<1x8x32xf32, #tpu.memory_space<vmem>>, vector<1x8x32xf32>
    %1 = vector.shape_cast %0 : vector<1x8x32xf32> to vector<8x32xf32>
    %c0_2 = arith.constant 0 : index
    %c0_3 = arith.constant 0 : index
    %c0_4 = arith.constant 0 : index
    %2 = vector.load %arg2[%c0_2, %c0_3, %c0_4] : memref<1x8x32xf32, #tpu.memory_space<vmem>>, vector<1x8x32xf32>
    %3 = vector.shape_cast %2 : vector<1x8x32xf32> to vector<8x32xf32>
    %c0_5 = arith.constant 0 : index
    %c0_6 = arith.constant 0 : index
    %c0_7 = arith.constant 0 : index
    %4 = vector.load %arg4[%c0_5, %c0_6, %c0_7] : memref<1x16x32xf32, #tpu.memory_space<vmem>>, vector<1x16x32xf32>
    %5 = vector.shape_cast %4 : vector<1x16x32xf32> to vector<16x32xf32>
    %c0_8 = arith.constant 0 : index
    %c0_9 = arith.constant 0 : index
    %c0_10 = arith.constant 0 : index
    %6 = vector.load %arg5[%c0_8, %c0_9, %c0_10] : memref<1x16x32xf32, #tpu.memory_space<vmem>>, vector<1x16x32xf32>
    %7 = vector.shape_cast %6 : vector<1x16x32xf32> to vector<16x32xf32>
    %c0_11 = arith.constant 0 : index
    %c0_12 = arith.constant 0 : index
    %8 = vector.load %arg6[%c0_11, %c0_12] : memref<32x32xf32, #tpu.memory_space<vmem>>, vector<32x32xf32>
    %cst = arith.constant dense<0.000000e+00> : vector<8x32xf32>
    %9 = tpu.matmul %1, %8, %cst {dimension_numbers = #tpu.dot_dimension_numbers<[1], [1], [0], [0], [0, 0, 1, 0], [], []>} : vector<8x32xf32>, vector<32x32xf32>, vector<8x32xf32> -> vector<8x32xf32>
    %c0_13 = arith.constant 0 : index
    %c0_14 = arith.constant 0 : index
    %10 = vector.load %arg7[%c0_13, %c0_14] : memref<1x32xf32, #tpu.memory_space<vmem>>, vector<1x32xf32>
    %11 = vector.broadcast %10 : vector<1x32xf32> to vector<8x32xf32>
    %12 = arith.addf %9, %11 : vector<8x32xf32>
    %c0_15 = arith.constant 0 : index
    %c0_16 = arith.constant 0 : index
    %13 = vector.load %arg8[%c0_15, %c0_16] : memref<32x32xf32, #tpu.memory_space<vmem>>, vector<32x32xf32>
    %cst_17 = arith.constant dense<0.000000e+00> : vector<8x32xf32>
    %14 = tpu.matmul %3, %13, %cst_17 {dimension_numbers = #tpu.dot_dimension_numbers<[1], [1], [0], [0], [0, 0, 1, 0], [], []>} : vector<8x32xf32>, vector<32x32xf32>, vector<8x32xf32> -> vector<8x32xf32>
    %c0_18 = arith.constant 0 : index
    %c0_19 = arith.constant 0 : index
    %15 = vector.load %arg9[%c0_18, %c0_19] : memref<1x32xf32, #tpu.memory_space<vmem>>, vector<1x32xf32>
    %16 = vector.broadcast %15 : vector<1x32xf32> to vector<8x32xf32>
    %17 = arith.addf %14, %16 : vector<8x32xf32>
    %18 = arith.addf %12, %17 : vector<8x32xf32>
    %c0_20 = arith.constant 0 : index
    %c0_21 = arith.constant 0 : index
    %19 = vector.load %arg10[%c0_20, %c0_21] : memref<32x32xf32, #tpu.memory_space<vmem>>, vector<32x32xf32>
    %cst_22 = arith.constant dense<0.000000e+00> : vector<8x32xf32>
    %20 = tpu.matmul %1, %19, %cst_22 {dimension_numbers = #tpu.dot_dimension_numbers<[1], [1], [0], [0], [0, 0, 1, 0], [], []>} : vector<8x32xf32>, vector<32x32xf32>, vector<8x32xf32> -> vector<8x32xf32>
    %c0_23 = arith.constant 0 : index
    %c0_24 = arith.constant 0 : index
    %21 = vector.load %arg11[%c0_23, %c0_24] : memref<1x32xf32, #tpu.memory_space<vmem>>, vector<1x32xf32>
    %22 = vector.broadcast %21 : vector<1x32xf32> to vector<8x32xf32>
    %23 = arith.addf %20, %22 : vector<8x32xf32>
    %c0_25 = arith.constant 0 : index
    %c0_26 = arith.constant 0 : index
    %24 = vector.load %arg12[%c0_25, %c0_26] : memref<32x32xf32, #tpu.memory_space<vmem>>, vector<32x32xf32>
    %cst_27 = arith.constant dense<0.000000e+00> : vector<8x32xf32>
    %25 = tpu.matmul %3, %24, %cst_27 {dimension_numbers = #tpu.dot_dimension_numbers<[1], [1], [0], [0], [0, 0, 1, 0], [], []>} : vector<8x32xf32>, vector<32x32xf32>, vector<8x32xf32> -> vector<8x32xf32>
    %c0_28 = arith.constant 0 : index
    %c0_29 = arith.constant 0 : index
    %26 = vector.load %arg13[%c0_28, %c0_29] : memref<1x32xf32, #tpu.memory_space<vmem>>, vector<1x32xf32>
    %27 = vector.broadcast %26 : vector<1x32xf32> to vector<8x32xf32>
    %28 = arith.addf %25, %27 : vector<8x32xf32>
    %29 = arith.addf %23, %28 : vector<8x32xf32>
    %c0_30 = arith.constant 0 : index
    %c0_31 = arith.constant 0 : index
    %30 = vector.load %arg14[%c0_30, %c0_31] : memref<32x32xf32, #tpu.memory_space<vmem>>, vector<32x32xf32>
    %cst_32 = arith.constant dense<0.000000e+00> : vector<8x32xf32>
    %31 = tpu.matmul %1, %30, %cst_32 {dimension_numbers = #tpu.dot_dimension_numbers<[1], [1], [0], [0], [0, 0, 1, 0], [], []>} : vector<8x32xf32>, vector<32x32xf32>, vector<8x32xf32> -> vector<8x32xf32>
    %c0_33 = arith.constant 0 : index
    %c0_34 = arith.constant 0 : index
    %32 = vector.load %arg15[%c0_33, %c0_34] : memref<1x32xf32, #tpu.memory_space<vmem>>, vector<1x32xf32>
    %33 = vector.broadcast %32 : vector<1x32xf32> to vector<8x32xf32>
    %34 = arith.addf %31, %33 : vector<8x32xf32>
    %cst_35 = arith.constant 0.353553385 : f32
    %35 = vector.broadcast %cst_35 : f32 to vector<8x32xf32>
    %36 = arith.mulf %18, %35 : vector<8x32xf32>
    %c0_36 = arith.constant 0 : index
    %c0_37 = arith.constant 0 : index
    %37 = vector.load %arg16[%c0_36, %c0_37] : memref<32x32xf32, #tpu.memory_space<vmem>>, vector<32x32xf32>
    %38 = vector.extract_strided_slice %36 {offsets = [0, 0], sizes = [8, 8], strides = [1, 1]} : vector<8x32xf32> to vector<8x8xf32>
    %39 = vector.extract_strided_slice %29 {offsets = [0, 0], sizes = [8, 8], strides = [1, 1]} : vector<8x32xf32> to vector<8x8xf32>
    %cst_38 = arith.constant dense<0.000000e+00> : vector<8x8xf32>
    %40 = tpu.matmul %38, %39, %cst_38 {dimension_numbers = #tpu.dot_dimension_numbers<[1], [1], [0], [0], [0, 0, 1, 0], [], []>} : vector<8x8xf32>, vector<8x8xf32>, vector<8x8xf32> -> vector<8x8xf32>
    %cst_39 = arith.constant dense<0xFF800000> : vector<8xf32>
    %41 = vector.multi_reduction <maximumf>, %40, %cst_39 [1] : vector<8x8xf32> to vector<8xf32>
    %42 = vector.shape_cast %41 : vector<8xf32> to vector<8x1xf32>
    %43 = vector.broadcast %42 : vector<8x1xf32> to vector<8x8xf32>
    %44 = arith.subf %40, %43 : vector<8x8xf32>
    %45 = math.exp %44 : vector<8x8xf32>
    %cst_40 = arith.constant dense<0.000000e+00> : vector<8xf32>
    %46 = vector.multi_reduction <add>, %45, %cst_40 [1] : vector<8x8xf32> to vector<8xf32>
    %47 = vector.shape_cast %46 : vector<8xf32> to vector<8x1xf32>
    %48 = tpu.reciprocal %47 : vector<8x1xf32> -> vector<8x1xf32>
    %49 = vector.broadcast %48 : vector<8x1xf32> to vector<8x8xf32>
    %50 = arith.mulf %45, %49 : vector<8x8xf32>
    %51 = vector.extract_strided_slice %34 {offsets = [0, 0], sizes = [8, 8], strides = [1, 1]} : vector<8x32xf32> to vector<8x8xf32>
    %cst_41 = arith.constant dense<0.000000e+00> : vector<8x8xf32>
    %52 = tpu.matmul %50, %51, %cst_41 {dimension_numbers = #tpu.dot_dimension_numbers<[1], [0], [0], [1], [0, 0, 1, 1], [], []>} : vector<8x8xf32>, vector<8x8xf32>, vector<8x8xf32> -> vector<8x8xf32>
    %53 = vector.extract_strided_slice %37 {offsets = [0, 0], sizes = [32, 8], strides = [1, 1]} : vector<32x32xf32> to vector<32x8xf32>
    %cst_42 = arith.constant dense<0.000000e+00> : vector<8x32xf32>
    %54 = tpu.matmul %52, %53, %cst_42 {dimension_numbers = #tpu.dot_dimension_numbers<[1], [1], [0], [0], [0, 0, 1, 0], [], []>} : vector<8x8xf32>, vector<32x8xf32>, vector<8x32xf32> -> vector<8x32xf32>
    %55 = vector.extract_strided_slice %36 {offsets = [0, 8], sizes = [8, 8], strides = [1, 1]} : vector<8x32xf32> to vector<8x8xf32>
    %56 = vector.extract_strided_slice %29 {offsets = [0, 8], sizes = [8, 8], strides = [1, 1]} : vector<8x32xf32> to vector<8x8xf32>
    %cst_43 = arith.constant dense<0.000000e+00> : vector<8x8xf32>
    %57 = tpu.matmul %55, %56, %cst_43 {dimension_numbers = #tpu.dot_dimension_numbers<[1], [1], [0], [0], [0, 0, 1, 0], [], []>} : vector<8x8xf32>, vector<8x8xf32>, vector<8x8xf32> -> vector<8x8xf32>
    %cst_44 = arith.constant dense<0xFF800000> : vector<8xf32>
    %58 = vector.multi_reduction <maximumf>, %57, %cst_44 [1] : vector<8x8xf32> to vector<8xf32>
    %59 = vector.shape_cast %58 : vector<8xf32> to vector<8x1xf32>
    %60 = vector.broadcast %59 : vector<8x1xf32> to vector<8x8xf32>
    %61 = arith.subf %57, %60 : vector<8x8xf32>
    %62 = math.exp %61 : vector<8x8xf32>
    %cst_45 = arith.constant dense<0.000000e+00> : vector<8xf32>
    %63 = vector.multi_reduction <add>, %62, %cst_45 [1] : vector<8x8xf32> to vector<8xf32>
    %64 = vector.shape_cast %63 : vector<8xf32> to vector<8x1xf32>
    %65 = tpu.reciprocal %64 : vector<8x1xf32> -> vector<8x1xf32>
    %66 = vector.broadcast %65 : vector<8x1xf32> to vector<8x8xf32>
    %67 = arith.mulf %62, %66 : vector<8x8xf32>
    %68 = vector.extract_strided_slice %34 {offsets = [0, 8], sizes = [8, 8], strides = [1, 1]} : vector<8x32xf32> to vector<8x8xf32>
    %cst_46 = arith.constant dense<0.000000e+00> : vector<8x8xf32>
    %69 = tpu.matmul %67, %68, %cst_46 {dimension_numbers = #tpu.dot_dimension_numbers<[1], [0], [0], [1], [0, 0, 1, 1], [], []>} : vector<8x8xf32>, vector<8x8xf32>, vector<8x8xf32> -> vector<8x8xf32>
    %70 = vector.extract_strided_slice %37 {offsets = [0, 8], sizes = [32, 8], strides = [1, 1]} : vector<32x32xf32> to vector<32x8xf32>
    %cst_47 = arith.constant dense<0.000000e+00> : vector<8x32xf32>
    %71 = tpu.matmul %69, %70, %cst_47 {dimension_numbers = #tpu.dot_dimension_numbers<[1], [1], [0], [0], [0, 0, 1, 0], [], []>} : vector<8x8xf32>, vector<32x8xf32>, vector<8x32xf32> -> vector<8x32xf32>
    %72 = arith.addf %54, %71 : vector<8x32xf32>
    %73 = vector.extract_strided_slice %36 {offsets = [0, 16], sizes = [8, 8], strides = [1, 1]} : vector<8x32xf32> to vector<8x8xf32>
    %74 = vector.extract_strided_slice %29 {offsets = [0, 16], sizes = [8, 8], strides = [1, 1]} : vector<8x32xf32> to vector<8x8xf32>
    %cst_48 = arith.constant dense<0.000000e+00> : vector<8x8xf32>
    %75 = tpu.matmul %73, %74, %cst_48 {dimension_numbers = #tpu.dot_dimension_numbers<[1], [1], [0], [0], [0, 0, 1, 0], [], []>} : vector<8x8xf32>, vector<8x8xf32>, vector<8x8xf32> -> vector<8x8xf32>
    %cst_49 = arith.constant dense<0xFF800000> : vector<8xf32>
    %76 = vector.multi_reduction <maximumf>, %75, %cst_49 [1] : vector<8x8xf32> to vector<8xf32>
    %77 = vector.shape_cast %76 : vector<8xf32> to vector<8x1xf32>
    %78 = vector.broadcast %77 : vector<8x1xf32> to vector<8x8xf32>
    %79 = arith.subf %75, %78 : vector<8x8xf32>
    %80 = math.exp %79 : vector<8x8xf32>
    %cst_50 = arith.constant dense<0.000000e+00> : vector<8xf32>
    %81 = vector.multi_reduction <add>, %80, %cst_50 [1] : vector<8x8xf32> to vector<8xf32>
    %82 = vector.shape_cast %81 : vector<8xf32> to vector<8x1xf32>
    %83 = tpu.reciprocal %82 : vector<8x1xf32> -> vector<8x1xf32>
    %84 = vector.broadcast %83 : vector<8x1xf32> to vector<8x8xf32>
    %85 = arith.mulf %80, %84 : vector<8x8xf32>
    %86 = vector.extract_strided_slice %34 {offsets = [0, 16], sizes = [8, 8], strides = [1, 1]} : vector<8x32xf32> to vector<8x8xf32>
    %cst_51 = arith.constant dense<0.000000e+00> : vector<8x8xf32>
    %87 = tpu.matmul %85, %86, %cst_51 {dimension_numbers = #tpu.dot_dimension_numbers<[1], [0], [0], [1], [0, 0, 1, 1], [], []>} : vector<8x8xf32>, vector<8x8xf32>, vector<8x8xf32> -> vector<8x8xf32>
    %88 = vector.extract_strided_slice %37 {offsets = [0, 16], sizes = [32, 8], strides = [1, 1]} : vector<32x32xf32> to vector<32x8xf32>
    %cst_52 = arith.constant dense<0.000000e+00> : vector<8x32xf32>
    %89 = tpu.matmul %87, %88, %cst_52 {dimension_numbers = #tpu.dot_dimension_numbers<[1], [1], [0], [0], [0, 0, 1, 0], [], []>} : vector<8x8xf32>, vector<32x8xf32>, vector<8x32xf32> -> vector<8x32xf32>
    %90 = arith.addf %72, %89 : vector<8x32xf32>
    %91 = vector.extract_strided_slice %36 {offsets = [0, 24], sizes = [8, 8], strides = [1, 1]} : vector<8x32xf32> to vector<8x8xf32>
    %92 = vector.extract_strided_slice %29 {offsets = [0, 24], sizes = [8, 8], strides = [1, 1]} : vector<8x32xf32> to vector<8x8xf32>
    %cst_53 = arith.constant dense<0.000000e+00> : vector<8x8xf32>
    %93 = tpu.matmul %91, %92, %cst_53 {dimension_numbers = #tpu.dot_dimension_numbers<[1], [1], [0], [0], [0, 0, 1, 0], [], []>} : vector<8x8xf32>, vector<8x8xf32>, vector<8x8xf32> -> vector<8x8xf32>
    %cst_54 = arith.constant dense<0xFF800000> : vector<8xf32>
    %94 = vector.multi_reduction <maximumf>, %93, %cst_54 [1] : vector<8x8xf32> to vector<8xf32>
    %95 = vector.shape_cast %94 : vector<8xf32> to vector<8x1xf32>
    %96 = vector.broadcast %95 : vector<8x1xf32> to vector<8x8xf32>
    %97 = arith.subf %93, %96 : vector<8x8xf32>
    %98 = math.exp %97 : vector<8x8xf32>
    %cst_55 = arith.constant dense<0.000000e+00> : vector<8xf32>
    %99 = vector.multi_reduction <add>, %98, %cst_55 [1] : vector<8x8xf32> to vector<8xf32>
    %100 = vector.shape_cast %99 : vector<8xf32> to vector<8x1xf32>
    %101 = tpu.reciprocal %100 : vector<8x1xf32> -> vector<8x1xf32>
    %102 = vector.broadcast %101 : vector<8x1xf32> to vector<8x8xf32>
    %103 = arith.mulf %98, %102 : vector<8x8xf32>
    %104 = vector.extract_strided_slice %34 {offsets = [0, 24], sizes = [8, 8], strides = [1, 1]} : vector<8x32xf32> to vector<8x8xf32>
    %cst_56 = arith.constant dense<0.000000e+00> : vector<8x8xf32>
    %105 = tpu.matmul %103, %104, %cst_56 {dimension_numbers = #tpu.dot_dimension_numbers<[1], [0], [0], [1], [0, 0, 1, 1], [], []>} : vector<8x8xf32>, vector<8x8xf32>, vector<8x8xf32> -> vector<8x8xf32>
    %106 = vector.extract_strided_slice %37 {offsets = [0, 24], sizes = [32, 8], strides = [1, 1]} : vector<32x32xf32> to vector<32x8xf32>
    %cst_57 = arith.constant dense<0.000000e+00> : vector<8x32xf32>
    %107 = tpu.matmul %105, %106, %cst_57 {dimension_numbers = #tpu.dot_dimension_numbers<[1], [1], [0], [0], [0, 0, 1, 0], [], []>} : vector<8x8xf32>, vector<32x8xf32>, vector<8x32xf32> -> vector<8x32xf32>
    %108 = arith.addf %90, %107 : vector<8x32xf32>
    %c0_58 = arith.constant 0 : index
    %c0_59 = arith.constant 0 : index
    %109 = vector.load %arg17[%c0_58, %c0_59] : memref<1x32xf32, #tpu.memory_space<vmem>>, vector<1x32xf32>
    %110 = vector.broadcast %109 : vector<1x32xf32> to vector<8x32xf32>
    %111 = arith.addf %108, %110 : vector<8x32xf32>
    %112 = arith.addf %1, %111 : vector<8x32xf32>
    %cst_60 = arith.constant dense<0.000000e+00> : vector<8xf32>
    %113 = vector.multi_reduction <add>, %112, %cst_60 [1] : vector<8x32xf32> to vector<8xf32>
    %114 = vector.shape_cast %113 : vector<8xf32> to vector<8x1xf32>
    %cst_61 = arith.constant 3.200000e+01 : f32
    %115 = vector.broadcast %cst_61 : f32 to vector<8x1xf32>
    %116 = arith.divf %114, %115 : vector<8x1xf32>
    %117 = vector.broadcast %116 : vector<8x1xf32> to vector<8x32xf32>
    %118 = arith.subf %112, %117 : vector<8x32xf32>
    %119 = arith.mulf %118, %118 : vector<8x32xf32>
    %cst_62 = arith.constant dense<0.000000e+00> : vector<8xf32>
    %120 = vector.multi_reduction <add>, %119, %cst_62 [1] : vector<8x32xf32> to vector<8xf32>
    %121 = vector.shape_cast %120 : vector<8xf32> to vector<8x1xf32>
    %cst_63 = arith.constant 3.200000e+01 : f32
    %122 = vector.broadcast %cst_63 : f32 to vector<8x1xf32>
    %123 = arith.divf %121, %122 : vector<8x1xf32>
    %124 = vector.broadcast %116 : vector<8x1xf32> to vector<8x32xf32>
    %125 = arith.subf %112, %124 : vector<8x32xf32>
    %cst_64 = arith.constant 9.99999974E-6 : f32
    %126 = vector.broadcast %cst_64 : f32 to vector<8x1xf32>
    %127 = arith.addf %123, %126 : vector<8x1xf32>
    %128 = math.rsqrt %127 : vector<8x1xf32>
    %129 = vector.broadcast %128 : vector<8x1xf32> to vector<8x32xf32>
    %130 = arith.mulf %125, %129 : vector<8x32xf32>
    %c0_65 = arith.constant 0 : index
    %c0_66 = arith.constant 0 : index
    %131 = vector.load %arg18[%c0_65, %c0_66] : memref<1x32xf32, #tpu.memory_space<vmem>>, vector<1x32xf32>
    %132 = vector.broadcast %131 : vector<1x32xf32> to vector<8x32xf32>
    %133 = arith.mulf %130, %132 : vector<8x32xf32>
    %c0_67 = arith.constant 0 : index
    %c0_68 = arith.constant 0 : index
    %134 = vector.load %arg19[%c0_67, %c0_68] : memref<1x32xf32, #tpu.memory_space<vmem>>, vector<1x32xf32>
    %135 = vector.broadcast %134 : vector<1x32xf32> to vector<8x32xf32>
    %136 = arith.addf %133, %135 : vector<8x32xf32>
    %c0_69 = arith.constant 0 : index
    %c0_70 = arith.constant 0 : index
    %137 = vector.load %arg20[%c0_69, %c0_70] : memref<32x32xf32, #tpu.memory_space<vmem>>, vector<32x32xf32>
    %cst_71 = arith.constant dense<0.000000e+00> : vector<8x32xf32>
    %138 = tpu.matmul %136, %137, %cst_71 {dimension_numbers = #tpu.dot_dimension_numbers<[1], [1], [0], [0], [0, 0, 1, 0], [], []>} : vector<8x32xf32>, vector<32x32xf32>, vector<8x32xf32> -> vector<8x32xf32>
    %c0_72 = arith.constant 0 : index
    %c0_73 = arith.constant 0 : index
    %139 = vector.load %arg21[%c0_72, %c0_73] : memref<1x32xf32, #tpu.memory_space<vmem>>, vector<1x32xf32>
    %140 = vector.broadcast %139 : vector<1x32xf32> to vector<8x32xf32>
    %141 = arith.addf %138, %140 : vector<8x32xf32>
    %c0_74 = arith.constant 0 : index
    %c0_75 = arith.constant 0 : index
    %142 = vector.load %arg24[%c0_74, %c0_75] : memref<32x32xf32, #tpu.memory_space<vmem>>, vector<32x32xf32>
    %cst_76 = arith.constant dense<0.000000e+00> : vector<16x32xf32>
    %143 = tpu.matmul %5, %142, %cst_76 {dimension_numbers = #tpu.dot_dimension_numbers<[1], [1], [0], [0], [0, 0, 1, 0], [], []>} : vector<16x32xf32>, vector<32x32xf32>, vector<16x32xf32> -> vector<16x32xf32>
    %c0_77 = arith.constant 0 : index
    %c0_78 = arith.constant 0 : index
    %144 = vector.load %arg25[%c0_77, %c0_78] : memref<1x32xf32, #tpu.memory_space<vmem>>, vector<1x32xf32>
    %145 = vector.broadcast %144 : vector<1x32xf32> to vector<16x32xf32>
    %146 = arith.addf %143, %145 : vector<16x32xf32>
    %c0_79 = arith.constant 0 : index
    %c0_80 = arith.constant 0 : index
    %147 = vector.load %arg28[%c0_79, %c0_80] : memref<32x32xf32, #tpu.memory_space<vmem>>, vector<32x32xf32>
    %cst_81 = arith.constant dense<0.000000e+00> : vector<16x32xf32>
    %148 = tpu.matmul %5, %147, %cst_81 {dimension_numbers = #tpu.dot_dimension_numbers<[1], [1], [0], [0], [0, 0, 1, 0], [], []>} : vector<16x32xf32>, vector<32x32xf32>, vector<16x32xf32> -> vector<16x32xf32>
    %c0_82 = arith.constant 0 : index
    %c0_83 = arith.constant 0 : index
    %149 = vector.load %arg29[%c0_82, %c0_83] : memref<1x32xf32, #tpu.memory_space<vmem>>, vector<1x32xf32>
    %150 = vector.broadcast %149 : vector<1x32xf32> to vector<16x32xf32>
    %151 = arith.addf %148, %150 : vector<16x32xf32>
    %c0_84 = arith.constant 0 : index
    %c0_85 = arith.constant 0 : index
    %152 = vector.load %arg26[%c0_84, %c0_85] : memref<32x32xf32, #tpu.memory_space<vmem>>, vector<32x32xf32>
    %cst_86 = arith.constant dense<0.000000e+00> : vector<16x32xf32>
    %153 = tpu.matmul %7, %152, %cst_86 {dimension_numbers = #tpu.dot_dimension_numbers<[1], [1], [0], [0], [0, 0, 1, 0], [], []>} : vector<16x32xf32>, vector<32x32xf32>, vector<16x32xf32> -> vector<16x32xf32>
    %c0_87 = arith.constant 0 : index
    %c0_88 = arith.constant 0 : index
    %154 = vector.load %arg27[%c0_87, %c0_88] : memref<1x32xf32, #tpu.memory_space<vmem>>, vector<1x32xf32>
    %155 = vector.broadcast %154 : vector<1x32xf32> to vector<16x32xf32>
    %156 = arith.addf %153, %155 : vector<16x32xf32>
    %c0_89 = arith.constant 0 : index
    %c0_90 = arith.constant 0 : index
    %157 = vector.load %arg22[%c0_89, %c0_90] : memref<32x32xf32, #tpu.memory_space<vmem>>, vector<32x32xf32>
    %cst_91 = arith.constant dense<0.000000e+00> : vector<8x32xf32>
    %158 = tpu.matmul %3, %157, %cst_91 {dimension_numbers = #tpu.dot_dimension_numbers<[1], [1], [0], [0], [0, 0, 1, 0], [], []>} : vector<8x32xf32>, vector<32x32xf32>, vector<8x32xf32> -> vector<8x32xf32>
    %c0_92 = arith.constant 0 : index
    %c0_93 = arith.constant 0 : index
    %159 = vector.load %arg23[%c0_92, %c0_93] : memref<1x32xf32, #tpu.memory_space<vmem>>, vector<1x32xf32>
    %160 = vector.broadcast %159 : vector<1x32xf32> to vector<8x32xf32>
    %161 = arith.addf %158, %160 : vector<8x32xf32>
    %162 = arith.addf %141, %161 : vector<8x32xf32>
    %163 = arith.addf %146, %156 : vector<16x32xf32>
    %c0_94 = arith.constant 0 : index
    %c0_95 = arith.constant 0 : index
    %c0_96 = arith.constant 0 : index
    %164 = vector.load %arg3[%c0_94, %c0_95, %c0_96] : memref<1x8x32xf32, #tpu.memory_space<vmem>>, vector<1x8x32xf32>
    %165 = vector.shape_cast %164 : vector<1x8x32xf32> to vector<8x32xf32>
    %c0_97 = arith.constant 0 : index
    %c0_98 = arith.constant 0 : index
    %166 = vector.load %arg30[%c0_97, %c0_98] : memref<32x32xf32, #tpu.memory_space<vmem>>, vector<32x32xf32>
    %cst_99 = arith.constant dense<0.000000e+00> : vector<8x32xf32>
    %167 = tpu.matmul %165, %166, %cst_99 {dimension_numbers = #tpu.dot_dimension_numbers<[1], [1], [0], [0], [0, 0, 1, 0], [], []>} : vector<8x32xf32>, vector<32x32xf32>, vector<8x32xf32> -> vector<8x32xf32>
    %c0_100 = arith.constant 0 : index
    %c0_101 = arith.constant 0 : index
    %168 = vector.load %arg31[%c0_100, %c0_101] : memref<1x32xf32, #tpu.memory_space<vmem>>, vector<1x32xf32>
    %169 = vector.broadcast %168 : vector<1x32xf32> to vector<8x32xf32>
    %170 = arith.addf %167, %169 : vector<8x32xf32>
    %cst_102 = arith.constant 2.500000e-01 : f32
    %171 = vector.broadcast %cst_102 : f32 to vector<8x32xf32>
    %172 = arith.mulf %162, %171 : vector<8x32xf32>
    %cst_103 = arith.constant 2.500000e-01 : f32
    %173 = vector.broadcast %cst_103 : f32 to vector<8x32xf32>
    %174 = arith.mulf %170, %173 : vector<8x32xf32>
    %c0_104 = arith.constant 0 : index
    %c0_105 = arith.constant 0 : index
    %175 = vector.load %arg32[%c0_104, %c0_105] : memref<32x32xf32, #tpu.memory_space<vmem>>, vector<32x32xf32>
    %176 = vector.extract_strided_slice %172 {offsets = [0, 0], sizes = [8, 8], strides = [1, 1]} : vector<8x32xf32> to vector<8x8xf32>
    %177 = vector.extract_strided_slice %163 {offsets = [0, 0], sizes = [16, 8], strides = [1, 1]} : vector<16x32xf32> to vector<16x8xf32>
    %cst_106 = arith.constant dense<0.000000e+00> : vector<8x16xf32>
    %178 = tpu.matmul %176, %177, %cst_106 {dimension_numbers = #tpu.dot_dimension_numbers<[1], [1], [0], [0], [0, 0, 1, 0], [], []>} : vector<8x8xf32>, vector<16x8xf32>, vector<8x16xf32> -> vector<8x16xf32>
    %179 = vector.extract_strided_slice %174 {offsets = [0, 0], sizes = [8, 8], strides = [1, 1]} : vector<8x32xf32> to vector<8x8xf32>
    %180 = vector.extract_strided_slice %156 {offsets = [0, 0], sizes = [16, 8], strides = [1, 1]} : vector<16x32xf32> to vector<16x8xf32>
    %cst_107 = arith.constant dense<0.000000e+00> : vector<8x16xf32>
    %181 = tpu.matmul %179, %180, %cst_107 {dimension_numbers = #tpu.dot_dimension_numbers<[1], [1], [0], [0], [0, 0, 1, 0], [], []>} : vector<8x8xf32>, vector<16x8xf32>, vector<8x16xf32> -> vector<8x16xf32>
    %182 = arith.addf %178, %181 : vector<8x16xf32>
    %cst_108 = arith.constant dense<0xFF800000> : vector<8xf32>
    %183 = vector.multi_reduction <maximumf>, %182, %cst_108 [1] : vector<8x16xf32> to vector<8xf32>
    %184 = vector.shape_cast %183 : vector<8xf32> to vector<8x1xf32>
    %185 = vector.broadcast %184 : vector<8x1xf32> to vector<8x16xf32>
    %186 = arith.subf %182, %185 : vector<8x16xf32>
    %187 = math.exp %186 : vector<8x16xf32>
    %cst_109 = arith.constant dense<0.000000e+00> : vector<8xf32>
    %188 = vector.multi_reduction <add>, %187, %cst_109 [1] : vector<8x16xf32> to vector<8xf32>
    %189 = vector.shape_cast %188 : vector<8xf32> to vector<8x1xf32>
    %190 = tpu.reciprocal %189 : vector<8x1xf32> -> vector<8x1xf32>
    %191 = vector.broadcast %190 : vector<8x1xf32> to vector<8x16xf32>
    %192 = arith.mulf %187, %191 : vector<8x16xf32>
    %193 = vector.extract_strided_slice %151 {offsets = [0, 0], sizes = [16, 8], strides = [1, 1]} : vector<16x32xf32> to vector<16x8xf32>
    %cst_110 = arith.constant dense<0.000000e+00> : vector<8x8xf32>
    %194 = tpu.matmul %192, %193, %cst_110 {dimension_numbers = #tpu.dot_dimension_numbers<[1], [0], [0], [1], [0, 0, 1, 1], [], []>} : vector<8x16xf32>, vector<16x8xf32>, vector<8x8xf32> -> vector<8x8xf32>
    %195 = vector.extract_strided_slice %175 {offsets = [0, 0], sizes = [32, 8], strides = [1, 1]} : vector<32x32xf32> to vector<32x8xf32>
    %cst_111 = arith.constant dense<0.000000e+00> : vector<8x32xf32>
    %196 = tpu.matmul %194, %195, %cst_111 {dimension_numbers = #tpu.dot_dimension_numbers<[1], [1], [0], [0], [0, 0, 1, 0], [], []>} : vector<8x8xf32>, vector<32x8xf32>, vector<8x32xf32> -> vector<8x32xf32>
    %197 = vector.extract_strided_slice %172 {offsets = [0, 8], sizes = [8, 8], strides = [1, 1]} : vector<8x32xf32> to vector<8x8xf32>
    %198 = vector.extract_strided_slice %163 {offsets = [0, 8], sizes = [16, 8], strides = [1, 1]} : vector<16x32xf32> to vector<16x8xf32>
    %cst_112 = arith.constant dense<0.000000e+00> : vector<8x16xf32>
    %199 = tpu.matmul %197, %198, %cst_112 {dimension_numbers = #tpu.dot_dimension_numbers<[1], [1], [0], [0], [0, 0, 1, 0], [], []>} : vector<8x8xf32>, vector<16x8xf32>, vector<8x16xf32> -> vector<8x16xf32>
    %200 = vector.extract_strided_slice %174 {offsets = [0, 8], sizes = [8, 8], strides = [1, 1]} : vector<8x32xf32> to vector<8x8xf32>
    %201 = vector.extract_strided_slice %156 {offsets = [0, 8], sizes = [16, 8], strides = [1, 1]} : vector<16x32xf32> to vector<16x8xf32>
    %cst_113 = arith.constant dense<0.000000e+00> : vector<8x16xf32>
    %202 = tpu.matmul %200, %201, %cst_113 {dimension_numbers = #tpu.dot_dimension_numbers<[1], [1], [0], [0], [0, 0, 1, 0], [], []>} : vector<8x8xf32>, vector<16x8xf32>, vector<8x16xf32> -> vector<8x16xf32>
    %203 = arith.addf %199, %202 : vector<8x16xf32>
    %cst_114 = arith.constant dense<0xFF800000> : vector<8xf32>
    %204 = vector.multi_reduction <maximumf>, %203, %cst_114 [1] : vector<8x16xf32> to vector<8xf32>
    %205 = vector.shape_cast %204 : vector<8xf32> to vector<8x1xf32>
    %206 = vector.broadcast %205 : vector<8x1xf32> to vector<8x16xf32>
    %207 = arith.subf %203, %206 : vector<8x16xf32>
    %208 = math.exp %207 : vector<8x16xf32>
    %cst_115 = arith.constant dense<0.000000e+00> : vector<8xf32>
    %209 = vector.multi_reduction <add>, %208, %cst_115 [1] : vector<8x16xf32> to vector<8xf32>
    %210 = vector.shape_cast %209 : vector<8xf32> to vector<8x1xf32>
    %211 = tpu.reciprocal %210 : vector<8x1xf32> -> vector<8x1xf32>
    %212 = vector.broadcast %211 : vector<8x1xf32> to vector<8x16xf32>
    %213 = arith.mulf %208, %212 : vector<8x16xf32>
    %214 = vector.extract_strided_slice %151 {offsets = [0, 8], sizes = [16, 8], strides = [1, 1]} : vector<16x32xf32> to vector<16x8xf32>
    %cst_116 = arith.constant dense<0.000000e+00> : vector<8x8xf32>
    %215 = tpu.matmul %213, %214, %cst_116 {dimension_numbers = #tpu.dot_dimension_numbers<[1], [0], [0], [1], [0, 0, 1, 1], [], []>} : vector<8x16xf32>, vector<16x8xf32>, vector<8x8xf32> -> vector<8x8xf32>
    %216 = vector.extract_strided_slice %175 {offsets = [0, 8], sizes = [32, 8], strides = [1, 1]} : vector<32x32xf32> to vector<32x8xf32>
    %cst_117 = arith.constant dense<0.000000e+00> : vector<8x32xf32>
    %217 = tpu.matmul %215, %216, %cst_117 {dimension_numbers = #tpu.dot_dimension_numbers<[1], [1], [0], [0], [0, 0, 1, 0], [], []>} : vector<8x8xf32>, vector<32x8xf32>, vector<8x32xf32> -> vector<8x32xf32>
    %218 = arith.addf %196, %217 : vector<8x32xf32>
    %219 = vector.extract_strided_slice %172 {offsets = [0, 16], sizes = [8, 8], strides = [1, 1]} : vector<8x32xf32> to vector<8x8xf32>
    %220 = vector.extract_strided_slice %163 {offsets = [0, 16], sizes = [16, 8], strides = [1, 1]} : vector<16x32xf32> to vector<16x8xf32>
    %cst_118 = arith.constant dense<0.000000e+00> : vector<8x16xf32>
    %221 = tpu.matmul %219, %220, %cst_118 {dimension_numbers = #tpu.dot_dimension_numbers<[1], [1], [0], [0], [0, 0, 1, 0], [], []>} : vector<8x8xf32>, vector<16x8xf32>, vector<8x16xf32> -> vector<8x16xf32>
    %222 = vector.extract_strided_slice %174 {offsets = [0, 16], sizes = [8, 8], strides = [1, 1]} : vector<8x32xf32> to vector<8x8xf32>
    %223 = vector.extract_strided_slice %156 {offsets = [0, 16], sizes = [16, 8], strides = [1, 1]} : vector<16x32xf32> to vector<16x8xf32>
    %cst_119 = arith.constant dense<0.000000e+00> : vector<8x16xf32>
    %224 = tpu.matmul %222, %223, %cst_119 {dimension_numbers = #tpu.dot_dimension_numbers<[1], [1], [0], [0], [0, 0, 1, 0], [], []>} : vector<8x8xf32>, vector<16x8xf32>, vector<8x16xf32> -> vector<8x16xf32>
    %225 = arith.addf %221, %224 : vector<8x16xf32>
    %cst_120 = arith.constant dense<0xFF800000> : vector<8xf32>
    %226 = vector.multi_reduction <maximumf>, %225, %cst_120 [1] : vector<8x16xf32> to vector<8xf32>
    %227 = vector.shape_cast %226 : vector<8xf32> to vector<8x1xf32>
    %228 = vector.broadcast %227 : vector<8x1xf32> to vector<8x16xf32>
    %229 = arith.subf %225, %228 : vector<8x16xf32>
    %230 = math.exp %229 : vector<8x16xf32>
    %cst_121 = arith.constant dense<0.000000e+00> : vector<8xf32>
    %231 = vector.multi_reduction <add>, %230, %cst_121 [1] : vector<8x16xf32> to vector<8xf32>
    %232 = vector.shape_cast %231 : vector<8xf32> to vector<8x1xf32>
    %233 = tpu.reciprocal %232 : vector<8x1xf32> -> vector<8x1xf32>
    %234 = vector.broadcast %233 : vector<8x1xf32> to vector<8x16xf32>
    %235 = arith.mulf %230, %234 : vector<8x16xf32>
    %236 = vector.extract_strided_slice %151 {offsets = [0, 16], sizes = [16, 8], strides = [1, 1]} : vector<16x32xf32> to vector<16x8xf32>
    %cst_122 = arith.constant dense<0.000000e+00> : vector<8x8xf32>
    %237 = tpu.matmul %235, %236, %cst_122 {dimension_numbers = #tpu.dot_dimension_numbers<[1], [0], [0], [1], [0, 0, 1, 1], [], []>} : vector<8x16xf32>, vector<16x8xf32>, vector<8x8xf32> -> vector<8x8xf32>
    %238 = vector.extract_strided_slice %175 {offsets = [0, 16], sizes = [32, 8], strides = [1, 1]} : vector<32x32xf32> to vector<32x8xf32>
    %cst_123 = arith.constant dense<0.000000e+00> : vector<8x32xf32>
    %239 = tpu.matmul %237, %238, %cst_123 {dimension_numbers = #tpu.dot_dimension_numbers<[1], [1], [0], [0], [0, 0, 1, 0], [], []>} : vector<8x8xf32>, vector<32x8xf32>, vector<8x32xf32> -> vector<8x32xf32>
    %240 = arith.addf %218, %239 : vector<8x32xf32>
    %241 = vector.extract_strided_slice %172 {offsets = [0, 24], sizes = [8, 8], strides = [1, 1]} : vector<8x32xf32> to vector<8x8xf32>
    %242 = vector.extract_strided_slice %163 {offsets = [0, 24], sizes = [16, 8], strides = [1, 1]} : vector<16x32xf32> to vector<16x8xf32>
    %cst_124 = arith.constant dense<0.000000e+00> : vector<8x16xf32>
    %243 = tpu.matmul %241, %242, %cst_124 {dimension_numbers = #tpu.dot_dimension_numbers<[1], [1], [0], [0], [0, 0, 1, 0], [], []>} : vector<8x8xf32>, vector<16x8xf32>, vector<8x16xf32> -> vector<8x16xf32>
    %244 = vector.extract_strided_slice %174 {offsets = [0, 24], sizes = [8, 8], strides = [1, 1]} : vector<8x32xf32> to vector<8x8xf32>
    %245 = vector.extract_strided_slice %156 {offsets = [0, 24], sizes = [16, 8], strides = [1, 1]} : vector<16x32xf32> to vector<16x8xf32>
    %cst_125 = arith.constant dense<0.000000e+00> : vector<8x16xf32>
    %246 = tpu.matmul %244, %245, %cst_125 {dimension_numbers = #tpu.dot_dimension_numbers<[1], [1], [0], [0], [0, 0, 1, 0], [], []>} : vector<8x8xf32>, vector<16x8xf32>, vector<8x16xf32> -> vector<8x16xf32>
    %247 = arith.addf %243, %246 : vector<8x16xf32>
    %cst_126 = arith.constant dense<0xFF800000> : vector<8xf32>
    %248 = vector.multi_reduction <maximumf>, %247, %cst_126 [1] : vector<8x16xf32> to vector<8xf32>
    %249 = vector.shape_cast %248 : vector<8xf32> to vector<8x1xf32>
    %250 = vector.broadcast %249 : vector<8x1xf32> to vector<8x16xf32>
    %251 = arith.subf %247, %250 : vector<8x16xf32>
    %252 = math.exp %251 : vector<8x16xf32>
    %cst_127 = arith.constant dense<0.000000e+00> : vector<8xf32>
    %253 = vector.multi_reduction <add>, %252, %cst_127 [1] : vector<8x16xf32> to vector<8xf32>
    %254 = vector.shape_cast %253 : vector<8xf32> to vector<8x1xf32>
    %255 = tpu.reciprocal %254 : vector<8x1xf32> -> vector<8x1xf32>
    %256 = vector.broadcast %255 : vector<8x1xf32> to vector<8x16xf32>
    %257 = arith.mulf %252, %256 : vector<8x16xf32>
    %258 = vector.extract_strided_slice %151 {offsets = [0, 24], sizes = [16, 8], strides = [1, 1]} : vector<16x32xf32> to vector<16x8xf32>
    %cst_128 = arith.constant dense<0.000000e+00> : vector<8x8xf32>
    %259 = tpu.matmul %257, %258, %cst_128 {dimension_numbers = #tpu.dot_dimension_numbers<[1], [0], [0], [1], [0, 0, 1, 1], [], []>} : vector<8x16xf32>, vector<16x8xf32>, vector<8x8xf32> -> vector<8x8xf32>
    %260 = vector.extract_strided_slice %175 {offsets = [0, 24], sizes = [32, 8], strides = [1, 1]} : vector<32x32xf32> to vector<32x8xf32>
    %cst_129 = arith.constant dense<0.000000e+00> : vector<8x32xf32>
    %261 = tpu.matmul %259, %260, %cst_129 {dimension_numbers = #tpu.dot_dimension_numbers<[1], [1], [0], [0], [0, 0, 1, 0], [], []>} : vector<8x8xf32>, vector<32x8xf32>, vector<8x32xf32> -> vector<8x32xf32>
    %262 = arith.addf %240, %261 : vector<8x32xf32>
    %c0_130 = arith.constant 0 : index
    %c0_131 = arith.constant 0 : index
    %263 = vector.load %arg33[%c0_130, %c0_131] : memref<1x32xf32, #tpu.memory_space<vmem>>, vector<1x32xf32>
    %264 = vector.broadcast %263 : vector<1x32xf32> to vector<8x32xf32>
    %265 = arith.addf %262, %264 : vector<8x32xf32>
    %266 = arith.addf %136, %265 : vector<8x32xf32>
    %cst_132 = arith.constant dense<0.000000e+00> : vector<8xf32>
    %267 = vector.multi_reduction <add>, %266, %cst_132 [1] : vector<8x32xf32> to vector<8xf32>
    %268 = vector.shape_cast %267 : vector<8xf32> to vector<8x1xf32>
    %cst_133 = arith.constant 3.200000e+01 : f32
    %269 = vector.broadcast %cst_133 : f32 to vector<8x1xf32>
    %270 = arith.divf %268, %269 : vector<8x1xf32>
    %271 = vector.broadcast %270 : vector<8x1xf32> to vector<8x32xf32>
    %272 = arith.subf %266, %271 : vector<8x32xf32>
    %273 = arith.mulf %272, %272 : vector<8x32xf32>
    %cst_134 = arith.constant dense<0.000000e+00> : vector<8xf32>
    %274 = vector.multi_reduction <add>, %273, %cst_134 [1] : vector<8x32xf32> to vector<8xf32>
    %275 = vector.shape_cast %274 : vector<8xf32> to vector<8x1xf32>
    %cst_135 = arith.constant 3.200000e+01 : f32
    %276 = vector.broadcast %cst_135 : f32 to vector<8x1xf32>
    %277 = arith.divf %275, %276 : vector<8x1xf32>
    %278 = vector.broadcast %270 : vector<8x1xf32> to vector<8x32xf32>
    %279 = arith.subf %266, %278 : vector<8x32xf32>
    %cst_136 = arith.constant 9.99999974E-6 : f32
    %280 = vector.broadcast %cst_136 : f32 to vector<8x1xf32>
    %281 = arith.addf %277, %280 : vector<8x1xf32>
    %282 = math.rsqrt %281 : vector<8x1xf32>
    %283 = vector.broadcast %282 : vector<8x1xf32> to vector<8x32xf32>
    %284 = arith.mulf %279, %283 : vector<8x32xf32>
    %c0_137 = arith.constant 0 : index
    %c0_138 = arith.constant 0 : index
    %285 = vector.load %arg34[%c0_137, %c0_138] : memref<1x32xf32, #tpu.memory_space<vmem>>, vector<1x32xf32>
    %286 = vector.broadcast %285 : vector<1x32xf32> to vector<8x32xf32>
    %287 = arith.mulf %284, %286 : vector<8x32xf32>
    %c0_139 = arith.constant 0 : index
    %c0_140 = arith.constant 0 : index
    %288 = vector.load %arg35[%c0_139, %c0_140] : memref<1x32xf32, #tpu.memory_space<vmem>>, vector<1x32xf32>
    %289 = vector.broadcast %288 : vector<1x32xf32> to vector<8x32xf32>
    %290 = arith.addf %287, %289 : vector<8x32xf32>
    %c0_141 = arith.constant 0 : index
    %c0_142 = arith.constant 0 : index
    %291 = vector.load %arg36[%c0_141, %c0_142] : memref<64x32xf32, #tpu.memory_space<vmem>>, vector<64x32xf32>
    %cst_143 = arith.constant dense<0.000000e+00> : vector<8x64xf32>
    %292 = tpu.matmul %290, %291, %cst_143 {dimension_numbers = #tpu.dot_dimension_numbers<[1], [1], [0], [0], [0, 0, 1, 0], [], []>} : vector<8x32xf32>, vector<64x32xf32>, vector<8x64xf32> -> vector<8x64xf32>
    %c0_144 = arith.constant 0 : index
    %c0_145 = arith.constant 0 : index
    %293 = vector.load %arg37[%c0_144, %c0_145] : memref<1x64xf32, #tpu.memory_space<vmem>>, vector<1x64xf32>
    %294 = vector.broadcast %293 : vector<1x64xf32> to vector<8x64xf32>
    %295 = arith.addf %292, %294 : vector<8x64xf32>
    %cst_146 = arith.constant 0.000000e+00 : f32
    %296 = vector.broadcast %cst_146 : f32 to vector<8x64xf32>
    %297 = arith.maximumf %295, %296 : vector<8x64xf32>
    %c0_147 = arith.constant 0 : index
    %c0_148 = arith.constant 0 : index
    %298 = vector.load %arg38[%c0_147, %c0_148] : memref<32x64xf32, #tpu.memory_space<vmem>>, vector<32x64xf32>
    %cst_149 = arith.constant dense<0.000000e+00> : vector<8x32xf32>
    %299 = tpu.matmul %297, %298, %cst_149 {dimension_numbers = #tpu.dot_dimension_numbers<[1], [1], [0], [0], [0, 0, 1, 0], [], []>} : vector<8x64xf32>, vector<32x64xf32>, vector<8x32xf32> -> vector<8x32xf32>
    %c0_150 = arith.constant 0 : index
    %c0_151 = arith.constant 0 : index
    %300 = vector.load %arg39[%c0_150, %c0_151] : memref<1x32xf32, #tpu.memory_space<vmem>>, vector<1x32xf32>
    %301 = vector.broadcast %300 : vector<1x32xf32> to vector<8x32xf32>
    %302 = arith.addf %299, %301 : vector<8x32xf32>
    %303 = arith.addf %290, %302 : vector<8x32xf32>
    %cst_152 = arith.constant dense<0.000000e+00> : vector<8xf32>
    %304 = vector.multi_reduction <add>, %303, %cst_152 [1] : vector<8x32xf32> to vector<8xf32>
    %305 = vector.shape_cast %304 : vector<8xf32> to vector<8x1xf32>
    %cst_153 = arith.constant 3.200000e+01 : f32
    %306 = vector.broadcast %cst_153 : f32 to vector<8x1xf32>
    %307 = arith.divf %305, %306 : vector<8x1xf32>
    %308 = vector.broadcast %307 : vector<8x1xf32> to vector<8x32xf32>
    %309 = arith.subf %303, %308 : vector<8x32xf32>
    %310 = arith.mulf %309, %309 : vector<8x32xf32>
    %cst_154 = arith.constant dense<0.000000e+00> : vector<8xf32>
    %311 = vector.multi_reduction <add>, %310, %cst_154 [1] : vector<8x32xf32> to vector<8xf32>
    %312 = vector.shape_cast %311 : vector<8xf32> to vector<8x1xf32>
    %cst_155 = arith.constant 3.200000e+01 : f32
    %313 = vector.broadcast %cst_155 : f32 to vector<8x1xf32>
    %314 = arith.divf %312, %313 : vector<8x1xf32>
    %315 = vector.broadcast %307 : vector<8x1xf32> to vector<8x32xf32>
    %316 = arith.subf %303, %315 : vector<8x32xf32>
    %cst_156 = arith.constant 9.99999974E-6 : f32
    %317 = vector.broadcast %cst_156 : f32 to vector<8x1xf32>
    %318 = arith.addf %314, %317 : vector<8x1xf32>
    %319 = math.rsqrt %318 : vector<8x1xf32>
    %320 = vector.broadcast %319 : vector<8x1xf32> to vector<8x32xf32>
    %321 = arith.mulf %316, %320 : vector<8x32xf32>
    %c0_157 = arith.constant 0 : index
    %c0_158 = arith.constant 0 : index
    %322 = vector.load %arg40[%c0_157, %c0_158] : memref<1x32xf32, #tpu.memory_space<vmem>>, vector<1x32xf32>
    %323 = vector.broadcast %322 : vector<1x32xf32> to vector<8x32xf32>
    %324 = arith.mulf %321, %323 : vector<8x32xf32>
    %c0_159 = arith.constant 0 : index
    %c0_160 = arith.constant 0 : index
    %325 = vector.load %arg41[%c0_159, %c0_160] : memref<1x32xf32, #tpu.memory_space<vmem>>, vector<1x32xf32>
    %326 = vector.broadcast %325 : vector<1x32xf32> to vector<8x32xf32>
    %327 = arith.addf %324, %326 : vector<8x32xf32>
    %c0_161 = arith.constant 0 : index
    %c0_162 = arith.constant 0 : index
    %c0_163 = arith.constant 0 : index
    %328 = vector.load %arg42[%c0_161, %c0_162, %c0_163] : memref<1x8x32xf32, #tpu.memory_space<vmem>>, vector<1x8x32xf32>
    %329 = vector.shape_cast %328 : vector<1x8x32xf32> to vector<8x32xf32>
    %330 = vector.shape_cast %327 : vector<8x32xf32> to vector<1x8x32xf32>
    tpu.vector_store %arg42[%c0_161, %c0_162, %c0_163], %330 {strides = array<i32>} : memref<1x8x32xf32, #tpu.memory_space<vmem>>, vector<1x8x32xf32>,
    return
  }
  func.func @transform_0(%arg0: i32) -> (i32, i32, i32) {
    %c0_i32 = arith.constant 0 : i32
    %c0_i32_0 = arith.constant 0 : i32
    %c0_i32_1 = arith.constant 0 : i32
    return %arg0, %c0_i32, %c0_i32_0 : i32, i32, i32
  }
  func.func @transform_1(%arg0: i32) -> (i32, i32, i32) {
    %c0_i32 = arith.constant 0 : i32
    %c0_i32_0 = arith.constant 0 : i32
    %c0_i32_1 = arith.constant 0 : i32
    return %arg0, %c0_i32, %c0_i32_0 : i32, i32, i32
  }
  func.func @transform_2(%arg0: i32) -> (i32, i32, i32) {
    %c0_i32 = arith.constant 0 : i32
    %c0_i32_0 = arith.constant 0 : i32
    %c0_i32_1 = arith.constant 0 : i32
    return %arg0, %c0_i32, %c0_i32_0 : i32, i32, i32
  }
  func.func @transform_3(%arg0: i32) -> (i32, i32, i32) {
    %c0_i32 = arith.constant 0 : i32
    %c0_i32_0 = arith.constant 0 : i32
    %c0_i32_1 = arith.constant 0 : i32
    return %arg0, %c0_i32, %c0_i32_0 : i32, i32, i32
  }
  func.func @transform_4(%arg0: i32) -> (i32, i32, i32) {
    %c0_i32 = arith.constant 0 : i32
    %c0_i32_0 = arith.constant 0 : i32
    %c0_i32_1 = arith.constant 0 : i32
    return %arg0, %c0_i32, %c0_i32_0 : i32, i32, i32
  }
  func.func @transform_5(%arg0: i32) -> (i32, i32) {
    %c0_i32 = arith.constant 0 : i32
    %c0_i32_0 = arith.constant 0 : i32
    %c0_i32_1 = arith.constant 0 : i32
    return %c0_i32, %c0_i32_0 : i32, i32
  }
  func.func @transform_6(%arg0: i32) -> (i32, i32) {
    %c0_i32 = arith.constant 0 : i32
    %c0_i32_0 = arith.constant 0 : i32
    %c0_i32_1 = arith.constant 0 : i32
    return %c0_i32, %c0_i32_0 : i32, i32
  }
  func.func @transform_7(%arg0: i32) -> (i32, i32) {
    %c0_i32 = arith.constant 0 : i32
    %c0_i32_0 = arith.constant 0 : i32
    %c0_i32_1 = arith.constant 0 : i32
    return %c0_i32, %c0_i32_0 : i32, i32
  }
  func.func @transform_8(%arg0: i32) -> (i32, i32) {
    %c0_i32 = arith.constant 0 : i32
    %c0_i32_0 = arith.constant 0 : i32
    %c0_i32_1 = arith.constant 0 : i32
    return %c0_i32, %c0_i32_0 : i32, i32
  }
  func.func @transform_9(%arg0: i32) -> (i32, i32) {
    %c0_i32 = arith.constant 0 : i32
    %c0_i32_0 = arith.constant 0 : i32
    %c0_i32_1 = arith.constant 0 : i32
    return %c0_i32, %c0_i32_0 : i32, i32
  }
  func.func @transform_10(%arg0: i32) -> (i32, i32) {
    %c0_i32 = arith.constant 0 : i32
    %c0_i32_0 = arith.constant 0 : i32
    %c0_i32_1 = arith.constant 0 : i32
    return %c0_i32, %c0_i32_0 : i32, i32
  }
  func.func @transform_11(%arg0: i32) -> (i32, i32) {
    %c0_i32 = arith.constant 0 : i32
    %c0_i32_0 = arith.constant 0 : i32
    %c0_i32_1 = arith.constant 0 : i32
    return %c0_i32, %c0_i32_0 : i32, i32
  }
  func.func @transform_12(%arg0: i32) -> (i32, i32) {
    %c0_i32 = arith.constant 0 : i32
    %c0_i32_0 = arith.constant 0 : i32
    %c0_i32_1 = arith.constant 0 : i32
    return %c0_i32, %c0_i32_0 : i32, i32
  }
  func.func @transform_13(%arg0: i32) -> (i32, i32) {
    %c0_i32 = arith.constant 0 : i32
    %c0_i32_0 = arith.constant 0 : i32
    %c0_i32_1 = arith.constant 0 : i32
    return %c0_i32, %c0_i32_0 : i32, i32
  }
  func.func @transform_14(%arg0: i32) -> (i32, i32) {
    %c0_i32 = arith.constant 0 : i32
    %c0_i32_0 = arith.constant 0 : i32
    %c0_i32_1 = arith.constant 0 : i32
    return %c0_i32, %c0_i32_0 : i32, i32
  }
  func.func @transform_15(%arg0: i32) -> (i32, i32) {
    %c0_i32 = arith.constant 0 : i32
    %c0_i32_0 = arith.constant 0 : i32
    %c0_i32_1 = arith.constant 0 : i32
    return %c0_i32, %c0_i32_0 : i32, i32
  }
  func.func @transform_16(%arg0: i32) -> (i32, i32) {
    %c0_i32 = arith.constant 0 : i32
    %c0_i32_0 = arith.constant 0 : i32
    %c0_i32_1 = arith.constant 0 : i32
    return %c0_i32, %c0_i32_0 : i32, i32
  }
  func.func @transform_17(%arg0: i32) -> (i32, i32) {
    %c0_i32 = arith.constant 0 : i32
    %c0_i32_0 = arith.constant 0 : i32
    %c0_i32_1 = arith.constant 0 : i32
    return %c0_i32, %c0_i32_0 : i32, i32
  }
  func.func @transform_18(%arg0: i32) -> (i32, i32) {
    %c0_i32 = arith.constant 0 : i32
    %c0_i32_0 = arith.constant 0 : i32
    %c0_i32_1 = arith.constant 0 : i32
    return %c0_i32, %c0_i32_0 : i32, i32
  }
  func.func @transform_19(%arg0: i32) -> (i32, i32) {
    %c0_i32 = arith.constant 0 : i32
    %c0_i32_0 = arith.constant 0 : i32
    %c0_i32_1 = arith.constant 0 : i32
    return %c0_i32, %c0_i32_0 : i32, i32
  }
  func.func @transform_20(%arg0: i32) -> (i32, i32) {
    %c0_i32 = arith.constant 0 : i32
    %c0_i32_0 = arith.constant 0 : i32
    %c0_i32_1 = arith.constant 0 : i32
    return %c0_i32, %c0_i32_0 : i32, i32
  }
  func.func @transform_21(%arg0: i32) -> (i32, i32) {
    %c0_i32 = arith.constant 0 : i32
    %c0_i32_0 = arith.constant 0 : i32
    %c0_i32_1 = arith.constant 0 : i32
    return %c0_i32, %c0_i32_0 : i32, i32
  }
  func.func @transform_22(%arg0: i32) -> (i32, i32) {
    %c0_i32 = arith.constant 0 : i32
    %c0_i32_0 = arith.constant 0 : i32
    %c0_i32_1 = arith.constant 0 : i32
    return %c0_i32, %c0_i32_0 : i32, i32
  }
  func.func @transform_23(%arg0: i32) -> (i32, i32) {
    %c0_i32 = arith.constant 0 : i32
    %c0_i32_0 = arith.constant 0 : i32
    %c0_i32_1 = arith.constant 0 : i32
    return %c0_i32, %c0_i32_0 : i32, i32
  }
  func.func @transform_24(%arg0: i32) -> (i32, i32) {
    %c0_i32 = arith.constant 0 : i32
    %c0_i32_0 = arith.constant 0 : i32
    %c0_i32_1 = arith.constant 0 : i32
    return %c0_i32, %c0_i32_0 : i32, i32
  }
  func.func @transform_25(%arg0: i32) -> (i32, i32) {
    %c0_i32 = arith.constant 0 : i32
    %c0_i32_0 = arith.constant 0 : i32
    %c0_i32_1 = arith.constant 0 : i32
    return %c0_i32, %c0_i32_0 : i32, i32
  }
  func.func @transform_26(%arg0: i32) -> (i32, i32) {
    %c0_i32 = arith.constant 0 : i32
    %c0_i32_0 = arith.constant 0 : i32
    %c0_i32_1 = arith.constant 0 : i32
    return %c0_i32, %c0_i32_0 : i32, i32
  }
  func.func @transform_27(%arg0: i32) -> (i32, i32) {
    %c0_i32 = arith.constant 0 : i32
    %c0_i32_0 = arith.constant 0 : i32
    %c0_i32_1 = arith.constant 0 : i32
    return %c0_i32, %c0_i32_0 : i32, i32
  }
  func.func @transform_28(%arg0: i32) -> (i32, i32) {
    %c0_i32 = arith.constant 0 : i32
    %c0_i32_0 = arith.constant 0 : i32
    %c0_i32_1 = arith.constant 0 : i32
    return %c0_i32, %c0_i32_0 : i32, i32
  }
  func.func @transform_29(%arg0: i32) -> (i32, i32) {
    %c0_i32 = arith.constant 0 : i32
    %c0_i32_0 = arith.constant 0 : i32
    %c0_i32_1 = arith.constant 0 : i32
    return %c0_i32, %c0_i32_0 : i32, i32
  }
  func.func @transform_30(%arg0: i32) -> (i32, i32) {
    %c0_i32 = arith.constant 0 : i32
    %c0_i32_0 = arith.constant 0 : i32
    %c0_i32_1 = arith.constant 0 : i32
    return %c0_i32, %c0_i32_0 : i32, i32
  }
  func.func @transform_31(%arg0: i32) -> (i32, i32) {
    %c0_i32 = arith.constant 0 : i32
    %c0_i32_0 = arith.constant 0 : i32
    %c0_i32_1 = arith.constant 0 : i32
    return %c0_i32, %c0_i32_0 : i32, i32
  }
  func.func @transform_32(%arg0: i32) -> (i32, i32) {
    %c0_i32 = arith.constant 0 : i32
    %c0_i32_0 = arith.constant 0 : i32
    %c0_i32_1 = arith.constant 0 : i32
    return %c0_i32, %c0_i32_0 : i32, i32
  }
  func.func @transform_33(%arg0: i32) -> (i32, i32) {
    %c0_i32 = arith.constant 0 : i32
    %c0_i32_0 = arith.constant 0 : i32
    %c0_i32_1 = arith.constant 0 : i32
    return %c0_i32, %c0_i32_0 : i32, i32
  }
  func.func @transform_34(%arg0: i32) -> (i32, i32) {
    %c0_i32 = arith.constant 0 : i32
    %c0_i32_0 = arith.constant 0 : i32
    %c0_i32_1 = arith.constant 0 : i32
    return %c0_i32, %c0_i32_0 : i32, i32
  }
  func.func @transform_35(%arg0: i32) -> (i32, i32) {
    %c0_i32 = arith.constant 0 : i32
    %c0_i32_0 = arith.constant 0 : i32
    %c0_i32_1 = arith.constant 0 : i32
    return %c0_i32, %c0_i32_0 : i32, i32
  }
  func.func @transform_36(%arg0: i32) -> (i32, i32) {
    %c0_i32 = arith.constant 0 : i32
    %c0_i32_0 = arith.constant 0 : i32
    %c0_i32_1 = arith.constant 0 : i32
    return %c0_i32, %c0_i32_0 : i32, i32
  }
  func.func @transform_37(%arg0: i32) -> (i32, i32) {
    %c0_i32 = arith.constant 0 : i32
    %c0_i32_0 = arith.constant 0 : i32
    %c0_i32_1 = arith.constant 0 : i32
    return %c0_i32, %c0_i32_0 : i32, i32
  }
  func.func @transform_38(%arg0: i32) -> (i32, i32) {
    %c0_i32 = arith.constant 0 : i32
    %c0_i32_0 = arith.constant 0 : i32
    %c0_i32_1 = arith.constant 0 : i32
    return %c0_i32, %c0_i32_0 : i32, i32
  }
  func.func @transform_39(%arg0: i32) -> (i32, i32) {
    %c0_i32 = arith.constant 0 : i32
    %c0_i32_0 = arith.constant 0 : i32
    %c0_i32_1 = arith.constant 0 : i32
    return %c0_i32, %c0_i32_0 : i32, i32
  }
  func.func @transform_40(%arg0: i32) -> (i32, i32) {
    %c0_i32 = arith.constant 0 : i32
    %c0_i32_0 = arith.constant 0 : i32
    %c0_i32_1 = arith.constant 0 : i32
    return %c0_i32, %c0_i32_0 : i32, i32
  }
  func.func @transform_41(%arg0: i32) -> (i32, i32, i32) {
    %c0_i32 = arith.constant 0 : i32
    %c0_i32_0 = arith.constant 0 : i32
    %c0_i32_1 = arith.constant 0 : i32
    return %arg0, %c0_i32, %c0_i32_0 : i32, i32, i32
  }
}

</mosaic_0001>

<bundles_post_ra>
// kernel: tpu_custom_call.1
= control target key start
LH: loop header
LB: loop body
LE: loop exit
PB: predicated region body
PF: predicated region fallthrough
CT: control target
= control target key end

     0   :  { %s5732_s6 = smov 1   ;;  %s5733_s10 = smov 2   ;;  %s6999_s0 = inlined_call_operand.smem [shape: u32[42], index: -1, kind: input, shape index: {}] }
   0x1   :  { %s5816_s5 = sld [smem:[%s6999_s0]]   ;;  %s5734_s14 = smov 3  }
   0x2   :  { %s5821_s9 = sld [smem:[%s6999_s0 + %s5732_s6]]   ;;  %s5735_s18 = smov 4  }
   0x3   :  { %s5826_s13 = sld [smem:[%s6999_s0 + %s5733_s10]]   ;;  %s5736_s22 = smov 5  }
   0x4   :  { %s5831_s17 = sld [smem:[%s6999_s0 + %s5734_s14]]   ;;  %s5737_s26 = smov 6  }
   0x5   :  { %s5836_s21 = sld [smem:[%s6999_s0 + %s5735_s18]]   ;;  %s5738_s30 = smov 7  }
   0x6   :  { %s5841_s25 = sld [smem:[%s6999_s0 + %s5736_s22]]   ;;  %s5739_s4 = smov 8  }
   0x7   :  { %7051 = sst [smem:[#allocation71_spill]] %s5816_s5  ;;  %s5740_s10 = smov 9  }
   0x8   :  { %7052 = sst [smem:[#allocation72_spill]] %s5821_s9  ;;  %s5741_s15 = smov 10  }
   0x9   :  { %7053 = sst [smem:[#allocation73_spill]] %s5826_s13  ;;  %s5742_s20 = smov 11  }
   0xa   :  { %7054 = sst [smem:[#allocation74_spill]] %s5831_s17  ;;  %s5744_s1 = smov 13  }
   0xb   :  { %7055 = sst [smem:[#allocation75_spill]] %s5836_s21  ;;  %s5745_s7 = smov 14  }
   0xc   :  { %7056 = sst [smem:[#allocation76_spill]] %s5841_s25  ;;  %s5747_s22 = smov 16  }
   0xd   :  { %s5846_s29 = sld [smem:[%s6999_s0 + %s5737_s26]]   ;;  %s5743_s26 = smov 12  }
   0xe   :  { %s5851_s3 = sld [smem:[%s6999_s0 + %s5738_s30]]   ;;  %s5748_s28 = smov 17  }
   0xf   :  { %s5856_s8 = sld [smem:[%s6999_s0 + %s5739_s4]]  }
  0x10   :  { %s5861_s14 = sld [smem:[%s6999_s0 + %s5740_s10]]  }
  0x11   :  { %s5866_s19 = sld [smem:[%s6999_s0 + %s5741_s15]]   ;;  %s5746_s15 = smov 15  }
  0x12   :  { %s5871_s24 = sld [smem:[%s6999_s0 + %s5742_s20]]  }
  0x13   :  { %7057 = sst [smem:[#allocation77_spill]] %s5846_s29 }
  0x14   :  { %7058 = sst [smem:[#allocation78_spill]] %s5851_s3 }
  0x15   :  { %7059 = sst [smem:[#allocation79_spill]] %s5856_s8 }
  0x16   :  { %7060 = sst [smem:[#allocation80_spill]] %s5861_s14 }
  0x17   :  { %7061 = sst [smem:[#allocation81_spill]] %s5866_s19 }
  0x18   :  { %s5876_s30 = sld [smem:[%s6999_s0 + %s5743_s26]]  }
  0x19   :  { %s5881_s6 = sld [smem:[%s6999_s0 + %s5744_s1]]  }
  0x1a   :  { %s5886_s12 = sld [smem:[%s6999_s0 + %s5745_s7]]   ;;  %s5749_s7 = smov 18  }
  0x1b   :  { %s5891_s20 = sld [smem:[%s6999_s0 + %s5746_s15]]   ;;  %s5750_s15 = smov 19  }
  0x1c   :  { %s5896_s27 = sld [smem:[%s6999_s0 + %s5747_s22]]   ;;  %s5751_s22 = smov 20  }
  0x1d   :  { %s5901_s4 = sld [smem:[%s6999_s0 + %s5748_s28]]   ;;  %s5752_s28 = smov 21  }
  0x1e   :  { %7062 = sst [smem:[#allocation82_spill]] %s5876_s30 }
  0x1f   :  { %7063 = sst [smem:[#allocation83_spill]] %s5881_s6 }
  0x20   :  { %7064 = sst [smem:[#allocation84_spill]] %s5886_s12 }
  0x21   :  { %s5906_s17 = sld [smem:[%s6999_s0 + %s5749_s7]]   ;;  %s5753_s7 = smov 22  }
  0x22   :  { %7065 = sst [smem:[#allocation85_spill]] %s5896_s27 }
  0x23   :  { %7066 = sst [smem:[#allocation86_spill]] %s5901_s4 }
  0x24   :  { %s5911_s21 = sld [smem:[%s6999_s0 + %s5750_s15]]   ;;  %s5754_s15 = smov 23  }
  0x25   :  { %s5916_s29 = sld [smem:[%s6999_s0 + %s5751_s22]]   ;;  %s5755_s22 = smov 24  }
  0x26   :  { %s5921_s25 = sld [smem:[%s6999_s0 + %s5752_s28]]   ;;  %s5756_s28 = smov 25  }
  0x27   :  { %7067 = sst [smem:[#allocation87_spill]] %s5906_s17 }
  0x28   :  { %s5926_s13 = sld [smem:[%s6999_s0 + %s5753_s7]]   ;;  %s5757_s7 = smov 26  }
  0x29   :  { %s5931_s5 = sld [smem:[%s6999_s0 + %s5754_s15]]   ;;  %s5758_s15 = smov 27  }
  0x2a   :  { %s5936_s9 = sld [smem:[%s6999_s0 + %s5755_s22]]   ;;  %s5759_s22 = smov 28  }
  0x2b   :  { %7068 = sst [smem:[#allocation88_spill]] %s5916_s29 }
  0x2c   :  { %s5941_s29 = sld [smem:[%s6999_s0 + %s5756_s28]]   ;;  %s5760_s28 = smov 29  }
  0x2d   :  { %s5951_s17 = sld [smem:[%s6999_s0 + %s5758_s15]]   ;;  %s5762_s15 = smov 31  }
  0x2e   :  { %7069 = sst [smem:[#allocation89_spill]] %s5926_s13 }
  0x2f   :  { %7070 = sst [smem:[#allocation90_spill]] %s5931_s5 }
  0x30   :  { %7071 = sst [smem:[#allocation91_spill]] %s5936_s9 }
  0x31   :  { %s5946_s13 = sld [smem:[%s6999_s0 + %s5757_s7]]   ;;  %s5761_s7 = smov 30  }
  0x32   :  { %s5956_s9 = sld [smem:[%s6999_s0 + %s5759_s22]]   ;;  %s5763_s22 = smov 32  }
  0x33   :  { %7073 = sst [smem:[#allocation93_spill]] %s5951_s17 }
  0x34   :  { %s5961_s27 = sld [smem:[%s6999_s0 + %s5760_s28]]   ;;  %s5764_s28 = smov 33  }
  0x35   :  { %s5971_s12 = sld [smem:[%s6999_s0 + %s5762_s15]]   ;;  %s5766_s15 = smov 35  }
  0x36   :  { %s5981_s30 = sld [smem:[%s6999_s0 + %s5764_s28]]   ;;  %s5768_s28 = smov 37  }
  0x37   :  { %7072 = sst [smem:[#allocation92_spill]] %s5946_s13 }
  0x38   :  { %7074 = sst [smem:[#allocation94_spill]] %s5956_s9 }
  0x39   :  { %s5966_s13 = sld [smem:[%s6999_s0 + %s5761_s7]]   ;;  %s5765_s7 = smov 34  }
  0x3a   :  { %s5976_s9 = sld [smem:[%s6999_s0 + %s5763_s22]]   ;;  %s5767_s22 = smov 36  }
  0x3b   :  { %7076 = sst [smem:[#allocation96_spill]] %s5971_s12 }
  0x3c   :  { %s5991_s19 = sld [smem:[%s6999_s0 + %s5766_s15]]   ;;  %s5770_s15 = smov 39  }
  0x3d   :  { %s6001_s8 = sld [smem:[%s6999_s0 + %s5768_s28]]   ;;  %s5772_s28 = smov 41  }
  0x3f   :  { %7075 = sst [smem:[#allocation95_spill]] %s5966_s13 }
  0x40   :  { %7077 = sst [smem:[#allocation97_spill]] %s5976_s9 }
  0x41   :  { %s5986_s13 = sld [smem:[%s6999_s0 + %s5765_s7]]   ;;  %s5769_s7 = smov 38  }
  0x42   :  { %7079 = sst [smem:[#allocation99_spill]] %s5991_s19 }
  0x43   :  { %s5996_s9 = sld [smem:[%s6999_s0 + %s5767_s22]]   ;;  %s5771_s22 = smov 40  }
  0x44   :  { %7081 = sst [smem:[#allocation101_spill]] %s6001_s8 }
  0x45   :  { %s6011_s19 = sld [smem:[%s6999_s0 + %s5770_s15]]  }
  0x46   :  { %s6021_s8 = sld [smem:[%s6999_s0 + %s5772_s28]]  }
  0x47   :  { %7078 = sst [smem:[#allocation98_spill]] %s5986_s13 }
  0x48   :  { %s6006_s13 = sld [smem:[%s6999_s0 + %s5769_s7]]  }
  0x49   :  { %7080 = sst [smem:[#allocation100_spill]] %s5996_s9 }
  0x4a   :  { %s6016_s9 = sld [smem:[%s6999_s0 + %s5771_s22]]  }
  0x4b   :  { %7083 = sst [smem:[#allocation103_spill]] %s6011_s19 }
  0x4c   :  { %7085 = sst [smem:[#allocation105_spill]] %s6021_s8 }
  0x4e   :  { %7082 = sst [smem:[#allocation102_spill]] %s6006_s13 }
  0x50   :  { %7084 = sst [smem:[#allocation104_spill]] %s6016_s9 }
  0x51   :  { %88 = vsyncpa [#allocation3], 0 }
  0x52   :  { %90 = vsyncpa [#allocation3 + $0x1], 0 }
  0x53   :  { %91 = vsyncpa [#allocation6], 0 }
  0x54   :  { %93 = vsyncpa [#allocation6 + $0x1], 0 }
  0x55   :  { %94 = vsyncpa [#allocation9], 0 }
  0x56   :  { %95 = vsyncpa [#allocation12], 0 }
  0x57   :  { %96 = vsyncpa [#allocation15], 0 }
  0x58   :  { %97 = vsyncpa [#allocation18], 0 }
  0x59   :  { %98 = vsyncpa [#allocation21], 0 }
  0x5a   :  { %99 = vsyncpa [#allocation24], 0 }
  0x5b   :  { %100 = vsyncpa [#allocation27], 0 }
  0x5c   :  { %101 = vsyncpa [#allocation30], 0 }
  0x5d   :  { %102 = vsyncpa [#allocation33], 0 }
  0x5e   :  { %103 = vsyncpa [#allocation36], 0 }
  0x5f   :  { %104 = vsyncpa [#allocation39], 0 }
  0x60   :  { %105 = vsyncpa [#allocation42], 0 }
  0x61   :  { %106 = vsyncpa [#allocation45], 0 }
  0x62   :  { %107 = vsyncpa [#allocation48], 0 }
  0x63   :  { %108 = vsyncpa [#allocation51], 0 }
  0x64   :  { %109 = vsyncpa [#allocation4], 0 }
  0x65   :  { %111 = vsyncpa [#allocation4 + $0x1], 0  ;;  %s6023_s0 = smov 0   ;;  %s6025_s7 = smov 0  }
  0x66   :  { %s6027_s10 = smov 0   ;;  %s6029_s11 = smov 0  }
  0x67 LB: > { %s7086_s17 = sld [smem:[#allocation93_spill]]  ;;  %s6044_s15 = sadd.s32 4294967295, %s5730_s11   ;;  %s5726_s10 = sphi %s6027_s10, %s7145_s10   ;;  %s5722_s7 = sphi %s6025_s7, %s7144_s7   ;;  %s5718_s0 = sphi %s6023_s0, %s7143_s0   ;;  %s5730_s11 = sphi %s6029_s11, %s7141_s11  }
  0x68   : > { %s7087_s14 = sld [smem:[#allocation80_spill]]  ;;  %s4082_s16 = sadd.s32 4294967294, %s5730_s11  }
  0x69   : > { %s7088_s12 = sld [smem:[#allocation96_spill]]  ;;  %s6048_s18 = sadd.s32 1, %s5730_s11  }
  0x6a   : > { %s7089_s6 = sld [smem:[#allocation83_spill]]  ;;  %s124_s22 = sadd.s32 1, %s5726_s10 }
  0x6b   : > { %s7090_s5 = sld [smem:[#allocation90_spill]]  ;;  %s121_s23 = ssub.s32 %s5730_s11, %s6048_s18 }
  0x6c   : > { %s7091_s4 = sld [smem:[#allocation86_spill]]  ;;  %p131_p0 = scmp.ne.s32.totalorder %s5726_s10, %s5722_s7 }
  0x6d   : > { %s7092_s3 = sld [smem:[#allocation78_spill]]  ;;  %p122_p1 = scmp.eq.s32.totalorder %s121_s23, 0 }
  0x6e   : > { %7093 = sst [smem:[#allocation106_spill]] %s5718_s0  ;;  %p132_p2 = scmp.eq.s32.totalorder %s5730_s11, 0 }
  0x6f   : > { %7094 = sst [smem:[#allocation107_spill]] %s6048_s18  ;;  %p137_p3 = scmp.ne.s32.totalorder %s5722_s7, %s5718_s0 }
  0x70   : > { %p138_p4 = scmp.eq.s32.totalorder %s6044_s15, 0  ;;  %p6062_p5 = por %p132_p2, %p131_p0 }
  0x71   : > { %s6060_s26 = scalar_select %p122_p1, %s5726_s10, %s124_s22  }
  0x72   : > { %p6068_p6 = por %p138_p4, %p137_p3  ;;  %p1021_p7 = scmp.eq.s32.totalorder %s6044_s15, 1 }
  0x73   : > { %7095 = sst [smem:[#allocation108_spill]] %s6060_s26  ;;  %p1027_p8 = scmp.eq.s32.totalorder %s4082_s16, 1 }
  0x74   : > { %p4083_p9 = scmp.ge.s32.totalorder %s5730_s11, 1  ;;  %p1034_p10 = scmp.lt.s32.totalorder %s5730_s11, 3 }
  0x75   : > { %p6075_p11 = por %p1021_p7, %p131_p0  ;;  %p6079_p12 = por %p1027_p8, %p137_p3 }
  0x76   : > { %p6083_p13 = pnand %p4083_p9, %p1034_p10 }
  0x77   : > { %s7098_s2 = scalar_select %p6075_p11, 1, 0 }
  0x78   : > { %s7100_s22 = scalar_select %p6079_p12, 1, 0 }
  0x79   : > { %7099 = sst [smem:[#allocation109_spill]] %s7098_s2  ;;  %1038 = sbr.rel (%p6083_p13) target bundleno = 502 (0x1f6), region = 12 }
  0x7a   : > { %7101 = sst [smem:[#allocation110_spill]] %s7100_s22  ;;  %s1051_s16 = sshll.u32 (!%p6083_p13), %s7092_s3, 4  ;;  %s1052_s16 = int_to_ptr.hbm [resolvable:$true] %s1051_s16 }
  0x7b   : > { %s5773_s26 = smov (!%p6083_p13), [#allocation8]   ;;  %s4698_s0 = sshra.s32 (!%p6083_p13), %s1052_s16, 4  ;;  %s4699_s0 = int_to_ptr.hbm [resolvable:$true] %s4698_s0 }
  0x7c   : > { %s1053_s18 = sshll.u32 (!%p6083_p13), %s5773_s26, 4  ;;  %s4700_s2 = scalar_lea.hbm (!%p6083_p13), %s4699_s0, 32  ;;  %s1054_s18 = int_to_ptr.vmem [resolvable:$true] %s1053_s18 }
  0x7d   : > { %p4701_p0 = scmp.ne.s32.totalorder (!%p6083_p13), %s4699_s0, %s4700_s2  ;;  %s4704_s22 = scalar_lea.hbm (!%p6083_p13), %s7092_s3, 32 }
  0x7e   : > { %p4705_p3 = scmp.lt.s32.totalorder %s4699_s0, %s7092_s3  ;;  %p4706_p7 = scmp.lt.s32.totalorder %s4704_s22, %s4700_s2 }
  0x7f   : > { %p4702_p1 = pnand %p4701_p0, %p138_p4 }
  0x80   : > { %p4707_p8 = por %p4706_p7, %p4705_p3 }
  0x81   : > { %p4703_p2 = pneg %p4702_p1 }
  0x83   : > { %p4708_p9 = pnand %p4707_p8, %p4703_p2 }
  0x85   : > { %4711 = shalt.err (!%p4708_p9)
}
  0x86   : > { %s7029_s9 = smov 128   ;;  %s7030_s26 = smov 8  }
  0x87   : > { %4317 = dma.hbm_to_vmem [thread:$0]  (%p138_p4), %s1052_s16, 512, %s1054_s18, [#allocation9], %s7029_s9, %s7029_s9, %s7030_s26  }
  0x88   : > { %s1077_s8 = sshll.u32 %s7087_s14, 4  ;;  %s5776_s0 = smov [#allocation11]   ;;  %s1078_s8 = int_to_ptr.hbm [resolvable:$true] %s1077_s8 }
  0x89   : > { %s1079_s2 = sshll.u32 %s5776_s0, 4  ;;  %s1103_s22 = sshll.u32 %s5871_s24, 4  ;;  %s1080_s2 = int_to_ptr.vmem [resolvable:$true] %s1079_s2  ;;  %s1104_s22 = int_to_ptr.hbm [resolvable:$true] %s1103_s22 }
  0x8a   : > { %s4726_s3 = sshra.s32 %s1078_s8, 4  ;;  %s4732_s13 = scalar_lea.hbm %s7087_s14, 32  ;;  %s4727_s3 = int_to_ptr.hbm [resolvable:$true] %s4726_s3 }
  0x8b   : > { %s4728_s19 = scalar_lea.hbm %s4727_s3, 32  ;;  %p4733_p2 = scmp.lt.s32.totalorder %s4727_s3, %s7087_s14 }
  0x8c   : > { %p4729_p10 = scmp.ne.s32.totalorder %s4727_s3, %s4728_s19  ;;  %p4734_p3 = scmp.lt.s32.totalorder %s4732_s13, %s4728_s19 }
  0x8e   : > { %p4730_p0 = pnand %p4729_p10, %p138_p4  ;;  %p4735_p7 = por %p4734_p3, %p4733_p2 }
  0x90   : > { %p4731_p1 = pneg %p4730_p0 }
  0x92   : > { %p4736_p8 = pnand %p4735_p7, %p4731_p1 }
  0x94   : > { %4739 = shalt.err (!%p4736_p8)
}
  0x95   : > { %4321 = dma.hbm_to_vmem [thread:$0]  (%p138_p4), %s1078_s8, 512, %s1080_s2, [#allocation12], %s7029_s9, %s7029_s9, %s7030_s26  }
  0x96   : > { %s5777_s18 = smov [#allocation14]   ;;  %s1129_s0 = sshll.u32 %s7089_s6, 4  ;;  %s6111_s0 = int_to_ptr.hbm [resolvable:$true] %s1129_s0 }
  0x97   : > { %s1105_s16 = sshll.u32 %s5777_s18, 4  ;;  %s4754_s13 = sshra.s32 %s1104_s22, 4  ;;  %s1106_s16 = int_to_ptr.vmem [resolvable:$true] %s1105_s16  ;;  %s4755_s13 = int_to_ptr.hbm [resolvable:$true] %s4754_s13 }
  0x98   : > { %s4756_s3 = scalar_lea.hbm %s4755_s13, 32  ;;  %s4760_s19 = scalar_lea.hbm %s5871_s24, 32 }
  0x99   : > { %p4757_p9 = scmp.ne.s32.totalorder %s4755_s13, %s4756_s3  ;;  %p4761_p1 = scmp.lt.s32.totalorder %s4755_s13, %s5871_s24 }
  0x9a   : > { %p4762_p2 = scmp.lt.s32.totalorder %s4760_s19, %s4756_s3 }
  0x9b   : > { %p4758_p10 = pnand %p4757_p9, %p138_p4 }
  0x9c   : > { %p4763_p3 = por %p4762_p2, %p4761_p1 }
  0x9d   : > { %p4759_p0 = pneg %p4758_p10 }
  0x9f   : > { %p4764_p7 = pnand %p4763_p3, %p4759_p0 }
  0xa1   : > { %4767 = shalt.err (!%p4764_p7)
}
  0xa2   : > { %4325 = dma.hbm_to_vmem [thread:$0]  (%p138_p4), %s1104_s22, 512, %s1106_s16, [#allocation15], %s7029_s9, %s7029_s9, %s7030_s26  }
  0xa3   : > { %s1155_s8 = sshll.u32 %s5891_s20, 4  ;;  %s5778_s2 = smov [#allocation17]   ;;  %s6123_s8 = int_to_ptr.hbm [resolvable:$true] %s1155_s8 }
  0xa4   : > { %s1131_s18 = sshll.u32 %s5778_s2, 4  ;;  %s4782_s13 = sshra.s32 %s6111_s0, 4  ;;  %s1132_s18 = int_to_ptr.vmem [resolvable:$true] %s1131_s18  ;;  %s4783_s13 = int_to_ptr.hbm [resolvable:$true] %s4782_s13 }
  0xa5   : > { %s4784_s3 = scalar_lea.hbm %s4783_s13, 32  ;;  %s4788_s19 = scalar_lea.hbm %s7089_s6, 32 }
  0xa6   : > { %p4785_p8 = scmp.ne.s32.totalorder %s4783_s13, %s4784_s3  ;;  %p4789_p0 = scmp.lt.s32.totalorder %s4783_s13, %s7089_s6 }
  0xa7   : > { %p4790_p1 = scmp.lt.s32.totalorder %s4788_s19, %s4784_s3 }
  0xa8   : > { %p4786_p9 = pnand %p4785_p8, %p138_p4 }
  0xa9   : > { %p4791_p2 = por %p4790_p1, %p4789_p0 }
  0xaa   : > { %p4787_p10 = pneg %p4786_p9 }
  0xac   : > { %p4792_p3 = pnand %p4791_p2, %p4787_p10 }
  0xae   : > { %4795 = shalt.err (!%p4792_p3)
}
  0xaf   : > { %4329 = dma.hbm_to_vmem [thread:$0]  (%p138_p4), %s6111_s0, 512, %s1132_s18, [#allocation18], %s7029_s9, %s7029_s9, %s7030_s26  }
  0xb0   : > { %s5779_s22 = smov [#allocation20]   ;;  %s1182_s2 = sshll.u32 %s7091_s4, 4  ;;  %s6137_s2 = int_to_ptr.hbm [resolvable:$true] %s1182_s2 }
  0xb1   : > { %s1157_s16 = sshll.u32 %s5779_s22, 4  ;;  %s4810_s13 = sshra.s32 %s6123_s8, 4  ;;  %s1158_s16 = int_to_ptr.vmem [resolvable:$true] %s1157_s16  ;;  %s4811_s13 = int_to_ptr.hbm [resolvable:$true] %s4810_s13 }
  0xb2   : > { %s4812_s3 = scalar_lea.hbm %s4811_s13, 32  ;;  %s4816_s19 = scalar_lea.hbm %s5891_s20, 32 }
  0xb3   : > { %p4813_p7 = scmp.ne.s32.totalorder %s4811_s13, %s4812_s3  ;;  %p4817_p10 = scmp.lt.s32.totalorder %s4811_s13, %s5891_s20 }
  0xb4   : > { %p4818_p0 = scmp.lt.s32.totalorder %s4816_s19, %s4812_s3 }
  0xb5   : > { %p4814_p8 = pnand %p4813_p7, %p138_p4 }
  0xb6   : > { %p4819_p1 = por %p4818_p0, %p4817_p10 }
  0xb7   : > { %p4815_p9 = pneg %p4814_p8 }
  0xb9   : > { %p4820_p2 = pnand %p4819_p1, %p4815_p9 }
  0xbb   : > { %4823 = shalt.err (!%p4820_p2)
}
  0xbc   : > { %4333 = dma.hbm_to_vmem [thread:$0]  (%p138_p4), %s6123_s8, 512, %s1158_s16, [#allocation21], %s7029_s9, %s7029_s9, %s7030_s26  }
  0xbd   : > { %s1205_s0 = sshll.u32 %s5911_s21, 4  ;;  %s5780_s18 = smov [#allocation23]   ;;  %s6151_s0 = int_to_ptr.hbm [resolvable:$true] %s1205_s0 }
  0xbe   : > { %s1184_s22 = sshll.u32 %s5780_s18, 4  ;;  %s4838_s13 = sshra.s32 %s6137_s2, 4  ;;  %s1185_s22 = int_to_ptr.vmem [resolvable:$true] %s1184_s22  ;;  %s4839_s13 = int_to_ptr.hbm [resolvable:$true] %s4838_s13 }
  0xbf   : > { %s4840_s3 = scalar_lea.hbm %s4839_s13, 1  ;;  %s4844_s19 = scalar_lea.hbm %s7091_s4, 1 }
  0xc0   : > { %p4841_p3 = scmp.ne.s32.totalorder %s4839_s13, %s4840_s3  ;;  %p4845_p9 = scmp.lt.s32.totalorder %s4839_s13, %s7091_s4 }
  0xc1   : > { %p4846_p10 = scmp.lt.s32.totalorder %s4844_s19, %s4840_s3 }
  0xc2   : > { %p4842_p7 = pnand %p4841_p3, %p138_p4 }
  0xc3   : > { %p4847_p0 = por %p4846_p10, %p4845_p9 }
  0xc4   : > { %p4843_p8 = pneg %p4842_p7 }
  0xc6   : > { %p4848_p1 = pnand %p4847_p0, %p4843_p8 }
  0xc8   : > { %4851 = shalt.err (!%p4848_p1)
}
  0xc9   : > { %4337 = dma.hbm_to_vmem [thread:$0]  (%p138_p4), %s6137_s2, 16, %s1185_s22, [#allocation24]  }
  0xca   : > { %s5781_s8 = smov [#allocation26]   ;;  %s1231_s18 = sshll.u32 %s5921_s25, 4  ;;  %s6162_s18 = int_to_ptr.hbm [resolvable:$true] %s1231_s18 }
  0xcb   : > { %s1207_s16 = sshll.u32 %s5781_s8, 4  ;;  %s4866_s13 = sshra.s32 %s6151_s0, 4  ;;  %s1208_s16 = int_to_ptr.vmem [resolvable:$true] %s1207_s16  ;;  %s4867_s13 = int_to_ptr.hbm [resolvable:$true] %s4866_s13 }
  0xcc   : > { %s4868_s3 = scalar_lea.hbm %s4867_s13, 32  ;;  %s4872_s19 = scalar_lea.hbm %s5911_s21, 32 }
  0xcd   : > { %p4869_p2 = scmp.ne.s32.totalorder %s4867_s13, %s4868_s3  ;;  %p4873_p8 = scmp.lt.s32.totalorder %s4867_s13, %s5911_s21 }
  0xce   : > { %p4874_p9 = scmp.lt.s32.totalorder %s4872_s19, %s4868_s3 }
  0xcf   : > { %p4870_p3 = pnand %p4869_p2, %p138_p4 }
  0xd0   : > { %p4875_p10 = por %p4874_p9, %p4873_p8 }
  0xd1   : > { %p4871_p7 = pneg %p4870_p3 }
  0xd3   : > { %p4876_p0 = pnand %p4875_p10, %p4871_p7 }
  0xd5   : > { %4879 = shalt.err (!%p4876_p0)
}
  0xd6   : > { %4341 = dma.hbm_to_vmem [thread:$0]  (%p138_p4), %s6151_s0, 512, %s1208_s16, [#allocation27], %s7029_s9, %s7029_s9, %s7030_s26  }
  0xd7   : > { %s1257_s2 = sshll.u32 %s7090_s5, 4  ;;  %s5782_s22 = smov [#allocation29]   ;;  %s6176_s2 = int_to_ptr.hbm [resolvable:$true] %s1257_s2 }
  0xd8   : > { %s1233_s8 = sshll.u32 %s5782_s22, 4  ;;  %s4894_s13 = sshra.s32 %s6162_s18, 4  ;;  %s1234_s8 = int_to_ptr.vmem [resolvable:$true] %s1233_s8  ;;  %s4895_s13 = int_to_ptr.hbm [resolvable:$true] %s4894_s13 }
  0xd9   : > { %s4896_s3 = scalar_lea.hbm %s4895_s13, 32  ;;  %s4900_s19 = scalar_lea.hbm %s5921_s25, 32 }
  0xda   : > { %p4897_p1 = scmp.ne.s32.totalorder %s4895_s13, %s4896_s3  ;;  %p4901_p7 = scmp.lt.s32.totalorder %s4895_s13, %s5921_s25 }
  0xdb   : > { %p4902_p8 = scmp.lt.s32.totalorder %s4900_s19, %s4896_s3 }
  0xdc   : > { %p4898_p2 = pnand %p4897_p1, %p138_p4 }
  0xdd   : > { %p4903_p9 = por %p4902_p8, %p4901_p7 }
  0xde   : > { %p4899_p3 = pneg %p4898_p2 }
  0xe0   : > { %p4904_p10 = pnand %p4903_p9, %p4899_p3 }
  0xe2   : > { %4907 = shalt.err (!%p4904_p10)
}
  0xe3   : > { %4345 = dma.hbm_to_vmem [thread:$0]  (%p138_p4), %s6162_s18, 512, %s1234_s8, [#allocation30], %s7029_s9, %s7029_s9, %s7030_s26  }
  0xe4   : > { %s5783_s0 = smov [#allocation32]   ;;  %s1283_s22 = sshll.u32 %s5941_s29, 4  ;;  %s6190_s22 = int_to_ptr.hbm [resolvable:$true] %s1283_s22 }
  0xe5   : > { %s1259_s16 = sshll.u32 %s5783_s0, 4  ;;  %s4922_s13 = sshra.s32 %s6176_s2, 4  ;;  %s1260_s16 = int_to_ptr.vmem [resolvable:$true] %s1259_s16  ;;  %s4923_s13 = int_to_ptr.hbm [resolvable:$true] %s4922_s13 }
  0xe6   : > { %s4924_s3 = scalar_lea.hbm %s4923_s13, 32  ;;  %s4928_s19 = scalar_lea.hbm %s7090_s5, 32 }
  0xe7   : > { %p4925_p0 = scmp.ne.s32.totalorder %s4923_s13, %s4924_s3  ;;  %p4929_p3 = scmp.lt.s32.totalorder %s4923_s13, %s7090_s5 }
  0xe8   : > { %p4930_p7 = scmp.lt.s32.totalorder %s4928_s19, %s4924_s3 }
  0xe9   : > { %p4926_p1 = pnand %p4925_p0, %p138_p4 }
  0xea   : > { %p4931_p8 = por %p4930_p7, %p4929_p3 }
  0xeb   : > { %p4927_p2 = pneg %p4926_p1 }
  0xed   : > { %p4932_p9 = pnand %p4931_p8, %p4927_p2 }
  0xef   : > { %4935 = shalt.err (!%p4932_p9)
}
  0xf0   : > { %4349 = dma.hbm_to_vmem [thread:$0]  (%p138_p4), %s6176_s2, 512, %s1260_s16, [#allocation33], %s7029_s9, %s7029_s9, %s7030_s26  }
  0xf1   : > { %s1309_s18 = sshll.u32 %s7086_s17, 4  ;;  %s5784_s8 = smov [#allocation35]   ;;  %s6204_s18 = int_to_ptr.hbm [resolvable:$true] %s1309_s18 }
  0xf2   : > { %s1285_s0 = sshll.u32 %s5784_s8, 4  ;;  %s4950_s13 = sshra.s32 %s6190_s22, 4  ;;  %s1286_s0 = int_to_ptr.vmem [resolvable:$true] %s1285_s0  ;;  %s4951_s13 = int_to_ptr.hbm [resolvable:$true] %s4950_s13 }
  0xf3   : > { %s4952_s3 = scalar_lea.hbm %s4951_s13, 32  ;;  %s4956_s19 = scalar_lea.hbm %s5941_s29, 32 }
  0xf4   : > { %p4953_p10 = scmp.ne.s32.totalorder %s4951_s13, %s4952_s3  ;;  %p4957_p2 = scmp.lt.s32.totalorder %s4951_s13, %s5941_s29 }
  0xf5   : > { %p4958_p3 = scmp.lt.s32.totalorder %s4956_s19, %s4952_s3 }
  0xf6   : > { %p4954_p0 = pnand %p4953_p10, %p138_p4 }
  0xf7   : > { %p4959_p7 = por %p4958_p3, %p4957_p2 }
  0xf8   : > { %p4955_p1 = pneg %p4954_p0 }
  0xfa   : > { %p4960_p8 = pnand %p4959_p7, %p4955_p1 }
  0xfc   : > { %4963 = shalt.err (!%p4960_p8)
}
  0xfd   : > { %4353 = dma.hbm_to_vmem [thread:$0]  (%p138_p4), %s6190_s22, 512, %s1286_s0, [#allocation36], %s7029_s9, %s7029_s9, %s7030_s26  }
  0xfe   : > { %s5785_s2 = smov [#allocation38]   ;;  %s1335_s8 = sshll.u32 %s5961_s27, 4  ;;  %s6218_s8 = int_to_ptr.hbm [resolvable:$true] %s1335_s8 }
  0xff   : > { %s1311_s16 = sshll.u32 %s5785_s2, 4  ;;  %s4978_s13 = sshra.s32 %s6204_s18, 4  ;;  %s1312_s16 = int_to_ptr.vmem [resolvable:$true] %s1311_s16  ;;  %s4979_s13 = int_to_ptr.hbm [resolvable:$true] %s4978_s13 }
 0x100   : > { %s4980_s3 = scalar_lea.hbm %s4979_s13, 32  ;;  %s4984_s19 = scalar_lea.hbm %s7086_s17, 32 }
 0x101   : > { %p4981_p9 = scmp.ne.s32.totalorder %s4979_s13, %s4980_s3  ;;  %p4985_p1 = scmp.lt.s32.totalorder %s4979_s13, %s7086_s17 }
 0x102   : > { %p4986_p2 = scmp.lt.s32.totalorder %s4984_s19, %s4980_s3 }
 0x103   : > { %p4982_p10 = pnand %p4981_p9, %p138_p4 }
 0x104   : > { %p4987_p3 = por %p4986_p2, %p4985_p1 }
 0x105   : > { %p4983_p0 = pneg %p4982_p10 }
 0x107   : > { %p4988_p7 = pnand %p4987_p3, %p4983_p0 }
 0x109   : > { %4991 = shalt.err (!%p4988_p7)
}
 0x10a   : > { %4357 = dma.hbm_to_vmem [thread:$0]  (%p138_p4), %s6204_s18, 512, %s1312_s16, [#allocation39], %s7029_s9, %s7029_s9, %s7030_s26  }
 0x10b   : > { %s1361_s22 = sshll.u32 %s7088_s12, 4  ;;  %s5786_s0 = smov [#allocation41]   ;;  %s6232_s22 = int_to_ptr.hbm [resolvable:$true] %s1361_s22 }
 0x10c   : > { %s1337_s2 = sshll.u32 %s5786_s0, 4  ;;  %s5006_s13 = sshra.s32 %s6218_s8, 4  ;;  %s1338_s2 = int_to_ptr.vmem [resolvable:$true] %s1337_s2  ;;  %s5007_s13 = int_to_ptr.hbm [resolvable:$true] %s5006_s13 }
 0x10d   : > { %s5008_s3 = scalar_lea.hbm %s5007_s13, 32  ;;  %s5012_s19 = scalar_lea.hbm %s5961_s27, 32 }
 0x10e   : > { %p5009_p8 = scmp.ne.s32.totalorder %s5007_s13, %s5008_s3  ;;  %p5013_p0 = scmp.lt.s32.totalorder %s5007_s13, %s5961_s27 }
 0x10f   : > { %p5014_p1 = scmp.lt.s32.totalorder %s5012_s19, %s5008_s3 }
 0x110   : > { %p5010_p9 = pnand %p5009_p8, %p138_p4 }
 0x111   : > { %p5015_p2 = por %p5014_p1, %p5013_p0 }
 0x112   : > { %p5011_p10 = pneg %p5010_p9 }
 0x114   : > { %p5016_p3 = pnand %p5015_p2, %p5011_p10 }
 0x116   : > { %5019 = shalt.err (!%p5016_p3)
}
 0x117   : > { %4361 = dma.hbm_to_vmem [thread:$0]  (%p138_p4), %s6218_s8, 512, %s1338_s2, [#allocation42], %s7029_s9, %s7029_s9, %s7030_s26  }
 0x118   : > { %s5787_s18 = smov [#allocation44]   ;;  %s1388_s0 = sshll.u32 %s5981_s30, 4  ;;  %s6246_s0 = int_to_ptr.hbm [resolvable:$true] %s1388_s0 }
 0x119   : > { %s1363_s16 = sshll.u32 %s5787_s18, 4  ;;  %s5034_s13 = sshra.s32 %s6232_s22, 4  ;;  %s1364_s16 = int_to_ptr.vmem [resolvable:$true] %s1363_s16  ;;  %s5035_s13 = int_to_ptr.hbm [resolvable:$true] %s5034_s13 }
 0x11a   : > { %s5036_s3 = scalar_lea.hbm %s5035_s13, 32  ;;  %s5040_s19 = scalar_lea.hbm %s7088_s12, 32 }
 0x11b   : > { %p5037_p7 = scmp.ne.s32.totalorder %s5035_s13, %s5036_s3  ;;  %p5041_p10 = scmp.lt.s32.totalorder %s5035_s13, %s7088_s12 }
 0x11c   : > { %p5042_p0 = scmp.lt.s32.totalorder %s5040_s19, %s5036_s3 }
 0x11d   : > { %p5038_p8 = pnand %p5037_p7, %p138_p4 }
 0x11e   : > { %p5043_p1 = por %p5042_p0, %p5041_p10 }
 0x11f   : > { %p5039_p9 = pneg %p5038_p8 }
 0x121   : > { %p5044_p2 = pnand %p5043_p1, %p5039_p9 }
 0x123   : > { %5047 = shalt.err (!%p5044_p2)
}
 0x124   : > { %s7103_s8 = sld [smem:[#allocation79_spill]]  ;;  %s5788_s18 = smov [#allocation47]  }
 0x125   : > { %4365 = dma.hbm_to_vmem [thread:$0]  (%p138_p4), %s6232_s22, 512, %s1364_s16, [#allocation45], %s7029_s9, %s7029_s9, %s7030_s26  }
 0x126   : > { %s1390_s4 = sshll.u32 %s5788_s18, 4  ;;  %s5062_s13 = sshra.s32 %s6246_s0, 4  ;;  %s1391_s4 = int_to_ptr.vmem [resolvable:$true] %s1390_s4  ;;  %s5063_s13 = int_to_ptr.hbm [resolvable:$true] %s5062_s13 }
 0x127   : > { %s5064_s3 = scalar_lea.hbm %s5063_s13, 1  ;;  %s5068_s19 = scalar_lea.hbm %s5981_s30, 1 }
 0x128   : > { %p5065_p3 = scmp.ne.s32.totalorder %s5063_s13, %s5064_s3  ;;  %p5069_p9 = scmp.lt.s32.totalorder %s5063_s13, %s5981_s30 }
 0x129   : > { %p5070_p10 = scmp.lt.s32.totalorder %s5068_s19, %s5064_s3 }
 0x12a   : > { %s1066_s2 = sshll.u32 %s7103_s8, 4  ;;  %p5066_p7 = pnand %p5065_p3, %p138_p4  ;;  %s6260_s2 = int_to_ptr.hbm [resolvable:$true] %s1066_s2 }
 0x12b   : > { %p5071_p0 = por %p5070_p10, %p5069_p9 }
 0x12c   : > { %p5067_p8 = pneg %p5066_p7 }
 0x12e   : > { %p5072_p1 = pnand %p5071_p0, %p5067_p8 }
 0x130   : > { %5075 = shalt.err (!%p5072_p1)
}
 0x131   : > { %s7104_s22 = sld [smem:[#allocation81_spill]]  ;;  %s5789_s16 = smov [#allocation10]  }
 0x132   : > { %4369 = dma.hbm_to_vmem [thread:$0]  (%p138_p4), %s6246_s0, 16, %s1391_s4, [#allocation48]  }
 0x133   : > { %s1068_s18 = sshll.u32 %s5789_s16, 4  ;;  %s5090_s13 = sshra.s32 %s6260_s2, 4  ;;  %s1069_s18 = int_to_ptr.vmem [resolvable:$true] %s1068_s18  ;;  %s5091_s13 = int_to_ptr.hbm [resolvable:$true] %s5090_s13 }
 0x134   : > { %s5092_s3 = scalar_lea.hbm %s5091_s13, 1  ;;  %s5096_s19 = scalar_lea.hbm %s7103_s8, 1 }
 0x135   : > { %p5093_p2 = scmp.ne.s32.totalorder %s5091_s13, %s5092_s3  ;;  %p5097_p8 = scmp.lt.s32.totalorder %s5091_s13, %s7103_s8 }
 0x136   : > { %p5098_p9 = scmp.lt.s32.totalorder %s5096_s19, %s5092_s3 }
 0x137   : > { %s1092_s9 = sshll.u32 %s7104_s22, 4  ;;  %p5094_p3 = pnand %p5093_p2, %p138_p4  ;;  %s6271_s9 = int_to_ptr.hbm [resolvable:$true] %s1092_s9 }
 0x138   : > { %p5099_p10 = por %p5098_p9, %p5097_p8 }
 0x139   : > { %p5095_p7 = pneg %p5094_p3 }
 0x13b   : > { %p5100_p0 = pnand %p5099_p10, %p5095_p7 }
 0x13d   : > { %5103 = shalt.err (!%p5100_p0)
}
 0x13e   : > { %s7105_s4 = sld [smem:[#allocation82_spill]]  ;;  %s5790_s16 = smov [#allocation13]  }
 0x13f   : > { %4319 = dma.hbm_to_vmem [thread:$0]  (%p138_p4), %s6260_s2, 16, %s1069_s18, [#allocation9]  }
 0x140   : > { %s1094_s26 = sshll.u32 %s5790_s16, 4  ;;  %s5118_s13 = sshra.s32 %s6271_s9, 4  ;;  %s1095_s26 = int_to_ptr.vmem [resolvable:$true] %s1094_s26  ;;  %s5119_s13 = int_to_ptr.hbm [resolvable:$true] %s5118_s13 }
 0x141   : > { %s5120_s3 = scalar_lea.hbm %s5119_s13, 1  ;;  %s5124_s19 = scalar_lea.hbm %s7104_s22, 1 }
 0x142   : > { %p5121_p1 = scmp.ne.s32.totalorder %s5119_s13, %s5120_s3  ;;  %p5125_p7 = scmp.lt.s32.totalorder %s5119_s13, %s7104_s22 }
 0x143   : > { %p5126_p8 = scmp.lt.s32.totalorder %s5124_s19, %s5120_s3 }
 0x144   : > { %s1118_s0 = sshll.u32 %s7105_s4, 4  ;;  %p5122_p2 = pnand %p5121_p1, %p138_p4  ;;  %s6282_s0 = int_to_ptr.hbm [resolvable:$true] %s1118_s0 }
 0x145   : > { %p5127_p9 = por %p5126_p8, %p5125_p7 }
 0x146   : > { %p5123_p3 = pneg %p5122_p2 }
 0x148   : > { %p5128_p10 = pnand %p5127_p9, %p5123_p3 }
 0x14a   : > { %5131 = shalt.err (!%p5128_p10)
}
 0x14b   : > { %s7106_s2 = sld [smem:[#allocation84_spill]]  ;;  %s5791_s18 = smov [#allocation16]  }
 0x14c   : > { %4323 = dma.hbm_to_vmem [thread:$0]  (%p138_p4), %s6271_s9, 16, %s1095_s26, [#allocation12]  }
 0x14d   : > { %s1120_s16 = sshll.u32 %s5791_s18, 4  ;;  %s5146_s13 = sshra.s32 %s6282_s0, 4  ;;  %s1121_s16 = int_to_ptr.vmem [resolvable:$true] %s1120_s16  ;;  %s5147_s13 = int_to_ptr.hbm [resolvable:$true] %s5146_s13 }
 0x14e   : > { %s5148_s3 = scalar_lea.hbm %s5147_s13, 1  ;;  %s5152_s19 = scalar_lea.hbm %s7105_s4, 1 }
 0x14f   : > { %p5149_p0 = scmp.ne.s32.totalorder %s5147_s13, %s5148_s3  ;;  %p5153_p3 = scmp.lt.s32.totalorder %s5147_s13, %s7105_s4 }
 0x150   : > { %p5154_p7 = scmp.lt.s32.totalorder %s5152_s19, %s5148_s3 }
 0x151   : > { %s1144_s5 = sshll.u32 %s7106_s2, 4  ;;  %p5150_p1 = pnand %p5149_p0, %p138_p4  ;;  %s6293_s5 = int_to_ptr.hbm [resolvable:$true] %s1144_s5 }
 0x152   : > { %p5155_p8 = por %p5154_p7, %p5153_p3 }
 0x153   : > { %p5151_p2 = pneg %p5150_p1 }
 0x155   : > { %p5156_p9 = pnand %p5155_p8, %p5151_p2 }
 0x157   : > { %5159 = shalt.err (!%p5156_p9)
}
 0x158   : > { %s7107_s9 = sld [smem:[#allocation85_spill]]  ;;  %s5792_s18 = smov [#allocation19]  }
 0x159   : > { %4327 = dma.hbm_to_vmem [thread:$0]  (%p138_p4), %s6282_s0, 16, %s1121_s16, [#allocation15]  }
 0x15a   : > { %s1146_s6 = sshll.u32 %s5792_s18, 4  ;;  %s5174_s13 = sshra.s32 %s6293_s5, 4  ;;  %s1147_s6 = int_to_ptr.vmem [resolvable:$true] %s1146_s6  ;;  %s5175_s13 = int_to_ptr.hbm [resolvable:$true] %s5174_s13 }
 0x15b   : > { %s5176_s3 = scalar_lea.hbm %s5175_s13, 1  ;;  %s5180_s19 = scalar_lea.hbm %s7106_s2, 1 }
 0x15c   : > { %p5177_p10 = scmp.ne.s32.totalorder %s5175_s13, %s5176_s3  ;;  %p5181_p2 = scmp.lt.s32.totalorder %s5175_s13, %s7106_s2 }
 0x15d   : > { %p5182_p3 = scmp.lt.s32.totalorder %s5180_s19, %s5176_s3 }
 0x15e   : > { %s1170_s26 = sshll.u32 %s7107_s9, 4  ;;  %p5178_p0 = pnand %p5177_p10, %p138_p4  ;;  %s6304_s26 = int_to_ptr.hbm [resolvable:$true] %s1170_s26 }
 0x15f   : > { %p5183_p7 = por %p5182_p3, %p5181_p2 }
 0x160   : > { %p5179_p1 = pneg %p5178_p0 }
 0x162   : > { %p5184_p8 = pnand %p5183_p7, %p5179_p1 }
 0x164   : > { %5187 = shalt.err (!%p5184_p8)
}
 0x165   : > { %s7108_s0 = sld [smem:[#allocation87_spill]]  ;;  %s5793_s18 = smov [#allocation22]  }
 0x166   : > { %4331 = dma.hbm_to_vmem [thread:$0]  (%p138_p4), %s6293_s5, 16, %s1147_s6, [#allocation18]  }
 0x167   : > { %s1172_s4 = sshll.u32 %s5793_s18, 4  ;;  %s5202_s13 = sshra.s32 %s6304_s26, 4  ;;  %s1173_s4 = int_to_ptr.vmem [resolvable:$true] %s1172_s4  ;;  %s5203_s13 = int_to_ptr.hbm [resolvable:$true] %s5202_s13 }
 0x168   : > { %s5204_s3 = scalar_lea.hbm %s5203_s13, 1  ;;  %s5208_s19 = scalar_lea.hbm %s7107_s9, 1 }
 0x169   : > { %p5205_p9 = scmp.ne.s32.totalorder %s5203_s13, %s5204_s3  ;;  %p5209_p1 = scmp.lt.s32.totalorder %s5203_s13, %s7107_s9 }
 0x16a   : > { %p5210_p2 = scmp.lt.s32.totalorder %s5208_s19, %s5204_s3 }
 0x16b   : > { %s7109_s16 = smov %s7108_s0  ;;  %s1194_s8 = sshll.u32 %s7108_s0, 4  ;;  %s6315_s8 = int_to_ptr.hbm [resolvable:$true] %s1194_s8 }
 0x16c   : > { %p5206_p10 = pnand %p5205_p9, %p138_p4  ;;  %p5211_p3 = por %p5210_p2, %p5209_p1 }
 0x16e   : > { %p5207_p0 = pneg %p5206_p10 }
 0x170   : > { %p5212_p7 = pnand %p5211_p3, %p5207_p0 }
 0x172   : > { %5215 = shalt.err (!%p5212_p7)
}
 0x173   : > { %s7110_s5 = sld [smem:[#allocation88_spill]]  ;;  %s5794_s0 = smov [#allocation25]  }
 0x174   : > { %4335 = dma.hbm_to_vmem [thread:$0]  (%p138_p4), %s6304_s26, 16, %s1173_s4, [#allocation21]  }
 0x175   : > { %s1196_s18 = sshll.u32 %s5794_s0, 4  ;;  %s5230_s13 = sshra.s32 %s6315_s8, 4  ;;  %s1197_s18 = int_to_ptr.vmem [resolvable:$true] %s1196_s18  ;;  %s5231_s13 = int_to_ptr.hbm [resolvable:$true] %s5230_s13 }
 0x176   : > { %s5232_s3 = scalar_lea.hbm %s5231_s13, 1  ;;  %s5236_s19 = scalar_lea.hbm %s7109_s16, 1 }
 0x177   : > { %p5233_p8 = scmp.ne.s32.totalorder %s5231_s13, %s5232_s3  ;;  %p5237_p0 = scmp.lt.s32.totalorder %s5231_s13, %s7109_s16 }
 0x178   : > { %p5238_p1 = scmp.lt.s32.totalorder %s5236_s19, %s5232_s3 }
 0x179   : > { %s1220_s6 = sshll.u32 %s7110_s5, 4  ;;  %p5234_p9 = pnand %p5233_p8, %p138_p4  ;;  %s6326_s6 = int_to_ptr.hbm [resolvable:$true] %s1220_s6 }
 0x17a   : > { %p5239_p2 = por %p5238_p1, %p5237_p0 }
 0x17b   : > { %p5235_p10 = pneg %p5234_p9 }
 0x17d   : > { %p5240_p3 = pnand %p5239_p2, %p5235_p10 }
 0x17f   : > { %5243 = shalt.err (!%p5240_p3)
}
 0x180   : > { %s7111_s4 = sld [smem:[#allocation89_spill]]  ;;  %s5795_s26 = smov [#allocation28]  }
 0x181   : > { %4339 = dma.hbm_to_vmem [thread:$0]  (%p138_p4), %s6315_s8, 16, %s1197_s18, [#allocation24]  }
 0x182   : > { %s1222_s0 = sshll.u32 %s5795_s26, 4  ;;  %s5258_s13 = sshra.s32 %s6326_s6, 4  ;;  %s1223_s0 = int_to_ptr.vmem [resolvable:$true] %s1222_s0  ;;  %s5259_s13 = int_to_ptr.hbm [resolvable:$true] %s5258_s13 }
 0x183   : > { %s5260_s3 = scalar_lea.hbm %s5259_s13, 1  ;;  %s5264_s19 = scalar_lea.hbm %s7110_s5, 1 }
 0x184   : > { %p5261_p7 = scmp.ne.s32.totalorder %s5259_s13, %s5260_s3  ;;  %p5265_p10 = scmp.lt.s32.totalorder %s5259_s13, %s7110_s5 }
 0x185   : > { %p5266_p0 = scmp.lt.s32.totalorder %s5264_s19, %s5260_s3 }
 0x186   : > { %s1246_s2 = sshll.u32 %s7111_s4, 4  ;;  %p5262_p8 = pnand %p5261_p7, %p138_p4  ;;  %s6337_s2 = int_to_ptr.hbm [resolvable:$true] %s1246_s2 }
 0x187   : > { %p5267_p1 = por %p5266_p0, %p5265_p10 }
 0x188   : > { %p5263_p9 = pneg %p5262_p8 }
 0x18a   : > { %p5268_p2 = pnand %p5267_p1, %p5263_p9 }
 0x18c   : > { %5271 = shalt.err (!%p5268_p2)
}
 0x18d   : > { %s7112_s8 = sld [smem:[#allocation91_spill]]  ;;  %s5796_s26 = smov [#allocation31]  }
 0x18e   : > { %4343 = dma.hbm_to_vmem [thread:$0]  (%p138_p4), %s6326_s6, 16, %s1223_s0, [#allocation27]  }
 0x18f   : > { %s1248_s9 = sshll.u32 %s5796_s26, 4  ;;  %s5286_s13 = sshra.s32 %s6337_s2, 4  ;;  %s1249_s9 = int_to_ptr.vmem [resolvable:$true] %s1248_s9  ;;  %s5287_s13 = int_to_ptr.hbm [resolvable:$true] %s5286_s13 }
 0x190   : > { %s5288_s3 = scalar_lea.hbm %s5287_s13, 1  ;;  %s5292_s19 = scalar_lea.hbm %s7111_s4, 1 }
 0x191   : > { %p5289_p3 = scmp.ne.s32.totalorder %s5287_s13, %s5288_s3  ;;  %p5293_p9 = scmp.lt.s32.totalorder %s5287_s13, %s7111_s4 }
 0x192   : > { %p5294_p10 = scmp.lt.s32.totalorder %s5292_s19, %s5288_s3 }
 0x193   : > { %s1272_s18 = sshll.u32 %s7112_s8, 4  ;;  %p5290_p7 = pnand %p5289_p3, %p138_p4  ;;  %s6348_s18 = int_to_ptr.hbm [resolvable:$true] %s1272_s18 }
 0x194   : > { %p5295_p0 = por %p5294_p10, %p5293_p9 }
 0x195   : > { %p5291_p8 = pneg %p5290_p7 }
 0x197   : > { %p5296_p1 = pnand %p5295_p0, %p5291_p8 }
 0x199   : > { %5299 = shalt.err (!%p5296_p1)
}
 0x19a   : > { %s7113_s6 = sld [smem:[#allocation92_spill]]  ;;  %s5797_s0 = smov [#allocation34]  }
 0x19b   : > { %4347 = dma.hbm_to_vmem [thread:$0]  (%p138_p4), %s6337_s2, 16, %s1249_s9, [#allocation30]  }
 0x19c   : > { %s1274_s26 = sshll.u32 %s5797_s0, 4  ;;  %s5314_s13 = sshra.s32 %s6348_s18, 4  ;;  %s1275_s26 = int_to_ptr.vmem [resolvable:$true] %s1274_s26  ;;  %s5315_s13 = int_to_ptr.hbm [resolvable:$true] %s5314_s13 }
 0x19d   : > { %s5316_s3 = scalar_lea.hbm %s5315_s13, 1  ;;  %s5320_s19 = scalar_lea.hbm %s7112_s8, 1 }
 0x19e   : > { %p5317_p2 = scmp.ne.s32.totalorder %s5315_s13, %s5316_s3  ;;  %p5321_p8 = scmp.lt.s32.totalorder %s5315_s13, %s7112_s8 }
 0x19f   : > { %p5322_p9 = scmp.lt.s32.totalorder %s5320_s19, %s5316_s3 }
 0x1a0   : > { %s1298_s5 = sshll.u32 %s7113_s6, 4  ;;  %p5318_p3 = pnand %p5317_p2, %p138_p4  ;;  %s6359_s5 = int_to_ptr.hbm [resolvable:$true] %s1298_s5 }
 0x1a1   : > { %p5323_p10 = por %p5322_p9, %p5321_p8 }
 0x1a2   : > { %p5319_p7 = pneg %p5318_p3 }
 0x1a4   : > { %p5324_p0 = pnand %p5323_p10, %p5319_p7 }
 0x1a6   : > { %5327 = shalt.err (!%p5324_p0)
}
 0x1a7   : > { %s7114_s2 = sld [smem:[#allocation94_spill]]  ;;  %s5798_s0 = smov [#allocation37]  }
 0x1a8   : > { %4351 = dma.hbm_to_vmem [thread:$0]  (%p138_p4), %s6348_s18, 16, %s1275_s26, [#allocation33]  }
 0x1a9   : > { %s1300_s4 = sshll.u32 %s5798_s0, 4  ;;  %s5342_s13 = sshra.s32 %s6359_s5, 4  ;;  %s1301_s4 = int_to_ptr.vmem [resolvable:$true] %s1300_s4  ;;  %s5343_s13 = int_to_ptr.hbm [resolvable:$true] %s5342_s13 }
 0x1aa   : > { %s5344_s3 = scalar_lea.hbm %s5343_s13, 1  ;;  %s5348_s19 = scalar_lea.hbm %s7113_s6, 1 }
 0x1ab   : > { %p5345_p1 = scmp.ne.s32.totalorder %s5343_s13, %s5344_s3  ;;  %p5349_p7 = scmp.lt.s32.totalorder %s5343_s13, %s7113_s6 }
 0x1ac   : > { %p5350_p8 = scmp.lt.s32.totalorder %s5348_s19, %s5344_s3 }
 0x1ad   : > { %s1324_s9 = sshll.u32 %s7114_s2, 4  ;;  %p5346_p2 = pnand %p5345_p1, %p138_p4  ;;  %s6370_s9 = int_to_ptr.hbm [resolvable:$true] %s1324_s9 }
 0x1ae   : > { %p5351_p9 = por %p5350_p8, %p5349_p7 }
 0x1af   : > { %p5347_p3 = pneg %p5346_p2 }
 0x1b1   : > { %p5352_p10 = pnand %p5351_p9, %p5347_p3 }
 0x1b3   : > { %5355 = shalt.err (!%p5352_p10)
}
 0x1b4   : > { %s7115_s18 = sld [smem:[#allocation95_spill]]  ;;  %s5799_s26 = smov [#allocation40]  }
 0x1b5   : > { %4355 = dma.hbm_to_vmem [thread:$0]  (%p138_p4), %s6359_s5, 16, %s1301_s4, [#allocation36]  }
 0x1b6   : > { %s1326_s0 = sshll.u32 %s5799_s26, 4  ;;  %s5370_s13 = sshra.s32 %s6370_s9, 4  ;;  %s1327_s0 = int_to_ptr.vmem [resolvable:$true] %s1326_s0  ;;  %s5371_s13 = int_to_ptr.hbm [resolvable:$true] %s5370_s13 }
 0x1b7   : > { %s5372_s3 = scalar_lea.hbm %s5371_s13, 1  ;;  %s5376_s19 = scalar_lea.hbm %s7114_s2, 1 }
 0x1b8   : > { %p5373_p0 = scmp.ne.s32.totalorder %s5371_s13, %s5372_s3  ;;  %p5377_p3 = scmp.lt.s32.totalorder %s5371_s13, %s7114_s2 }
 0x1b9   : > { %p5378_p7 = scmp.lt.s32.totalorder %s5376_s19, %s5372_s3 }
 0x1ba   : > { %s1350_s8 = sshll.u32 %s7115_s18, 4  ;;  %p5374_p1 = pnand %p5373_p0, %p138_p4  ;;  %s6381_s8 = int_to_ptr.hbm [resolvable:$true] %s1350_s8 }
 0x1bb   : > { %p5379_p8 = por %p5378_p7, %p5377_p3 }
 0x1bc   : > { %p5375_p2 = pneg %p5374_p1 }
 0x1be   : > { %p5380_p9 = pnand %p5379_p8, %p5375_p2 }
 0x1c0   : > { %5383 = shalt.err (!%p5380_p9)
}
 0x1c1   : > { %s7116_s5 = sld [smem:[#allocation97_spill]]  ;;  %s5800_s26 = smov [#allocation43]  }
 0x1c2   : > { %4359 = dma.hbm_to_vmem [thread:$0]  (%p138_p4), %s6370_s9, 16, %s1327_s0, [#allocation39]  }
 0x1c3   : > { %s1352_s6 = sshll.u32 %s5800_s26, 4  ;;  %s5398_s13 = sshra.s32 %s6381_s8, 4  ;;  %s1353_s6 = int_to_ptr.vmem [resolvable:$true] %s1352_s6  ;;  %s5399_s13 = int_to_ptr.hbm [resolvable:$true] %s5398_s13 }
 0x1c4   : > { %s5400_s3 = scalar_lea.hbm %s5399_s13, 1  ;;  %s5404_s19 = scalar_lea.hbm %s7115_s18, 1 }
 0x1c5   : > { %p5401_p10 = scmp.ne.s32.totalorder %s5399_s13, %s5400_s3  ;;  %p5405_p2 = scmp.lt.s32.totalorder %s5399_s13, %s7115_s18 }
 0x1c6   : > { %p5406_p3 = scmp.lt.s32.totalorder %s5404_s19, %s5400_s3 }
 0x1c7   : > { %s1376_s4 = sshll.u32 %s7116_s5, 4  ;;  %p5402_p0 = pnand %p5401_p10, %p138_p4  ;;  %s6392_s4 = int_to_ptr.hbm [resolvable:$true] %s1376_s4 }
 0x1c8   : > { %p5407_p7 = por %p5406_p3, %p5405_p2 }
 0x1c9   : > { %p5403_p1 = pneg %p5402_p0 }
 0x1cb   : > { %p5408_p8 = pnand %p5407_p7, %p5403_p1 }
 0x1cd   : > { %5411 = shalt.err (!%p5408_p8)
}
 0x1ce   : > { %s7117_s9 = sld [smem:[#allocation98_spill]]  ;;  %s5801_s0 = smov [#allocation46]  }
 0x1cf   : > { %4363 = dma.hbm_to_vmem [thread:$0]  (%p138_p4), %s6381_s8, 16, %s1353_s6, [#allocation42]  }
 0x1d0   : > { %s1378_s26 = sshll.u32 %s5801_s0, 4  ;;  %s5426_s13 = sshra.s32 %s6392_s4, 4  ;;  %s1379_s26 = int_to_ptr.vmem [resolvable:$true] %s1378_s26  ;;  %s5427_s13 = int_to_ptr.hbm [resolvable:$true] %s5426_s13 }
 0x1d1   : > { %s5428_s3 = scalar_lea.hbm %s5427_s13, 1  ;;  %s5432_s19 = scalar_lea.hbm %s7116_s5, 1 }
 0x1d2   : > { %p5429_p9 = scmp.ne.s32.totalorder %s5427_s13, %s5428_s3  ;;  %p5433_p1 = scmp.lt.s32.totalorder %s5427_s13, %s7116_s5 }
 0x1d3   : > { %p5434_p2 = scmp.lt.s32.totalorder %s5432_s19, %s5428_s3 }
 0x1d4   : > { %s1400_s2 = sshll.u32 %s7117_s9, 4  ;;  %p5430_p10 = pnand %p5429_p9, %p138_p4  ;;  %s6403_s2 = int_to_ptr.hbm [resolvable:$true] %s1400_s2 }
 0x1d5   : > { %p5435_p3 = por %p5434_p2, %p5433_p1 }
 0x1d6   : > { %p5431_p0 = pneg %p5430_p10 }
 0x1d8   : > { %p5436_p7 = pnand %p5435_p3, %p5431_p0 }
 0x1da   : > { %5439 = shalt.err (!%p5436_p7)
}
 0x1db   : > { %s7118_s8 = sld [smem:[#allocation101_spill]]  ;;  %s5802_s0 = smov [#allocation49]  }
 0x1dc   : > { %4367 = dma.hbm_to_vmem [thread:$0]  (%p138_p4), %s6392_s4, 16, %s1379_s26, [#allocation45]  }
 0x1dd   : > { %s1402_s12 = sshll.u32 %s5802_s0, 4  ;;  %s5454_s13 = sshra.s32 %s6403_s2, 4  ;;  %s1403_s12 = int_to_ptr.vmem [resolvable:$true] %s1402_s12  ;;  %s5455_s13 = int_to_ptr.hbm [resolvable:$true] %s5454_s13 }
 0x1de   : > { %s5456_s3 = scalar_lea.hbm %s5455_s13, 1  ;;  %s5460_s19 = scalar_lea.hbm %s7117_s9, 1 }
 0x1df   : > { %p5457_p8 = scmp.ne.s32.totalorder %s5455_s13, %s5456_s3  ;;  %p5461_p0 = scmp.lt.s32.totalorder %s5455_s13, %s7117_s9 }
 0x1e0   : > { %p5462_p1 = scmp.lt.s32.totalorder %s5460_s19, %s5456_s3 }
 0x1e1   : > { %s1417_s6 = sshll.u32 %s7118_s8, 4  ;;  %p5458_p9 = pnand %p5457_p8, %p138_p4  ;;  %s6414_s6 = int_to_ptr.hbm [resolvable:$true] %s1417_s6 }
 0x1e2   : > { %p5463_p2 = por %p5462_p1, %p5461_p0 }
 0x1e3   : > { %p5459_p10 = pneg %p5458_p9 }
 0x1e5   : > { %p5464_p3 = pnand %p5463_p2, %p5459_p10 }
 0x1e7   : > { %5467 = shalt.err (!%p5464_p3)
}
 0x1e8   : > { %4371 = dma.hbm_to_vmem [thread:$0]  (%p138_p4), %s6403_s2, 16, %s1403_s12, [#allocation48]  }
 0x1e9   : > { %s5803_s4 = smov [#allocation50]   ;;  %s5482_s0 = sshra.s32 %s6414_s6, 4  ;;  %s5483_s0 = int_to_ptr.hbm [resolvable:$true] %s5482_s0 }
 0x1ea   : > { %s1419_s26 = sshll.u32 %s5803_s4, 4  ;;  %s5484_s5 = scalar_lea.hbm %s5483_s0, 32  ;;  %s1420_s26 = int_to_ptr.vmem [resolvable:$true] %s1419_s26 }
 0x1eb   : > { %p5485_p7 = scmp.ne.s32.totalorder %s5483_s0, %s5484_s5  ;;  %s5488_s13 = scalar_lea.hbm %s7118_s8, 32 }
 0x1ec   : > { %p5489_p10 = scmp.lt.s32.totalorder %s5483_s0, %s7118_s8  ;;  %p5490_p0 = scmp.lt.s32.totalorder %s5488_s13, %s5484_s5 }
 0x1ed   : > { %p5486_p8 = pnand %p5485_p7, %p138_p4 }
 0x1ee   : > { %p5491_p1 = por %p5490_p0, %p5489_p10 }
 0x1ef   : > { %p5487_p9 = pneg %p5486_p8 }
 0x1f1   : > { %p5492_p2 = pnand %p5491_p1, %p5487_p9 }
 0x1f3   : > { %5495 = shalt.err (!%p5492_p2)
}
 0x1f4   : > { %s7119_s3 = smov 8   ;;  %s7120_s12 = smov 128  }
 0x1f5   : > { %4373 = dma.hbm_to_vmem [thread:$0]  (%p138_p4), %s6414_s6, 512, %s1420_s26, [#allocation51], %s7120_s12, %s7120_s12, %s7119_s3  }
 0x1f6 PF: > { %s7121_s2 = sld [smem:[#allocation72_spill]]  ;;  %p4483_p3 = scmp.lt.s32.totalorder %s5730_s11, 2 }
 0x1f7   : > { %s7044_s5 = sand.u32 1, %s5726_s10   ;;  %s6442_s4 = sshll.u32 %s5730_s11, 3 }
 0x1f8   : > { %s6439_s19 = sshll.u32 %s7044_s5, 3  ;;  %p6446_p7 = pnand %p4483_p3, %p6062_p5 }
 0x1f9   : > { %s1461_s26 = sand.u32 1, %s5730_s11   ;;  %s1465_s3 = scalar_lea.vmem [#allocation5], %s6439_s19 }
 0x1fa   : > { %s1473_s12 = sshll.u32 %s1465_s3, 4  ;;  %s6454_s5 = scalar_lea.sflag [#allocation6], %s1461_s26  ;;  %s1474_s12 = int_to_ptr.vmem [resolvable:$true] %s1473_s12 }
 0x1fb   : > { %p5514_p8 = pneg %p6446_p7 }
 0x1fc   : > { %s1469_s0 = scalar_lea.hbm %s7121_s2, %s6442_s4  ;;  %s5517_s9 = scalar_lea.hbm %s7121_s2, 16 }
 0x1fd   : > { %s1471_s13 = sshll.u32 %s1469_s0, 4  ;;  %s1472_s13 = int_to_ptr.hbm [resolvable:$true] %s1471_s13 }
 0x1fe   : > { %s5510_s8 = sshra.s32 %s1472_s13, 4  ;;  %s5511_s8 = int_to_ptr.hbm [resolvable:$true] %s5510_s8 }
 0x1ff   : > { %s5512_s28 = scalar_lea.hbm %s5511_s8, 8  ;;  %p5518_p0 = scmp.lt.s32.totalorder %s5511_s8, %s7121_s2 }
 0x200   : > { %p5513_p5 = scmp.ne.s32.totalorder %s5511_s8, %s5512_s28  ;;  %p5519_p1 = scmp.lt.s32.totalorder %s5517_s9, %s5512_s28 }
 0x202   : > { %p5515_p9 = pnand %p5514_p8, %p5513_p5  ;;  %p5520_p2 = por %p5519_p1, %p5518_p0 }
 0x204   : > { %p5516_p10 = pneg %p5515_p9 }
 0x206   : > { %p5521_p3 = pnand %p5520_p2, %p5516_p10 }
 0x208   : > { %5524 = shalt.err (!%p5521_p3)
}
 0x209   : > { %s7123_s26 = sld [smem:[#allocation71_spill]]  ;;  %s1446_s8 = scalar_lea.vmem [#allocation2], %s6439_s19 }
 0x20a   : > { %4446 = dma.hbm_to_vmem [thread:$0]  (!%p6446_p7), %s1472_s13, 128, %s1474_s12, %s6454_s5  }
 0x20b   : > { %s1454_s9 = sshll.u32 %s1446_s8, 4  ;;  %s7124_s28 = sand.u32 1, %s5726_s10   ;;  %s1455_s9 = int_to_ptr.vmem [resolvable:$true] %s1454_s9 }
 0x20c   : > { %s1443_s2 = scalar_lea.sflag [#allocation3], %s7124_s28 }
 0x20f   : > { %s1450_s0 = scalar_lea.hbm %s7123_s26, %s6442_s4  ;;  %s5547_s17 = scalar_lea.hbm %s7123_s26, 16 }
 0x210   : > { %s1452_s3 = sshll.u32 %s1450_s0, 4  ;;  %s1453_s3 = int_to_ptr.hbm [resolvable:$true] %s1452_s3 }
 0x211   : > { %s5540_s14 = sshra.s32 %s1453_s3, 4  ;;  %s5541_s14 = int_to_ptr.hbm [resolvable:$true] %s5540_s14 }
 0x212   : > { %s5542_s16 = scalar_lea.hbm %s5541_s14, 8  ;;  %p5548_p1 = scmp.lt.s32.totalorder %s5541_s14, %s7123_s26 }
 0x213   : > { %p5543_p9 = scmp.ne.s32.totalorder %s5541_s14, %s5542_s16  ;;  %p5549_p2 = scmp.lt.s32.totalorder %s5547_s17, %s5542_s16 }
 0x215   : > { %p5545_p10 = pnand %p5543_p9, %p5514_p8  ;;  %p5550_p3 = por %p5549_p2, %p5548_p1 }
 0x217   : > { %p5546_p0 = pneg %p5545_p10 }
 0x219   : > { %p5551_p5 = pnand %p5550_p3, %p5546_p0 }
 0x21b   : > { %5554 = shalt.err (!%p5551_p5)
}
 0x21c   : > { %s7125_s13 = sld [smem:[#allocation73_spill]]  ;;  %s1484_s8 = scalar_lea.vmem [#allocation7], %s6439_s19 }
 0x21d   : > { %4443 = dma.hbm_to_vmem [thread:$0]  (!%p6446_p7), %s1453_s3, 128, %s1455_s9, %s1443_s2  }
 0x21e   : > { %s1492_s28 = sshll.u32 %s1484_s8, 4  ;;  %s1493_s28 = int_to_ptr.vmem [resolvable:$true] %s1492_s28 }
 0x222   : > { %s1488_s12 = scalar_lea.hbm %s7125_s13, %s6442_s4  ;;  %s5577_s16 = scalar_lea.hbm %s7125_s13, 16 }
 0x223   : > { %s1490_s0 = sshll.u32 %s1488_s12, 4  ;;  %s1491_s0 = int_to_ptr.hbm [resolvable:$true] %s1490_s0 }
 0x224   : > { %s5570_s14 = sshra.s32 %s1491_s0, 4  ;;  %s5571_s14 = int_to_ptr.hbm [resolvable:$true] %s5570_s14 }
 0x225   : > { %s5572_s17 = scalar_lea.hbm %s5571_s14, 8  ;;  %p5578_p0 = scmp.lt.s32.totalorder %s5571_s14, %s7125_s13 }
 0x226   : > { %p5573_p9 = scmp.ne.s32.totalorder %s5571_s14, %s5572_s17  ;;  %p5579_p1 = scmp.lt.s32.totalorder %s5577_s16, %s5572_s17 }
 0x228   : > { %p5575_p5 = pnand %p5573_p9, %p5514_p8  ;;  %p5580_p2 = por %p5579_p1, %p5578_p0 }
 0x22a   : > { %p5576_p10 = pneg %p5575_p5 }
 0x22c   : > { %p5581_p3 = pnand %p5580_p2, %p5576_p10 }
 0x22e   : > { %5584 = shalt.err (!%p5581_p3)
}
 0x22f   : > { %4449 = dma.hbm_to_vmem [thread:$0]  (!%p6446_p7), %s1491_s0, 128, %s1493_s28, %s6454_s5  }
 0x230   : > { %1517 = sbr.rel (%p6083_p13) target bundleno = 4445 (0x115d), region = 184  ;;  %s6493_s2 = sand.u32 (!%p6083_p13), 1, %s5722_s7  }
 0x231   : > { %s6496_s19 = sshll.u32 (!%p6083_p13), %s6493_s2, 3  ;;  %s1520_s4 = scalar_lea.sflag (!%p6083_p13), [#allocation3], %s6493_s2 }
 0x232   : > { %s1523_s3 = scalar_lea.vmem (!%p6083_p13), [#allocation2], %s6496_s19 }
 0x235   : > { %5645 = dma.done.wait (%p6068_p6), %s1520_s4, 128  }
 0x236   : > { %5647 = vsyncadd (%p6068_p6), %s1520_s4, 4294967168  ;;  %s1529_s23 = sand.u32 1, %s6044_s15   ;;  %s1533_s6 = scalar_lea.vmem [#allocation5], %s6496_s19 }
 0x237   : > { %s1530_s5 = scalar_lea.sflag [#allocation6], %s1529_s23 }
 0x238   : > { %5649 = dma.done.wait (%p6068_p6), %s1530_s5, 256  }
 0x239   : > { %5651 = vsyncadd (%p6068_p6), %s1530_s5, 4294967040  ;;  %s1543_s9 = scalar_lea.vmem [#allocation7], %s6496_s19 }
 0x23a   : > { %5653 = dma.done.wait (%p138_p4), [#allocation9], 528  }
 0x23b   : > { %5655 = vsyncadd (%p138_p4), [#allocation9], 4294966768 }
 0x23c   : > { %5657 = dma.done.wait (%p138_p4), [#allocation12], 528  }
 0x23d   : > { %5659 = vsyncadd (%p138_p4), [#allocation12], 4294966768 }
 0x23e   : > { %5661 = dma.done.wait (%p138_p4), [#allocation15], 528  }
 0x23f   : > { %5663 = vsyncadd (%p138_p4), [#allocation15], 4294966768 }
 0x240   : > { %5665 = dma.done.wait (%p138_p4), [#allocation18], 528  }
 0x241   : > { %5667 = vsyncadd (%p138_p4), [#allocation18], 4294966768 }
 0x242   : > { %5669 = dma.done.wait (%p138_p4), [#allocation21], 528  }
 0x243   : > { %5671 = vsyncadd (%p138_p4), [#allocation21], 4294966768 }
 0x244   : > { %5673 = dma.done.wait (%p138_p4), [#allocation24], 32  }
 0x245   : > { %5675 = vsyncadd (%p138_p4), [#allocation24], 4294967264 }
 0x246   : > { %5677 = dma.done.wait (%p138_p4), [#allocation27], 528  }
 0x247   : > { %5679 = vsyncadd (%p138_p4), [#allocation27], 4294966768 }
 0x248   : > { %5681 = dma.done.wait (%p138_p4), [#allocation30], 528  }
 0x249   : > { %5683 = vsyncadd (%p138_p4), [#allocation30], 4294966768 }
 0x24a   : > { %5685 = dma.done.wait (%p138_p4), [#allocation33], 528  }
 0x24b   : > { %5687 = vsyncadd (%p138_p4), [#allocation33], 4294966768 }
 0x24c   : > { %5689 = dma.done.wait (%p138_p4), [#allocation36], 528  }
 0x24d   : > { %5691 = vsyncadd (%p138_p4), [#allocation36], 4294966768 }
 0x24e   : > { %5693 = dma.done.wait (%p138_p4), [#allocation39], 528  }
 0x24f   : > { %5695 = vsyncadd (%p138_p4), [#allocation39], 4294966768 }
 0x250   : > { %5697 = dma.done.wait (%p138_p4), [#allocation42], 528  }
 0x251   : > { %5699 = vsyncadd (%p138_p4), [#allocation42], 4294966768 }
 0x252   : > { %5701 = dma.done.wait (%p138_p4), [#allocation45], 528  }
 0x253   : > { %5703 = vsyncadd (%p138_p4), [#allocation45], 4294966768 }
 0x254   : > { %5705 = dma.done.wait (%p138_p4), [#allocation48], 32  }
 0x255   : > { %5707 = vsyncadd (%p138_p4), [#allocation48], 4294967264 }
 0x256   : > { %5709 = dma.done.wait (%p138_p4), [#allocation51], 512  }
 0x257   : > { %5711 = vsyncadd (%p138_p4), [#allocation51], 4294966784  ;;  %s7126_s1 = sld [smem:[#allocation76_spill]]  ;;  %vm1832_vm0 = vcmask 261120   ;;  %v1915_v0 = vld [vmem:[#allocation11 + $0x18] sm:$0xff]  ;;  %v1914_v2 = vld [vmem:[#allocation11 + $0x10] sm:$0xff] }
 0x258   : > { %v1955_v1 = vld [vmem:[#allocation14 + $0x18] sm:$0xff]  ;;  %4168 = vmatpush.xpose.msk.msra.mxu2 %vm1832_vm0, %v1915_v0  ;;  %v1954_v3 = vld [vmem:[#allocation14 + $0x10] sm:$0xff]  ;;  %v1913_v8 = vld [vmem:[#allocation11 + $0x8] sm:$0xff]  ;;  %s7127_s12 = sld [smem:[#allocation77_spill]]  ;;  %vm2038_vm1 = vcmask 64512   ;;  %s5804_s0 = smov 112  }
 0x259   : > { %4173 = vmatpush.xpose.msk.msra.mxu3 %vm1832_vm0, %v1955_v1  ;;  %v1871_v5 = vld [vmem:[#allocation8 + $0x18] sm:$0xff]  ;;  %v1870_v7 = vld [vmem:[#allocation8 + $0x10] sm:$0xff]  ;;  %v1869_v11 = vld [vmem:[#allocation8 + $0x8] sm:$0xff]  ;;  %s5805_s8 = smov 120   ;;  %s5806_s28 = smov 104  }
 0x25a   : > { %4163 = vmatpush.xpose.msk.msra.mxu1 %vm1832_vm0, %v1871_v5  ;;  %v1953_v9 = vld [vmem:[#allocation14 + $0x8] sm:$0xff]  ;;  %v1912_v12 = vld [vmem:[#allocation11] sm:$0xff]  ;;  %v1995_v19 = vld [vmem:[#allocation17 + $0x10] sm:$0xff]  ;;  %p1808_p4 = scmp.lt.s32.totalorder %s6044_s15, 1  ;;  %s7128_s14 = sld [smem:[#allocation75_spill]] }
 0x25b   : > { %v1952_v13 = vld [vmem:[#allocation14] sm:$0xff]  ;;  %v6591_v16 = vld [vmem:[%s1523_s3] sm:$0xff]  ;;  %v4640_v23 = vld [vmem:[#allocation10] ss:$0 sm:$0xff]  ;;  %s7129_s17 = sld [smem:[#allocation74_spill]] }
 0x25c   : > { %4169 = vmatpush.xpose.msk.msra.mxu2 %vm1832_vm0, %v1914_v2  ;;  %v1868_v15 = vld [vmem:[#allocation8] sm:$0xff]  ;;  %v1994_v20 = vld [vmem:[#allocation17 + $0x8] sm:$0xff]  ;;  %v6657_v1 = vld [vmem:[#allocation20 + $0x10] sm:$0xff]  ;;  %s1809_s16 = scalar_select %p1808_p4, %s6044_s15, 1 }
 0x25d   : > { %v1827_v4 = vld [vmem:[%s7126_s1 + $0x18] sm:$0xff]  ;;  %v1826_v6 = vld [vmem:[%s7126_s1 + $0x10] sm:$0xff]  ;;  %4174 = vmatpush.xpose.msk.msra.mxu3 %vm1832_vm0, %v1954_v3  ;;  %v1825_v10 = vld [vmem:[%s7126_s1 + $0x8] sm:$0xff]  ;;  %s7130_s5 = sld [smem:[#allocation99_spill]] }
 0x25e   : > { %4158 = vmatpush.xpose.msk.msra.mxu0 %vm1832_vm0, %v1827_v4  ;;  %4164 = vmatpush.xpose.msk.msra.mxu1 %vm1832_vm0, %v1870_v7  ;;  %v1824_v14 = vld [vmem:[%s7126_s1] sm:$0xff]  ;;  %v6595_v17 = vld [vmem:[%s1533_s6] sm:$0xff]  ;;  %s4314_s4 = sshll.u32 %s1809_s16, 4  ;;  %s7131_s6 = sld [smem:[#allocation100_spill]] }
 0x25f   : > { %v1996_v18 = vld [vmem:[#allocation17 + $0x18] sm:$0xff]  ;;  %v1993_v21 = vld [vmem:[#allocation17] sm:$0xff]  ;;  %v4639_v22 = vld [vmem:[%s7127_s12] ss:$0 sm:$0xff]  ;;  %s7133_s12 = sld [smem:[#allocation103_spill]] }
 0x260   : > { %4170 = vmatpush.xpose.msk.msra.mxu2 %vm1832_vm0, %v1913_v8  ;;  %v4637_v26 = vld [vmem:[#allocation13] ss:$0 sm:$0xff]  ;;  %v4638_v27 = vld [vmem:[#allocation16] ss:$0 sm:$0xff]  ;;  %v4641_v39 = vld [vmem:[#allocation19] ss:$0 sm:$0xff]  ;;  %s1817_s3 = scalar_lea.vmem %s7128_s14, %s4314_s4 }
 0x261   : > { %4175 = vmatpush.xpose.msk.msra.mxu3 %vm1832_vm0, %v1953_v9  ;;  %v6635_v52 = vld [vmem:[#allocation20 + $0x18] sm:$0xff]  ;;  %v6647_v63 = vld [vmem:[#allocation20 + $0x8] sm:$0xff]  ;;  %v6651_v0 = vld [vmem:[#allocation20] sm:$0xff]  ;;  %s1812_s23 = scalar_lea.vmem %s7129_s17, %s4314_s4  ;;  %s4311_s14 = sshll.u32 %s6044_s15, 3 }
 0x262   : > { %4159 = vmatpush.xpose.msk.msra.mxu0 %vm1832_vm0, %v1826_v6  ;;  %4165 = vmatpush.xpose.msk.msra.mxu1 %vm1832_vm0, %v1869_v11  ;;  %s1807_s4 = scalar_lea.vmem [#allocation52], %s6496_s19  ;;  %s3613_s15 = scalar_lea.sflag [#allocation4], %s6493_s2 }
 0x264   : > { %4171 = vmatpush.xpose.msk.msra.mxu2 %vm1832_vm0, %v1912_v12 }
 0x265   : > { %4176 = vmatpush.xpose.msk.msra.mxu3 %vm1832_vm0, %v1952_v13 }
 0x266   : > { %4160 = vmatpush.xpose.msk.msra.mxu0 %vm1832_vm0, %v1825_v10  ;;  %4166 = vmatpush.xpose.msk.msra.mxu1 %vm1832_vm0, %v1868_v15 }
 0x267   : > { %4172 = vmatmul.msk.f32.vlgmr.msra.gmra.mxu2 %vm1832_vm0, %v6591_v16 }
 0x268   : > { %4177 = vmatmul.msk.f32.vlgmr.msra.gmra.mxu3 %vm1832_vm0, %v6595_v17 }
 0x269   : > { %4167 = vmatmul.msk.f32.vlgmr.msra.gmra.mxu1 %vm1832_vm0, %v6595_v17 }
 0x26a   : > { %4161 = vmatpush.xpose.msk.msra.mxu0 %vm1832_vm0, %v1824_v14 }
 0x26d   : > { %4162 = vmatmul.msk.f32.vlgmr.msra.gmra.mxu0 %vm1832_vm0, %v6591_v16 }
 0x26e   : > { %4178 = vmatpush.xpose.msk.msrb.mxu0 %vm1832_vm0, %v1996_v18 }
 0x272   : > { %4179 = vmatpush.xpose.msk.msrb.mxu0 %vm1832_vm0, %v1995_v19 }
 0x276   : > { %4180 = vmatpush.xpose.msk.msrb.mxu0 %vm1832_vm0, %v1994_v20 }
 0x27a   : > { %4181 = vmatpush.xpose.msk.msrb.mxu0 %vm1832_vm0, %v1993_v21 }
 0x27d   : > { %4182 = vmatmul.msk.f32.vlgmr.msrb.gmra.mxu0 %vm1832_vm0, %v6591_v16 }
 0x2e6   : > { %v1908_v25 = vpop.f32.mrf.mxu1 }
 0x2e7   : > { %v1909_v29 = vadd.f32 %v4640_v23, %v1908_v25 }
 0x2ea   : > { %v1865_v24 = vpop.f32.mrf.mxu0  ;;  %v1949_v30 = vpop.f32.mrf.mxu2 }
 0x2eb   : > { %v1866_v28 = vadd.f32 %v4639_v22, %v1865_v24  ;;  %v1989_v31 = vpop.f32.mrf.mxu3  ;;  %v1950_v32 = vadd.f32 %v4637_v26, %v1949_v30 }
 0x2ec   : > { %v1990_v33 = vadd.f32 %v4638_v27, %v1989_v31 }
 0x2ed   : > { %v1911_v34 = vadd.f32 %v1909_v29, %v1866_v28 }
 0x2ee   : > { %v1992_v35 = vadd.f32 %v1990_v33, %v1950_v32 }
 0x2ef   : > { %v2033_v36 = vmul.f32 0.35355338, %v1911_v34 }
 0x2f0   : > { %2267 = vrot.lane.b32.xlu1 %v1992_v35, %s5804_s0  ;;  %2114 = vrot.lane.b32.xlu0 %v1992_v35, %s5805_s8 }
 0x2f1   : > { %4183 = vmatpush.xpose.msk.msrb.mxu1 %vm2038_vm1, %v1992_v35 }
 0x2f4   : > { %4184 = vmatmul.msk.f32.vlgmr.msrb.gmra.mxu1 %vm2038_vm1, %v2033_v36 }
 0x2f8   : > { %2265 = vrot.lane.b32.xlu1 %v2033_v36, %s5804_s0  ;;  %2112 = vrot.lane.b32.xlu0 %v2033_v36, %s5805_s8 }
 0x2fa   : > { %v2030_v40 = vpop.f32.mrf.mxu0 }
 0x2fb   : > { %v6622_v41 = vadd.f32 %v4641_v39, %v2030_v40 }
 0x2fd   : > { %2107 = vmatpush.msrb.mxu2 %v6622_v41 }
 0x362   : > { %v2268_v37 = vpop.permute.xlu1 %2267  ;;  %v2115_v38 = vpop.permute.xlu0 %2114 }
 0x363   : > { %4186 = vmatpush.xpose.msk.msrb.mxu3 %vm2038_vm1, %v2115_v38  ;;  %4199 = vmatpush.xpose.msk.msra.mxu0 %vm2038_vm1, %v2268_v37 }
 0x367   : > { %4194 = vmatpush.xpose.msk.msra.mxu3 %vm2038_vm1, %v6635_v52 }
 0x36a   : > { %v2266_v42 = vpop.permute.xlu1 %2265  ;;  %v2113_v43 = vpop.permute.xlu0 %2112 }
 0x36b   : > { %4187 = vmatmul.msk.f32.vlgmr.msrb.gmra.mxu3 %vm2038_vm1, %v2113_v43  ;;  %4200 = vmatmul.msk.f32.vlgmr.msra.gmra.mxu0 %vm2038_vm1, %v2266_v42 }
 0x36c   : > { %4195 = vmatpush.xpose.msk.msra.mxu3 %vm2038_vm1, %v6657_v1 }
 0x370   : > { %4196 = vmatpush.xpose.msk.msra.mxu3 %vm2038_vm1, %v6647_v63 }
 0x371   : > { %v2062_v58 = vpop.f32.mrf.mxu1 }
 0x372   : > { %v2065_v61 = vsel %vm2038_vm1, %v2062_v58, -inf }
 0x374   : > { %4197 = vmatpush.xpose.msk.msra.mxu3 %vm2038_vm1, %v6651_v0 }
 0x3e8   : > { %v2290_v46 = vpop.f32.mrf.mxu0 }
 0x3e9   : > { %v2293_v47 = vsel %vm2038_vm1, %v2290_v46, -inf }
 0x3ee   : > { %v2137_v44 = vpop.f32.mrf.mxu3 }
 0x3ef   : > { %v2140_v45 = vsel %vm2038_vm1, %v2137_v44, -inf }
 0x3f0   : > { %2141 = vmax.xlane.f32.xlu2 %v2140_v45 }
 0x3f8   : > { %2294 = vmax.xlane.f32.xlu2 %v2293_v47 }
 0x410   : > { %2165 = vrot.lane.b32.xlu2 %v6622_v41, %s5805_s8 }
 0x418   : > { %2317 = vrot.lane.b32.xlu2 %v6622_v41, %s5804_s0 }
 0x420   : > { %2385 = vrot.lane.b32.xlu2 %v1992_v35, %s5806_s28 }
 0x428   : > { %2383 = vrot.lane.b32.xlu2 %v2033_v36, %s5806_s28 }
 0x463   : > { %v2142_v48 = vpop.xlane.xlu2 %2141 }
 0x464   : > { %v2143_v49 = vsub.f32 %v2137_v44, %v2142_v48 }
 0x466   : > { %v2144_v50 = vmul.f32 1.442695, %v2143_v49 }
 0x468   : > { %4658 = vpow2.f32 %v2144_v50 }
 0x46b   : > { %v2295_v51 = vpop.xlane.xlu2 %2294 }
 0x46c   : > { %v2296_v53 = vsub.f32 %v2290_v46, %v2295_v51 }
 0x46e   : > { %v4659_v54 = vpop.eup %4658  ;;  %v2297_v55 = vmul.f32 1.442695, %v2296_v53 }
 0x46f   : > { %v2146_v56 = vsel %vm2038_vm1, %v4659_v54, 0.0 }
 0x470   : > { %4660 = vpow2.f32 %v2297_v55  ;;  %2147 = vadd.xlane.f32.xlu0 %v2146_v56 }
 0x473   : > { %v2166_v57 = vpop.permute.xlu2 %2165 }
 0x474   : > { %2186 = vmatpush.msra.mxu1 %v2166_v57 }
 0x476   : > { %v6640_v59 = vpop.eup %4660 }
 0x477   : > { %v2299_v60 = vsel %vm2038_vm1, %v6640_v59, 0.0 }
 0x478   : > { %2300 = vadd.xlane.f32.xlu1 %v2299_v60  ;;  %2066 = vmax.xlane.f32.xlu0 %v2065_v61 }
 0x47b   : > { %v2318_v62 = vpop.permute.xlu2 %2317 }
 0x47c   : > { %2338 = vmatpush.msrb.mxu1 %v2318_v62 }
 0x483   : > { %v2386_v25 = vpop.permute.xlu2 %2385 }
 0x48b   : > { %v2384_v35 = vpop.permute.xlu2 %2383 }
 0x48c   : > { %2201 = vrot.lane.b32.xlu0 %v6635_v52, %s5805_s8 }
 0x494   : > { %2197 = vrot.lane.b32.xlu0 %v6647_v63, %s5805_s8 }
 0x49c   : > { %2195 = vrot.lane.b32.xlu0 %v6651_v0, %s5805_s8 }
 0x4a4   : > { %2467 = vrot.lane.b32.xlu0 %v6635_v52, %s5806_s28 }
 0x4ac   : > { %2347 = vrot.lane.b32.xlu0 %v6657_v1, %s5804_s0 }
 0x4b4   : > { %2345 = vrot.lane.b32.xlu0 %v6647_v63, %s5804_s0 }
 0x4bc   : > { %2343 = vrot.lane.b32.xlu0 %v6651_v0, %s5804_s0 }
 0x4e3   : > { %v2148_v2 = vpop.xlane.xlu0 %2147 }
 0x4e4   : > { %4662 = vrcp.f32 %v2148_v2  ;;  %v2160_v9 = vand.u32 2147483648, %v2148_v2  ;;  %v2158_v11 = vand.u32 2147483647, %v2148_v2  ;;  %vm2154_vm3 = vweird.f32 %v2148_v2 }
 0x4e6   : > { %v2161_v15 = vor.u32 1.1754944e-38, %v2160_v9  ;;  %vm2159_vm5 = vcmp.eq.f32.partialorder %v2158_v11, 8.507059e+37 }
 0x4ea   : > { %v4663_v3 = vpop.eup %4662 }
 0x4eb   : > { %v2150_v4 = vmul.f32 %v4663_v3, %v2148_v2  ;;  %v2301_v5 = vpop.xlane.xlu1 %2300  ;;  %v2067_v6 = vpop.xlane.xlu0 %2066  ;;  %vm2155_vm2 = vweird.f32 %v4663_v3 }
 0x4ec   : > { %4664 = vrcp.f32 %v2301_v5  ;;  %v2068_v8 = vsub.f32 %v2062_v58, %v2067_v6  ;;  %vm2156_vm4 = vmor %vm2154_vm3, %vm2155_vm2  ;;  %v2313_v23 = vand.u32 2147483648, %v2301_v5  ;;  %v2311_v27 = vand.u32 2147483647, %v2301_v5 }
 0x4ed   : > { %v2151_v7 = vsub.f32 1.0, %v2150_v4  ;;  %vm2307_vm7 = vweird.f32 %v2301_v5 }
 0x4ee   : > { %v2069_v12 = vmul.f32 1.442695, %v2068_v8  ;;  %v2314_v30 = vor.u32 1.1754944e-38, %v2313_v23  ;;  %vm2312_vm9 = vcmp.eq.f32.partialorder %v2311_v27, 8.507059e+37 }
 0x4ef   : > { %v2152_v10 = vmul.f32 %v4663_v3, %v2151_v7 }
 0x4f0   : > { %4666 = vpow2.f32 %v2069_v12 }
 0x4f1   : > { %v2153_v13 = vadd.f32 %v4663_v3, %v2152_v10 }
 0x4f2   : > { %v4665_v14 = vpop.eup %4664 }
 0x4f3   : > { %v2157_v18 = vsel %vm2156_vm4, %v4663_v3, %v2153_v13  ;;  %v2303_v19 = vmul.f32 %v4665_v14, %v2301_v5  ;;  %vm2308_vm6 = vweird.f32 %v4665_v14 }
 0x4f4   : > { %v2162_v20 = vsel %vm2159_vm5, %v2161_v15, %v2157_v18  ;;  %vm2309_vm8 = vmor %vm2307_vm7, %vm2308_vm6 }
 0x4f5   : > { %v2304_v21 = vsub.f32 1.0, %v2303_v19  ;;  %v2163_v22 = vmul.f32 %v4659_v54, %v2162_v20 }
 0x4f6   : > { %v4667_v24 = vpop.eup %4666 }
 0x4f7   : > { %v2305_v26 = vmul.f32 %v4665_v14, %v2304_v21  ;;  %4188 = vmatmul.msk.f32.vlgmr.msra.gmra.mxu1 %vm2038_vm1, %v2163_v22  ;;  %v2071_v28 = vsel %vm2038_vm1, %v4667_v24, 0.0 }
 0x4f8   : > { %4207 = vmatpush.xpose.msk.msra.mxu1 %vm2038_vm1, %v2386_v25  ;;  %2072 = vadd.xlane.f32.xlu2 %v2071_v28 }
 0x4f9   : > { %v2306_v29 = vadd.f32 %v4665_v14, %v2305_v26  ;;  %v4642_v26 = vld [vmem:[#allocation22] ss:$0 sm:$0xff] }
 0x4fb   : > { %v2310_v31 = vsel %vm2309_vm8, %v4665_v14, %v2306_v29  ;;  %vm2881_vm8 = vcmask 130048  }
 0x4fc   : > { %v2315_v32 = vsel %vm2312_vm9, %v2314_v30, %v2310_v31 }
 0x4fd   : > { %v2316_v33 = vmul.f32 %v6640_v59, %v2315_v32  ;;  %v5807_v32 = vmov 32.0  }
 0x4fe   : > { %v2202_v34 = vpop.permute.xlu0 %2201 }
 0x4ff   : > { %4201 = vmatmul.msk.f32.vlgmr.msrb.gmra.mxu1 %vm2038_vm1, %v2316_v33  ;;  %4189 = vmatpush.xpose.msk.msra.mxu2 %vm2038_vm1, %v2202_v34  ;;  %v2684_v33 = vld [vmem:[#allocation35 + $0x18] sm:$0xff] }
 0x500   : > { %v2592_v34 = vld [vmem:[#allocation32 + $0x18] sm:$0xff] }
 0x506   : > { %v2198_v36 = vpop.permute.xlu0 %2197 }
 0x507   : > { %4208 = vmatmul.msk.f32.vlgmr.msra.gmra.mxu1 %vm2038_vm1, %v2384_v35  ;;  %v2683_v35 = vld [vmem:[#allocation35 + $0x10] sm:$0xff] }
 0x50e   : > { %v2196_v37 = vpop.permute.xlu0 %2195 }
 0x510   : > { %2349 = vrot.lane.b32.xlu2 %v6635_v52, %s5804_s0 }
 0x516   : > { %v2468_v38 = vpop.permute.xlu0 %2467 }
 0x517   : > { %4210 = vmatpush.xpose.msk.msrb.mxu3 %vm2038_vm1, %v2468_v38  ;;  %v2682_v38 = vld [vmem:[#allocation35 + $0x8] sm:$0xff] }
 0x51e   : > { %v2348_v39 = vpop.permute.xlu0 %2347 }
 0x526   : > { %v2346_v43 = vpop.permute.xlu0 %2345 }
 0x52e   : > { %v2344_v57 = vpop.permute.xlu0 %2343 }
 0x56b   : > { %v2073_v40 = vpop.xlane.xlu2 %2072 }
 0x56c   : > { %4668 = vrcp.f32 %v2073_v40  ;;  %v2085_v48 = vand.u32 2147483648, %v2073_v40  ;;  %v2083_v50 = vand.u32 2147483647, %v2073_v40  ;;  %vm2079_vm11 = vweird.f32 %v2073_v40 }
 0x56e   : > { %v2086_v52 = vor.u32 1.1754944e-38, %v2085_v48  ;;  %vm2084_vm13 = vcmp.eq.f32.partialorder %v2083_v50, 8.507059e+37  ;;  %v2776_v48 = vld [vmem:[#allocation41 + $0x10] sm:$0xff]  ;;  %v1823_v50 = vld [vmem:[%s1817_s3 + $0x8] sm:$0xff] }
 0x572   : > { %v4669_v42 = vpop.eup %4668 }
 0x573   : > { %v2075_v44 = vmul.f32 %v4669_v42, %v2073_v40  ;;  %v2350_v45 = vpop.permute.xlu2 %2349  ;;  %vm2080_vm10 = vweird.f32 %v4669_v42 }
 0x574   : > { %v2188_v46 = vpop.f32.mrf.mxu1  ;;  %4202 = vmatpush.xpose.msk.msrb.mxu0 %vm2038_vm1, %v2350_v45  ;;  %vm2081_vm12 = vmor %vm2079_vm11, %vm2080_vm10  ;;  %v1822_v45 = vld [vmem:[%s1817_s3] sm:$0xff]  ;;  %s3625_s3 = sshll.u32 %s1807_s4, 4  ;;  %s3626_s3 = int_to_ptr.vmem [resolvable:$true] %s3625_s3 }
 0x575   : > { %v2076_v47 = vsub.f32 1.0, %v2075_v44  ;;  %v2777_v44 = vld [vmem:[#allocation41 + $0x18] sm:$0xff] }
 0x577   : > { %v2077_v49 = vmul.f32 %v4669_v42, %v2076_v47 }
 0x578   : > { %4203 = vmatpush.xpose.msk.msrb.mxu0 %vm2038_vm1, %v2348_v39  ;;  %v2590_v39 = vld [vmem:[#allocation32 + $0x8] sm:$0xff] }
 0x579   : > { %v2078_v51 = vadd.f32 %v4669_v42, %v2077_v49 }
 0x57b   : > { %v2082_v54 = vsel %vm2081_vm12, %v4669_v42, %v2078_v51  ;;  %v2681_v42 = vld [vmem:[#allocation35] sm:$0xff] }
 0x57c   : > { %v2340_v53 = vpop.f32.mrf.mxu1  ;;  %4204 = vmatpush.xpose.msk.msrb.mxu0 %vm2038_vm1, %v2346_v43  ;;  %v2087_v55 = vsel %vm2084_vm13, %v2086_v52, %v2082_v54  ;;  %v2589_v43 = vld [vmem:[#allocation32] sm:$0xff] }
 0x57d   : > { %v2088_v56 = vmul.f32 %v4667_v24, %v2087_v55  ;;  %v1821_v51 = vld [vmem:[%s1812_s23 + $0x8] sm:$0xff] }
 0x57f   : > { %4185 = vmatmul.msk.f32.vlgmr.msrb.gmra.mxu2 %vm2038_vm1, %v2088_v56 }
 0x580   : > { %4205 = vmatpush.xpose.msk.msrb.mxu0 %vm2038_vm1, %v2344_v57 }
 0x583   : > { %4206 = vmatmul.msk.f32.vlgmr.msrb.gmra.mxu0 %vm2038_vm1, %v2340_v53 }
 0x584   : > { %v2408_v58 = vpop.f32.mrf.mxu1 }
 0x585   : > { %v2411_v59 = vsel %vm2038_vm1, %v2408_v58, -inf }
 0x586   : > { %2412 = vmax.xlane.f32.xlu1 %v2411_v59  ;;  %v2774_v59 = vld [vmem:[#allocation41] sm:$0xff] }
 0x59f   : > { %2199 = vrot.lane.b32.xlu1 %v6657_v1, %s5805_s8 }
 0x5f9   : > { %v2413_v60 = vpop.xlane.xlu1 %2412 }
 0x5fa   : > { %v2414_v61 = vsub.f32 %v2408_v58, %v2413_v60  ;;  %v2775_v58 = vld [vmem:[#allocation41 + $0x8] sm:$0xff] }
 0x5fb   : > { %v2549_v60 = vld [vmem:[#allocation26 + $0x18] sm:$0xff] }
 0x5fc   : > { %v2415_v62 = vmul.f32 1.442695, %v2414_v61  ;;  %v2773_v61 = vld [vmem:[%s1543_s9] sm:$0xff]  ;;  %4215 = vmatpush.xpose.msk.msrb.mxu1 %vm1832_vm0, %v2549_v60  ;;  %s7132_s9 = sld [smem:[#allocation102_spill]] }
 0x5fe   : > { %4670 = vpow2.f32 %v2415_v62  ;;  %v2548_v62 = vld [vmem:[#allocation26 + $0x10] sm:$0xff] }
 0x600   : > { %v2379_v24 = vpop.f32.mrf.mxu0  ;;  %4216 = vmatpush.xpose.msk.msrb.mxu1 %vm1832_vm0, %v2548_v62 }
 0x602   : > { %v2109_v2 = vpop.f32.mrf.mxu2 }
 0x603   : > { %4198 = vmatmul.msk.f32.vlgmr.msra.gmra.mxu3 %vm2038_vm1, %v2109_v2  ;;  %v2547_v2 = vld [vmem:[#allocation26 + $0x8] sm:$0xff] }
 0x604   : > { %v4671_v3 = vpop.eup %4670  ;;  %4217 = vmatpush.xpose.msk.msrb.mxu1 %vm1832_vm0, %v2547_v2 }
 0x605   : > { %v2417_v4 = vsel %vm2038_vm1, %v4671_v3, 0.0 }
 0x606   : > { %2418 = vadd.xlane.f32.xlu1 %v2417_v4  ;;  %v2733_v4 = vld [vmem:[#allocation29 + $0x18] sm:$0xff] }
 0x611   : > { %v2200_v5 = vpop.permute.xlu1 %2199 }
 0x612   : > { %4190 = vmatpush.xpose.msk.msra.mxu2 %vm2038_vm1, %v2200_v5  ;;  %v2641_v5 = vld [vmem:[#allocation38 + $0x18] sm:$0xff] }
 0x613   : > { %4226 = vmatpush.xpose.msk.msra.mxu0 %vm1832_vm0, %v2641_v5 }
 0x616   : > { %4191 = vmatpush.xpose.msk.msra.mxu2 %vm2038_vm1, %v2198_v36  ;;  %v2591_v36 = vld [vmem:[#allocation32 + $0x10] sm:$0xff] }
 0x61a   : > { %4192 = vmatpush.xpose.msk.msra.mxu2 %vm2038_vm1, %v2196_v37 }
 0x61d   : > { %4193 = vmatmul.msk.f32.vlgmr.msra.gmra.mxu2 %vm2038_vm1, %v2188_v46  ;;  %v1820_v46 = vld [vmem:[%s1812_s23] sm:$0xff] }
 0x61f   : > { %2435 = vrot.lane.b32.xlu1 %v6622_v41, %s5806_s28 }
 0x627   : > { %2465 = vrot.lane.b32.xlu1 %v6657_v1, %s5806_s28 }
 0x62f   : > { %2463 = vrot.lane.b32.xlu1 %v6647_v63, %s5806_s28 }
 0x637   : > { %2461 = vrot.lane.b32.xlu1 %v6651_v0, %s5806_s28 }
 0x679   : > { %v2419_v6 = vpop.xlane.xlu1 %2418 }
 0x67a   : > { %4672 = vrcp.f32 %v2419_v6  ;;  %v2431_v12 = vand.u32 2147483648, %v2419_v6  ;;  %vm2425_vm15 = vweird.f32 %v2419_v6  ;;  %v2429_v41 = vand.u32 2147483647, %v2419_v6 }
 0x67b   : > { %4674 = vrcp.f32 %v5807_v32  ;;  %v4644_v32 = vld [vmem:[#allocation25] ss:$0 sm:$0xff] }
 0x67c   : > { %v2432_v1 = vor.u32 1.1754944e-38, %v2431_v12  ;;  %vm2430_vm3 = vcmp.eq.f32.partialorder %v2429_v41, 8.507059e+37  ;;  %v2638_v41 = vld [vmem:[#allocation38] sm:$0xff] }
 0x680   : > { %v4673_v7 = vpop.eup %4672 }
 0x681   : > { %v2421_v8 = vmul.f32 %v4673_v7, %v2419_v6  ;;  %vm2426_vm14 = vweird.f32 %v4673_v7  ;;  %v4675_v37 = vpop.eup %4674  ;;  %v2732_v6 = vld [vmem:[#allocation29 + $0x10] sm:$0xff] }
 0x682   : > { %vm2427_vm2 = vmor %vm2425_vm15, %vm2426_vm14  ;;  %vm2515_vm4 = vweird.f32 %v4675_v37 }
 0x683   : > { %v2422_v9 = vsub.f32 1.0, %v2421_v8  ;;  %v2731_v8 = vld [vmem:[#allocation29 + $0x8] sm:$0xff] }
 0x685   : > { %v2423_v10 = vmul.f32 %v4673_v7, %v2422_v9  ;;  %v2639_v9 = vld [vmem:[#allocation38 + $0x8] sm:$0xff] }
 0x686   : > { %v2262_v22 = vpop.f32.mrf.mxu3 }
 0x687   : > { %v2424_v11 = vadd.f32 %v4673_v7, %v2423_v10 }
 0x689   : > { %v2428_v13 = vsel %vm2427_vm2, %v4673_v7, %v2424_v11  ;;  %v2640_v7 = vld [vmem:[#allocation38 + $0x10] sm:$0xff]  ;;  %v2730_v11 = vld [vmem:[#allocation29] sm:$0xff] }
 0x68a   : > { %v2433_v14 = vsel %vm2430_vm3, %v2432_v1, %v2428_v13  ;;  %4227 = vmatpush.xpose.msk.msra.mxu0 %vm1832_vm0, %v2640_v7 }
 0x68b   : > { %v2434_v15 = vmul.f32 %v4671_v3, %v2433_v14  ;;  %v2546_v3 = vld [vmem:[#allocation26] sm:$0xff] }
 0x68c   : > { %4218 = vmatpush.xpose.msk.msrb.mxu1 %vm1832_vm0, %v2546_v3 }
 0x68e   : > { %4228 = vmatpush.xpose.msk.msra.mxu0 %vm1832_vm0, %v2639_v9 }
 0x690   : > { %4238 = vmatpush.xpose.msk.msra.mxu1 %vm1832_vm0, %v2733_v4 }
 0x691   : > { %v2436_v63 = vpop.permute.xlu1 %2435 }
 0x692   : > { %2456 = vmatpush.msrb.mxu2 %v2436_v63  ;;  %4229 = vmatpush.xpose.msk.msra.mxu0 %vm1832_vm0, %v2638_v41  ;;  %v4645_v63 = vld [vmem:[#allocation37] ss:$0 sm:$0xff] }
 0x693   : > { %4209 = vmatmul.msk.f32.vlgmr.msrb.gmra.mxu2 %vm2038_vm1, %v2434_v15 }
 0x694   : > { %4220 = vmatpush.xpose.msk.msra.mxu2 %vm1832_vm0, %v2592_v34  ;;  %4239 = vmatpush.xpose.msk.msra.mxu1 %vm1832_vm0, %v2732_v6 }
 0x695   : > { %4230 = vmatmul.msk.f32.vlgmr.msra.gmra.mxu0 %vm1832_vm0, %v1820_v46 }
 0x698   : > { %4221 = vmatpush.xpose.msk.msra.mxu2 %vm1832_vm0, %v2591_v36  ;;  %4240 = vmatpush.xpose.msk.msra.mxu1 %vm1832_vm0, %v2731_v8 }
 0x699   : > { %v2466_v0 = vpop.permute.xlu1 %2465 }
 0x69a   : > { %4211 = vmatpush.xpose.msk.msrb.mxu3 %vm2038_vm1, %v2466_v0 }
 0x69c   : > { %4222 = vmatpush.xpose.msk.msra.mxu2 %vm1832_vm0, %v2590_v39  ;;  %4241 = vmatpush.xpose.msk.msra.mxu1 %vm1832_vm0, %v2730_v11 }
 0x69d   : > { %4231 = vmatmul.msk.f32.gmra.mxu0 %vm1832_vm0, %v1821_v51 }
 0x6a0   : > { %v2231_v20 = vpop.f32.mrf.mxu2  ;;  %4223 = vmatpush.xpose.msk.msra.mxu2 %vm1832_vm0, %v2589_v43 }
 0x6a1   : > { %v2464_v18 = vpop.permute.xlu1 %2463  ;;  %v2263_v23 = vadd.f32 %v2262_v22, %v2231_v20 }
 0x6a2   : > { %4212 = vmatpush.xpose.msk.msrb.mxu3 %vm2038_vm1, %v2464_v18  ;;  %v4646_v18 = vld [vmem:[#allocation34] ss:$0 sm:$0xff] }
 0x6a3   : > { %v2382_v25 = vadd.f32 %v2379_v24, %v2263_v23  ;;  %4224 = vmatmul.msk.f32.vlgmr.msra.gmra.mxu2 %vm1832_vm0, %v1820_v46  ;;  %v4648_v46 = vld [vmem:[#allocation28] ss:$0 sm:$0xff] }
 0x6a4   : > { %4243 = vmatpush.xpose.msk.msrb.mxu2 %vm1832_vm0, %v2777_v44 }
 0x6a8   : > { %4244 = vmatpush.xpose.msk.msrb.mxu2 %vm1832_vm0, %v2776_v48 }
 0x6a9   : > { %v2462_v19 = vpop.permute.xlu1 %2461 }
 0x6aa   : > { %4213 = vmatpush.xpose.msk.msrb.mxu3 %vm2038_vm1, %v2462_v19 }
 0x6ab   : > { %4225 = vmatmul.msk.f32.gmra.mxu2 %vm1832_vm0, %v1821_v51 }
 0x6ac   : > { %4245 = vmatpush.xpose.msk.msrb.mxu2 %vm1832_vm0, %v2775_v58 }
 0x6ae   : > { %4232 = vmatpush.xpose.msk.msra.mxu3 %vm1832_vm0, %v2684_v33 }
 0x6b0   : > { %4246 = vmatpush.xpose.msk.msrb.mxu2 %vm1832_vm0, %v2774_v59  ;;  %v6813_v59 = vld [vmem:[#allocation44 + $0x8] sm:$0xff] }
 0x6b2   : > { %4233 = vmatpush.xpose.msk.msra.mxu3 %vm1832_vm0, %v2683_v35 }
 0x6b3   : > { %4247 = vmatmul.msk.f32.vlgmr.msrb.gmra.mxu2 %vm1832_vm0, %v2773_v61 }
 0x6b6   : > { %4234 = vmatpush.xpose.msk.msra.mxu3 %vm1832_vm0, %v2682_v38 }
 0x6ba   : > { %4235 = vmatpush.xpose.msk.msra.mxu3 %vm1832_vm0, %v2681_v42  ;;  %v4650_v42 = vld [vmem:[#allocation40] ss:$0 sm:$0xff] }
 0x716   : > { %v2458_v21 = vpop.f32.mrf.mxu2 }
 0x717   : > { %4214 = vmatmul.msk.f32.vlgmr.msrb.gmra.mxu3 %vm2038_vm1, %v2458_v21 }
 0x71f   : > { %4236 = vmatmul.msk.f32.vlgmr.msra.gmra.mxu3 %vm1832_vm0, %v1822_v45 }
 0x726   : > { %v2632_v14 = vpop.f32.mrf.mxu2 }
 0x727   : > { %4237 = vmatmul.msk.f32.gmra.mxu3 %vm1832_vm0, %v1823_v50  ;;  %v2633_v34 = vadd.f32 %v4646_v18, %v2632_v14 }
 0x72e   : > { %v2635_v20 = vpop.f32.mrf.mxu2 }
 0x72f   : > { %v2636_v24 = vadd.f32 %v4646_v18, %v2635_v20 }
 0x79a   : > { %v2497_v27 = vpop.f32.mrf.mxu3 }
 0x79b   : > { %v2500_v28 = vadd.f32 %v2497_v27, %v2382_v25 }
 0x79d   : > { %v2505_v29 = vadd.f32 %v4642_v26, %v2500_v28 }
 0x79f   : > { %v2506_v30 = vadd.f32 %v2505_v29, %v6591_v16  ;;  %v2511_v16 = vmul.f32 32.0, %v4675_v37  ;;  %v4643_v29 = vld [vmem:[#allocation23] ss:$0 sm:$0xff] }
 0x7a1   : > { %v2507_v31 = vsel %vm1832_vm0, %v2506_v30, 0.0  ;;  %v2512_v40 = vsub.f32 1.0, %v2511_v16  ;;  %v2814_v16 = vpop.f32.mrf.mxu2 }
 0x7a2   : > { %2508 = vadd.xlane.f32.xlu2 %v2507_v31  ;;  %v2724_v1 = vpop.f32.mrf.mxu3 }
 0x7a3   : > { %v2513_v47 = vmul.f32 %v4675_v37, %v2512_v40  ;;  %v6763_v26 = vadd.f32 %v4645_v63, %v2724_v1  ;;  %v2675_v40 = vpop.f32.mrf.mxu0 }
 0x7a4   : > { %v2676_v45 = vadd.f32 %v4650_v42, %v2675_v40 }
 0x7a5   : > { %v2514_v49 = vadd.f32 %v4675_v37, %v2513_v47  ;;  %v6778_v36 = vadd.f32 %v6763_v26, %v2633_v34  ;;  %v4649_v47 = vld [vmem:[#allocation31] ss:$0 sm:$0xff] }
 0x7a7   : > { %v6727_v52 = vsel %vm2515_vm4, %v4675_v37, %v2514_v49  ;;  %v4647_v37 = vld [vmem:[#allocation43] ss:$0 sm:$0xff] }
 0x7a8   : > { %v2815_v38 = vadd.f32 %v4647_v37, %v2814_v16 }
 0x7aa   : > { %v2727_v19 = vpop.f32.mrf.mxu3  ;;  %v6790_v39 = vmul.f32 0.25, %v2815_v38 }
 0x7ab   : > { %v6756_v22 = vadd.f32 %v4645_v63, %v2727_v19  ;;  %v2678_v43 = vpop.f32.mrf.mxu0 }
 0x7ac   : > { %v2679_v44 = vadd.f32 %v4650_v42, %v2678_v43 }
 0x7ad   : > { %2933 = vrot.lane.b32.xlu0 %v6756_v22, %s5805_s8  ;;  %4248 = vmatpush.xpose.msk.msrb.mxu0 %vm2038_vm1, %v6756_v22  ;;  %v6766_v28 = vadd.f32 %v6756_v22, %v2636_v24 }
 0x7ae   : > { %2923 = vmatpush.msra.mxu2 %v2679_v44 }
 0x7b0   : > { %2924 = vmatpush.msra.mxu2 %v2676_v45 }
 0x7b1   : > { %4249 = vmatpush.xpose.msk.msrb.mxu0 %vm2038_vm1, %v6763_v26 }
 0x7b4   : > { %4250 = vmatmul.msk.f32.vlgmr.msrb.gmra.mxu0 %vm2038_vm1, %v6790_v39 }
 0x7b5   : > { %2965 = vrot.lane.b32.xlu0 %v6766_v28, %s5805_s8 }
 0x7bd   : > { %2931 = vrot.lane.b32.xlu0 %v6763_v26, %s5805_s8 }
 0x7c5   : > { %2963 = vrot.lane.b32.xlu0 %v6778_v36, %s5805_s8 }
 0x7cd   : > { %2929 = vrot.lane.b32.xlu0 %v6790_v39, %s5805_s8 }
 0x815   : > { %v2509_v53 = vpop.xlane.xlu2 %2508 }
 0x816   : > { %v2517_v54 = vmul.f32 %v6727_v52, %v2509_v53 }
 0x818   : > { %v6732_v55 = vsub.f32 %v2506_v30, %v2517_v54 }
 0x81a   : > { %v2519_v56 = vmul.f32 %v6732_v55, %v6732_v55 }
 0x81c   : > { %v2520_v57 = vsel %vm1832_vm0, %v2519_v56, 0.0 }
 0x81d   : > { %2521 = vadd.xlane.f32.xlu1 %v2520_v57  ;;  %v6808_v57 = vld [vmem:[#allocation44 + $0x10] sm:$0xff] }
 0x81f   : > { %v2934_v53 = vpop.permute.xlu0 %2933 }
 0x827   : > { %v2966_v56 = vpop.permute.xlu0 %2965 }
 0x828   : > { %4258 = vmatpush.xpose.msk.msra.mxu0 %vm2038_vm1, %v2966_v56 }
 0x82f   : > { %v2932_v58 = vpop.permute.xlu0 %2931 }
 0x831   : > { %v2849_v8 = vpop.f32.mrf.mxu0 }
 0x837   : > { %v2964_v60 = vpop.permute.xlu0 %2963 }
 0x838   : > { %4259 = vmatpush.xpose.msk.msra.mxu0 %vm2038_vm1, %v2964_v60 }
 0x83f   : > { %v2930_v61 = vpop.permute.xlu0 %2929 }
 0x890   : > { %v2522_v10 = vpop.xlane.xlu1 %2521 }
 0x891   : > { %v2523_v12 = vmul.f32 %v2522_v10, %v6727_v52 }
 0x893   : > { %v2524_v13 = vadd.f32 1e-05, %v2523_v12 }
 0x895   : > { %4676 = vrsqrt.f32 %v2524_v13  ;;  %vm2531_vm6 = vweird.f32 %v2524_v13 }
 0x89b   : > { %v4677_v15 = vpop.eup %4676 }
 0x89c   : > { %v2526_v0 = vmul.f32 %v4677_v15, %v2524_v13  ;;  %vm2532_vm5 = vweird.f32 %v4677_v15 }
 0x89d   : > { %vm2533_vm7 = vmor %vm2531_vm6, %vm2532_vm5 }
 0x89e   : > { %v2527_v21 = vmul.f32 %v4677_v15, %v2526_v0 }
 0x8a0   : > { %v2528_v23 = vmul.f32 0.5, %v2527_v21 }
 0x8a2   : > { %v2529_v25 = vsub.f32 1.5, %v2528_v23 }
 0x8a4   : > { %v2530_v27 = vmul.f32 %v4677_v15, %v2529_v25  ;;  %v6851_v25 = vld [vmem:[#allocation44 + $0x18] sm:$0xff] }
 0x8a5   : > { %4267 = vmatpush.xpose.msk.msrb.mxu3 %vm2038_vm1, %v6851_v25 }
 0x8a6   : > { %v2534_v30 = vsel %vm2533_vm7, %v4677_v15, %v2530_v27  ;;  %v6840_v15 = vld [vmem:[#allocation44] sm:$0xff] }
 0x8a7   : > { %v2535_v31 = vmul.f32 %v2534_v30, %v6732_v55  ;;  %v6803_v55 = vpack.i.bf16 %v2676_v45, %v2679_v44 }
 0x8a9   : > { %v2540_v33 = vmul.f32 %v4643_v29, %v2535_v31  ;;  %4268 = vmatpush.xpose.msk.msrb.mxu3 %vm2038_vm1, %v6808_v57 }
 0x8ab   : > { %v6773_v35 = vadd.f32 %v4644_v32, %v2540_v33 }
 0x8ad   : > { %4219 = vmatmul.msk.f32.vlgmr.msrb.gmra.mxu1 %vm1832_vm0, %v6773_v35  ;;  %4269 = vmatpush.xpose.msk.msrb.mxu3 %vm2038_vm1, %v6813_v59 }
 0x8ae   : > { %4251 = vmatpush.xpose.msk.msrb.mxu1 %vm2038_vm1, %v6766_v28 }
 0x8b1   : > { %4270 = vmatpush.xpose.msk.msrb.mxu3 %vm2038_vm1, %v6840_v15 }
 0x8b2   : > { %4252 = vmatpush.xpose.msk.msrb.mxu1 %vm2038_vm1, %v6778_v36 }
 0x8b5   : > { %4242 = vmatmul.msk.f32.vlgmr.msra.gmra.mxu1 %vm1832_vm0, %v6595_v17 }
 0x8b6   : > { %4255 = vmatpush.xpose.msk.msra.mxu1 %vm2038_vm1, %v2934_v53 }
 0x8ba   : > { %4256 = vmatpush.xpose.msk.msra.mxu1 %vm2038_vm1, %v2932_v58 }
 0x92a   : > { %v2586_v17 = vpop.f32.mrf.mxu1 }
 0x92b   : > { %v2587_v49 = vadd.f32 %v4648_v46, %v2586_v17 }
 0x932   : > { %v2767_v48 = vpop.f32.mrf.mxu1 }
 0x933   : > { %v2768_v50 = vadd.f32 %v4649_v47, %v2767_v48 }
 0x935   : > { %v2770_v51 = vadd.f32 %v2768_v50, %v2587_v49 }
 0x937   : > { %v6796_v54 = vmul.f32 0.25, %v2770_v51 }
 0x939   : > { %2961 = vrot.lane.b32.xlu2 %v6796_v54, %s5805_s8  ;;  %4253 = vmatmul.msk.f32.vlgmr.msrb.gmra.mxu1 %vm2038_vm1, %v6796_v54 }
 0x941   : > { %4623 = vrot.lane.b32.xlu2 %v6803_v55, %s5805_s8  ;;  %4257 = vmatmul.msk.f32.vlgmr.msra.gmra.mxu1 %vm2038_vm1, %v2930_v61 }
 0x949   : > { %3056 = vrot.lane.b32.xlu2 %v6808_v57, %s5805_s8 }
 0x951   : > { %3054 = vrot.lane.b32.xlu2 %v6813_v59, %s5805_s8 }
 0x959   : > { %3126 = vrot.lane.b32.xlu2 %v6756_v22, %s5804_s0 }
 0x961   : > { %3283 = vrot.lane.b32.xlu2 %v6756_v22, %s5806_s28 }
 0x969   : > { %3124 = vrot.lane.b32.xlu2 %v6763_v26, %s5804_s0 }
 0x971   : > { %3313 = vrot.lane.b32.xlu2 %v6778_v36, %s5806_s28 }
 0x979   : > { %3279 = vrot.lane.b32.xlu2 %v6790_v39, %s5806_s28 }
 0x993   : > { %v2962_v62 = vpop.permute.xlu2 %2961 }
 0x994   : > { %4260 = vmatmul.msk.f32.vlgmr.msra.gmra.mxu0 %vm2038_vm1, %v2962_v62 }
 0x99b   : > { %v4624_v2 = vpop.permute.xlu2 %4623 }
 0x99c   : > { %v4626_v3 = vunpack.i.h.bf16 %v4624_v2  ;;  %v4625_v4 = vunpack.i.l.bf16 %v4624_v2 }
 0x99e   : > { %3042 = vmatpush.msrb.mxu1 %v4625_v4 }
 0x9a0   : > { %3043 = vmatpush.msrb.mxu1 %v4626_v3 }
 0x9a3   : > { %v6830_v5 = vpop.permute.xlu2 %3056 }
 0x9ab   : > { %v6832_v6 = vpop.permute.xlu2 %3054 }
 0x9b3   : > { %v3127_v7 = vpop.permute.xlu2 %3126 }
 0x9b4   : > { %4272 = vmatpush.xpose.msk.msrb.mxu0 %vm2038_vm1, %v3127_v7 }
 0x9b6   : > { %v2878_v9 = vpop.f32.mrf.mxu1 }
 0x9b7   : > { %v2879_v10 = vadd.f32 %v2878_v9, %v2849_v8 }
 0x9b9   : > { %v2882_v11 = vsel %vm2881_vm8, %v2879_v10, -inf }
 0x9ba   : > { %2883 = vmax.xlane.f32.xlu1 %v2882_v11 }
 0x9bb   : > { %v6836_v12 = vpop.permute.xlu2 %3283 }
 0x9be   : > { %v2958_v13 = vpop.f32.mrf.mxu1 }
 0x9c3   : > { %v3125_v41 = vpop.permute.xlu2 %3124 }
 0x9c4   : > { %4273 = vmatpush.xpose.msk.msrb.mxu0 %vm2038_vm1, %v3125_v41 }
 0x9cb   : > { %v3314_v62 = vpop.permute.xlu2 %3313 }
 0x9d3   : > { %v3280_v7 = vpop.permute.xlu2 %3279 }
 0xa11   : > { %v2990_v1 = vpop.f32.mrf.mxu0 }
 0xa12   : > { %v2991_v14 = vadd.f32 %v2990_v1, %v2958_v13 }
 0xa14   : > { %v2993_v63 = vsel %vm2881_vm8, %v2991_v14, -inf }
 0xa15   : > { %2994 = vmax.xlane.f32.xlu0 %v2993_v63 }
 0xa29   : > { %3052 = vrot.lane.b32.xlu0 %v6840_v15, %s5805_s8 }
 0xa2d   : > { %v2884_v0 = vpop.xlane.xlu1 %2883 }
 0xa2e   : > { %v2885_v18 = vsub.f32 %v2879_v10, %v2884_v0 }
 0xa30   : > { %v2886_v19 = vmul.f32 1.442695, %v2885_v18 }
 0xa31   : > { %3156 = vrot.lane.b32.xlu0 %v6778_v36, %s5804_s0 }
 0xa32   : > { %4678 = vpow2.f32 %v2886_v19 }
 0xa38   : > { %v4679_v20 = vpop.eup %4678 }
 0xa39   : > { %3122 = vrot.lane.b32.xlu0 %v6790_v39, %s5804_s0  ;;  %v2888_v21 = vsel %vm2881_vm8, %v4679_v20, 0.0 }
 0xa3a   : > { %2889 = vadd.xlane.f32.xlu1 %v2888_v21 }
 0xa41   : > { %3311 = vrot.lane.b32.xlu0 %v6796_v54, %s5806_s28 }
 0xa88   : > { %v2995_v22 = vpop.xlane.xlu0 %2994 }
 0xa89   : > { %v2996_v23 = vsub.f32 %v2991_v14, %v2995_v22 }
 0xa8b   : > { %v2997_v24 = vmul.f32 1.442695, %v2996_v23 }
 0xa8d   : > { %4680 = vpow2.f32 %v2997_v24 }
 0xa93   : > { %v4681_v27 = vpop.eup %4680 }
 0xa94   : > { %v2999_v29 = vsel %vm2881_vm8, %v4681_v27, 0.0 }
 0xa95   : > { %3000 = vadd.xlane.f32.xlu1 %v2999_v29 }
 0xa9b   : > { %v3053_v30 = vpop.permute.xlu0 %3052 }
 0xaa3   : > { %v3157_v31 = vpop.permute.xlu0 %3156 }
 0xaab   : > { %v3123_v32 = vpop.permute.xlu0 %3122 }
 0xaac   : > { %4274 = vmatmul.msk.f32.vlgmr.msrb.gmra.mxu0 %vm2038_vm1, %v3123_v32 }
 0xaad   : > { %v2890_v33 = vpop.xlane.xlu1 %2889 }
 0xaae   : > { %4682 = vrcp.f32 %v2890_v33  ;;  %3058 = vrot.lane.b32.xlu1 %v6851_v25, %s5805_s8  ;;  %v2902_v16 = vand.u32 2147483648, %v2890_v33  ;;  %v2900_v39 = vand.u32 2147483647, %v2890_v33  ;;  %vm2896_vm10 = vweird.f32 %v2890_v33 }
 0xab0   : > { %v2903_v42 = vor.u32 1.1754944e-38, %v2902_v16  ;;  %vm2901_vm12 = vcmp.eq.f32.partialorder %v2900_v39, 8.507059e+37 }
 0xab4   : > { %v4683_v34 = vpop.eup %4682 }
 0xab5   : > { %v2892_v36 = vmul.f32 %v4683_v34, %v2890_v33  ;;  %vm2897_vm9 = vweird.f32 %v4683_v34 }
 0xab6   : > { %3158 = vrot.lane.b32.xlu1 %v6766_v28, %s5804_s0  ;;  %vm2898_vm11 = vmor %vm2896_vm10, %vm2897_vm9 }
 0xab7   : > { %v2893_v37 = vsub.f32 1.0, %v2892_v36 }
 0xab9   : > { %v2894_v38 = vmul.f32 %v4683_v34, %v2893_v37 }
 0xabb   : > { %v2895_v40 = vadd.f32 %v4683_v34, %v2894_v38 }
 0xabd   : > { %v2899_v43 = vsel %vm2898_vm11, %v4683_v34, %v2895_v40 }
 0xabe   : > { %v2904_v44 = vsel %vm2901_vm12, %v2903_v42, %v2899_v43  ;;  %3315 = vrot.lane.b32.xlu1 %v6766_v28, %s5806_s28 }
 0xabf   : > { %v2905_v45 = vmul.f32 %v4679_v20, %v2904_v44 }
 0xac1   : > { %4254 = vmatmul.msk.f32.vlgmr.msra.gmra.mxu2 %vm2881_vm8, %v2905_v45 }
 0xac6   : > { %3281 = vrot.lane.b32.xlu1 %v6763_v26, %s5806_s28 }
 0xace   : > { %3154 = vrot.lane.b32.xlu1 %v6796_v54, %s5804_s0 }
 0xb08   : > { %v3001_v17 = vpop.xlane.xlu1 %3000 }
 0xb09   : > { %4684 = vrcp.f32 %v3001_v17  ;;  %v3013_v49 = vand.u32 2147483648, %v3001_v17  ;;  %v3011_v51 = vand.u32 2147483647, %v3001_v17  ;;  %vm3007_vm14 = vweird.f32 %v3001_v17 }
 0xb0b   : > { %v3014_v28 = vor.u32 1.1754944e-38, %v3013_v49  ;;  %vm3012_vm2 = vcmp.eq.f32.partialorder %v3011_v51, 8.507059e+37 }
 0xb0f   : > { %v4685_v46 = vpop.eup %4684 }
 0xb10   : > { %v3003_v47 = vmul.f32 %v4685_v46, %v3001_v17  ;;  %vm3008_vm13 = vweird.f32 %v4685_v46 }
 0xb11   : > { %vm3009_vm15 = vmor %vm3007_vm14, %vm3008_vm13 }
 0xb12   : > { %v3004_v48 = vsub.f32 1.0, %v3003_v47 }
 0xb14   : > { %v3005_v50 = vmul.f32 %v4685_v46, %v3004_v48 }
 0xb16   : > { %v3006_v53 = vadd.f32 %v4685_v46, %v3005_v50 }
 0xb18   : > { %v3010_v56 = vsel %vm3009_vm15, %v4685_v46, %v3006_v53 }
 0xb19   : > { %v3015_v58 = vsel %vm3012_vm2, %v3014_v28, %v3010_v56 }
 0xb1a   : > { %v3016_v26 = vmul.f32 %v4681_v27, %v3015_v58 }
 0xb1c   : > { %4261 = vmatmul.msk.f32.vlgmr.msrb.gmra.mxu1 %vm2881_vm8, %v3016_v26 }
 0xb20   : > { %v3059_v54 = vpop.permute.xlu1 %3058 }
 0xb21   : > { %4262 = vmatpush.xpose.msk.msrb.mxu2 %vm2038_vm1, %v3059_v54 }
 0xb25   : > { %4263 = vmatpush.xpose.msk.msrb.mxu2 %vm2038_vm1, %v6830_v5  ;;  %v3312_v5 = vpop.permute.xlu0 %3311 }
 0xb28   : > { %v3159_v60 = vpop.permute.xlu1 %3158 }
 0xb29   : > { %4264 = vmatpush.xpose.msk.msrb.mxu2 %vm2038_vm1, %v6832_v6  ;;  %4275 = vmatpush.xpose.msk.msra.mxu1 %vm2038_vm1, %v3159_v60  ;;  %v3151_v8 = vpop.f32.mrf.mxu0 }
 0xb2d   : > { %4265 = vmatpush.xpose.msk.msrb.mxu2 %vm2038_vm1, %v3053_v30  ;;  %4276 = vmatpush.xpose.msk.msra.mxu1 %vm2038_vm1, %v3157_v31 }
 0xb30   : > { %v3316_v61 = vpop.permute.xlu1 %3315 }
 0xb31   : > { %4284 = vmatpush.xpose.msk.msra.mxu2 %vm2038_vm1, %v6836_v12  ;;  %4287 = vmatpush.xpose.msk.msra.mxu3 %vm2038_vm1, %v3316_v61 }
 0xb35   : > { %4288 = vmatpush.xpose.msk.msra.mxu3 %vm2038_vm1, %v3314_v62 }
 0xb38   : > { %v3282_v2 = vpop.permute.xlu1 %3281 }
 0xb39   : > { %4285 = vmatpush.xpose.msk.msra.mxu2 %vm2038_vm1, %v3282_v2 }
 0xb40   : > { %v3155_v3 = vpop.permute.xlu1 %3154 }
 0xb41   : > { %4277 = vmatmul.msk.f32.vlgmr.msra.gmra.mxu1 %vm2038_vm1, %v3155_v3 }
 0xb44   : > { %v2926_v4 = vpop.f32.mrf.mxu2 }
 0xb45   : > { %4271 = vmatmul.msk.f32.vlgmr.msrb.gmra.mxu3 %vm2038_vm1, %v2926_v4 }
 0xb4d   : > { %4289 = vmatmul.msk.f32.vlgmr.msra.gmra.mxu3 %vm2038_vm1, %v3312_v5 }
 0xb99   : > { %v3045_v6 = vpop.f32.mrf.mxu1 }
 0xb9a   : > { %4266 = vmatmul.msk.f32.vlgmr.msrb.gmra.mxu2 %vm2038_vm1, %v3045_v6 }
 0xba2   : > { %4286 = vmatmul.msk.f32.vlgmr.msra.gmra.mxu2 %vm2038_vm1, %v3280_v7 }
 0xbbe   : > { %v3183_v9 = vpop.f32.mrf.mxu1 }
 0xbbf   : > { %v3184_v10 = vadd.f32 %v3183_v9, %v3151_v8  ;;  %v4651_v9 = vld [vmem:[#allocation46] ss:$0 sm:$0xff] }
 0xbc1   : > { %v3186_v11 = vsel %vm2881_vm8, %v3184_v10, -inf }
 0xbc2   : > { %3187 = vmax.xlane.f32.xlu1 %v3186_v11 }
 0xbc8   : > { %v6894_v12 = vpop.f32.mrf.mxu3 }
 0xbd0   : > { %v3340_v13 = vpop.f32.mrf.mxu3 }
 0xc1d   : > { %v6896_v41 = vpop.f32.mrf.mxu2 }
 0xc1e   : > { %v3120_v7 = vadd.f32 %v6894_v12, %v6896_v41 }
 0xc25   : > { %v3308_v1 = vpop.f32.mrf.mxu2 }
 0xc26   : > { %v3341_v14 = vadd.f32 %v3340_v13, %v3308_v1 }
 0xc28   : > { %v3343_v63 = vsel %vm2881_vm8, %v3341_v14, -inf }
 0xc29   : > { %3344 = vmax.xlane.f32.xlu2 %v3343_v63  ;;  %v3481_v63 = vld [vmem:[%s7130_s5 + $0x38] sm:$0xff] }
 0xc2a   : > { %4296 = vmatpush.xpose.msk.msrb.mxu3 %vm1832_vm0, %v3481_v63 }
 0xc35   : > { %v3188_v0 = vpop.xlane.xlu1 %3187 }
 0xc36   : > { %v3189_v18 = vsub.f32 %v3184_v10, %v3188_v0 }
 0xc38   : > { %v3190_v19 = vmul.f32 1.442695, %v3189_v18 }
 0xc3a   : > { %4686 = vpow2.f32 %v3190_v19 }
 0xc40   : > { %v4687_v20 = vpop.eup %4686 }
 0xc41   : > { %4628 = vrot.lane.b32.xlu2 %v6803_v55, %s5804_s0  ;;  %v3192_v21 = vsel %vm2881_vm8, %v4687_v20, 0.0 }
 0xc42   : > { %3193 = vadd.xlane.f32.xlu0 %v3192_v21  ;;  %v3478_v21 = vld [vmem:[%s7130_s5 + $0x20] sm:$0xff] }
 0xc49   : > { %3400 = vrot.lane.b32.xlu2 %v6808_v57, %s5806_s28 }
 0xc51   : > { %3241 = vrot.lane.b32.xlu2 %v6813_v59, %s5804_s0 }
 0xc56   : > { %4633 = vrot.lane.b32.xlu0 %v6803_v55, %s5806_s28 }
 0xc5e   : > { %3245 = vrot.lane.b32.xlu0 %v6851_v25, %s5804_s0 }
 0xc66   : > { %3398 = vrot.lane.b32.xlu0 %v6813_v59, %s5806_s28 }
 0xc6e   : > { %3239 = vrot.lane.b32.xlu0 %v6840_v15, %s5804_s0 }
 0xc9c   : > { %v3345_v22 = vpop.xlane.xlu2 %3344 }
 0xc9d   : > { %v3346_v23 = vsub.f32 %v3341_v14, %v3345_v22  ;;  %v3477_v22 = vld [vmem:[%s7130_s5 + $0x18] sm:$0xff] }
 0xc9f   : > { %v3347_v24 = vmul.f32 1.442695, %v3346_v23  ;;  %v3476_v23 = vld [vmem:[%s7130_s5 + $0x10] sm:$0xff] }
 0xca1   : > { %4688 = vpow2.f32 %v3347_v24  ;;  %v3475_v24 = vld [vmem:[%s7130_s5 + $0x8] sm:$0xff] }
 0xca4   : > { %v4629_v27 = vpop.permute.xlu2 %4628 }
 0xca5   : > { %v4630_v29 = vunpack.i.l.bf16 %v4629_v27  ;;  %v4631_v31 = vunpack.i.h.bf16 %v4629_v27  ;;  %v3474_v27 = vld [vmem:[%s7130_s5] sm:$0xff] }
 0xca7   : > { %v4689_v30 = vpop.eup %4688  ;;  %3233 = vmatpush.msra.mxu0 %v4630_v29  ;;  %v3537_v29 = vld [vmem:[#allocation50 + $0x18] sm:$0xff] }
 0xca8   : > { %v3349_v55 = vsel %vm2881_vm8, %v4689_v30, 0.0 }
 0xca9   : > { %3350 = vadd.xlane.f32.xlu1 %v3349_v55  ;;  %3234 = vmatpush.msra.mxu0 %v4631_v31 }
 0xcac   : > { %v3401_v54 = vpop.permute.xlu2 %3400 }
 0xcb4   : > { %v3242_v62 = vpop.permute.xlu2 %3241 }
 0xcb5   : > { %v3194_v32 = vpop.xlane.xlu0 %3193 }
 0xcb6   : > { %4690 = vrcp.f32 %v3194_v32  ;;  %v3206_v36 = vand.u32 2147483648, %v3194_v32  ;;  %v3204_v16 = vand.u32 2147483647, %v3194_v32  ;;  %vm3200_vm4 = vweird.f32 %v3194_v32 }
 0xcb8   : > { %v3207_v39 = vor.u32 1.1754944e-38, %v3206_v36  ;;  %vm3205_vm6 = vcmp.eq.f32.partialorder %v3204_v16, 8.507059e+37 }
 0xcbc   : > { %v4691_v33 = vpop.eup %4690 }
 0xcbd   : > { %v3196_v59 = vmul.f32 %v4691_v33, %v3194_v32  ;;  %vm3201_vm3 = vweird.f32 %v4691_v33 }
 0xcbe   : > { %vm3202_vm5 = vmor %vm3200_vm4, %vm3201_vm3 }
 0xcbf   : > { %v3197_v34 = vsub.f32 1.0, %v3196_v59 }
 0xcc1   : > { %v3198_v37 = vmul.f32 %v4691_v33, %v3197_v34 }
 0xcc2   : > { %3402 = vrot.lane.b32.xlu1 %v6851_v25, %s5806_s28 }
 0xcc3   : > { %v3199_v38 = vadd.f32 %v4691_v33, %v3198_v37 }
 0xcc5   : > { %v3203_v40 = vsel %vm3202_vm5, %v4691_v33, %v3199_v38  ;;  %v3535_v33 = vld [vmem:[#allocation50 + $0x8] sm:$0xff] }
 0xcc6   : > { %v3208_v42 = vsel %vm3205_vm6, %v3207_v39, %v3203_v40  ;;  %v4652_v39 = vld [vmem:[#allocation47] ss:$0 sm:$0xff] }
 0xcc7   : > { %v3209_v43 = vmul.f32 %v4687_v20, %v3208_v42  ;;  %v3480_v20 = vld [vmem:[%s7130_s5 + $0x30] sm:$0xff] }
 0xcc8   : > { %v4634_v44 = vpop.permute.xlu0 %4633  ;;  %4297 = vmatpush.xpose.msk.msrb.mxu3 %vm1832_vm0, %v3480_v20 }
 0xcc9   : > { %v4635_v45 = vunpack.i.l.bf16 %v4634_v44  ;;  %4278 = vmatmul.msk.f32.vlgmr.msra.gmra.mxu0 %vm2881_vm8, %v3209_v43  ;;  %v4636_v17 = vunpack.i.h.bf16 %v4634_v44  ;;  %v4653_v43 = vld [vmem:[#allocation49] ss:$0 sm:$0xff] }
 0xcca   : > { %3243 = vrot.lane.b32.xlu1 %v6808_v57, %s5804_s0  ;;  %s7134_s0 = sld [smem:[#allocation105_spill]] }
 0xccb   : > { %3390 = vmatpush.msrb.mxu0 %v4635_v45 }
 0xccd   : > { %3391 = vmatpush.msrb.mxu0 %v4636_v17  ;;  %v3534_v17 = vld [vmem:[#allocation50] sm:$0xff] }
 0xcd0   : > { %v3246_v25 = vpop.permute.xlu0 %3245  ;;  %s7135_s8 = smov %s7134_s0  ;;  %s3623_s17 = scalar_lea.hbm %s7134_s0, %s4311_s14 }
 0xcd1   : > { %4279 = vmatpush.xpose.msk.msrb.mxu1 %vm2038_vm1, %v3246_v25  ;;  %v4654_v25 = vld [vmem:[%s7131_s6] ss:$0 sm:$0xff]  ;;  %s3627_s23 = sshll.u32 %s3623_s17, 4  ;;  %s3628_s23 = int_to_ptr.hbm [resolvable:$true] %s3627_s23 }
 0xcd2   : > { %3396 = vrot.lane.b32.xlu1 %v6840_v15, %s5806_s28  ;;  %s7136_s28 = sld [smem:[#allocation104_spill]]  ;;  %s5614_s6 = sshra.s32 %s3628_s23, 4  ;;  %s5615_s6 = int_to_ptr.hbm [resolvable:$true] %s5614_s6 }
 0xcd3   : > { %p5621_p8 = scmp.lt.s32.totalorder %s5615_s6, %s7135_s8 }
 0xcd8   : > { %v3399_v60 = vpop.permute.xlu0 %3398 }
 0xce0   : > { %v3240_v2 = vpop.permute.xlu0 %3239 }
 0xd1c   : > { %v3351_v46 = vpop.xlane.xlu1 %3350 }
 0xd1d   : > { %4692 = vrcp.f32 %v3351_v46  ;;  %v3363_v50 = vand.u32 2147483648, %v3351_v46  ;;  %v3361_v53 = vand.u32 2147483647, %v3351_v46  ;;  %vm3357_vm9 = vweird.f32 %v3351_v46 }
 0xd1f   : > { %v3364_v57 = vor.u32 1.1754944e-38, %v3363_v50  ;;  %vm3362_vm11 = vcmp.eq.f32.partialorder %v3361_v53, 8.507059e+37 }
 0xd23   : > { %v4693_v47 = vpop.eup %4692 }
 0xd24   : > { %v3353_v48 = vmul.f32 %v4693_v47, %v3351_v46  ;;  %vm3358_vm7 = vweird.f32 %v4693_v47 }
 0xd25   : > { %vm3359_vm10 = vmor %vm3357_vm9, %vm3358_vm7 }
 0xd26   : > { %v3354_v49 = vsub.f32 1.0, %v3353_v48 }
 0xd28   : > { %v3355_v51 = vmul.f32 %v4693_v47, %v3354_v49  ;;  %v4655_v49 = vld [vmem:[%s7132_s9] ss:$0 sm:$0xff]  ;;  %s5616_s9 = scalar_lea.hbm %s5615_s6, 8 }
 0xd29   : > { %p5617_p6 = scmp.ne.s32.totalorder %s5615_s6, %s5616_s9 }
 0xd2a   : > { %v3356_v28 = vadd.f32 %v4693_v47, %v3355_v51 }
 0xd2b   : > { %p5618_p13 = pnand %p5617_p6, %p6075_p11 }
 0xd2c   : > { %v3360_v56 = vsel %vm3359_vm10, %v4693_v47, %v3356_v28 }
 0xd2d   : > { %v3365_v58 = vsel %vm3362_vm11, %v3364_v57, %v3360_v56  ;;  %p5619_p7 = pneg %p5618_p13 }
 0xd2e   : > { %v3366_v15 = vmul.f32 %v4689_v30, %v3365_v58  ;;  %v3536_v30 = vld [vmem:[#allocation50 + $0x10] sm:$0xff] }
 0xd30   : > { %4290 = vmatmul.msk.f32.vlgmr.msrb.gmra.mxu0 %vm2881_vm8, %v3366_v15 }
 0xd34   : > { %v3403_v26 = vpop.permute.xlu1 %3402 }
 0xd35   : > { %4291 = vmatpush.xpose.msk.msrb.mxu2 %vm2038_vm1, %v3403_v26 }
 0xd39   : > { %4292 = vmatpush.xpose.msk.msrb.mxu2 %vm2038_vm1, %v3401_v54 }
 0xd3c   : > { %v3244_v61 = vpop.permute.xlu1 %3243 }
 0xd3d   : > { %4280 = vmatpush.xpose.msk.msrb.mxu1 %vm2038_vm1, %v3244_v61  ;;  %4293 = vmatpush.xpose.msk.msrb.mxu2 %vm2038_vm1, %v3399_v60 }
 0xd41   : > { %4281 = vmatpush.xpose.msk.msrb.mxu1 %vm2038_vm1, %v3242_v62 }
 0xd44   : > { %v3397_v3 = vpop.permute.xlu1 %3396 }
 0xd45   : > { %4282 = vmatpush.xpose.msk.msrb.mxu1 %vm2038_vm1, %v3240_v2  ;;  %4294 = vmatpush.xpose.msk.msrb.mxu2 %vm2038_vm1, %v3397_v3 }
 0xd46   : > { %v3236_v4 = vpop.f32.mrf.mxu0 }
 0xd48   : > { %4283 = vmatmul.msk.f32.vlgmr.msrb.gmra.mxu1 %vm2038_vm1, %v3236_v4 }
 0xdad   : > { %v3393_v5 = vpop.f32.mrf.mxu0 }
 0xdae   : > { %4295 = vmatmul.msk.f32.vlgmr.msrb.gmra.mxu2 %vm2038_vm1, %v3393_v5  ;;  %vm3542_vm1 = vcmask 523264  }
 0xdaf   : > { %4305 = vmatpush.xpose.msk.msra.mxu0 %vm3542_vm1, %v3537_v29 }
 0xdb3   : > { %4306 = vmatpush.xpose.msk.msra.mxu0 %vm3542_vm1, %v3536_v30 }
 0xdb7   : > { %4307 = vmatpush.xpose.msk.msra.mxu0 %vm3542_vm1, %v3535_v33 }
 0xdbb   : > { %4308 = vmatpush.xpose.msk.msra.mxu0 %vm3542_vm1, %v3534_v17 }
 0xdc5   : > { %v3275_v6 = vpop.f32.mrf.mxu1 }
 0xdc6   : > { %v3278_v8 = vadd.f32 %v3275_v6, %v3120_v7  ;;  %v4656_v7 = vld [vmem:[%s7133_s12] ss:$0 sm:$0xff]  ;;  %s5620_s12 = scalar_lea.hbm %s7135_s8, 16 }
 0xdc7   : > { %p5622_p9 = scmp.lt.s32.totalorder %s5620_s12, %s5616_s9 }
 0xdc9   : > { %p5623_p5 = por %p5622_p9, %p5621_p8 }
 0xdcb   : > { %p5624_p10 = pnand %p5623_p5, %p5619_p7 }
 0xe31   : > { %v3432_v10 = vpop.f32.mrf.mxu2 }
 0xe32   : > { %v3435_v11 = vadd.f32 %v3432_v10, %v3278_v8 }
 0xe34   : > { %v3440_v13 = vadd.f32 %v4651_v9, %v3435_v11  ;;  %v4657_v9 = vld [vmem:[%s7136_s28] ss:$0 sm:$0xff] }
 0xe36   : > { %v3441_v1 = vadd.f32 %v3440_v13, %v6773_v35  ;;  %v3479_v35 = vld [vmem:[%s7130_s5 + $0x28] sm:$0xff] }
 0xe37   : > { %4298 = vmatpush.xpose.msk.msrb.mxu3 %vm1832_vm0, %v3479_v35 }
 0xe38   : > { %v3442_v14 = vsel %vm1832_vm0, %v3441_v1, 0.0 }
 0xe39   : > { %3443 = vadd.xlane.f32.xlu2 %v3442_v14 }
 0xe3b   : > { %4299 = vmatpush.xpose.msk.msrb.mxu3 %vm1832_vm0, %v3478_v21 }
 0xe3f   : > { %4300 = vmatpush.xpose.msk.msrb.mxu3 %vm1832_vm0, %v3477_v22 }
 0xe43   : > { %4301 = vmatpush.xpose.msk.msrb.mxu3 %vm1832_vm0, %v3476_v23 }
 0xe47   : > { %4302 = vmatpush.xpose.msk.msrb.mxu3 %vm1832_vm0, %v3475_v24 }
 0xe4b   : > { %4303 = vmatpush.xpose.msk.msrb.mxu3 %vm1832_vm0, %v3474_v27 }
 0xeac   : > { %v3444_v0 = vpop.xlane.xlu2 %3443 }
 0xead   : > { %v3445_v12 = vmul.f32 %v3444_v0, %v6727_v52 }
 0xeaf   : > { %v3446_v41 = vsub.f32 %v3441_v1, %v3445_v12 }
 0xeb1   : > { %v3447_v18 = vmul.f32 %v3446_v41, %v3446_v41 }
 0xeb3   : > { %v3448_v19 = vsel %vm1832_vm0, %v3447_v18, 0.0 }
 0xeb4   : > { %3449 = vadd.xlane.f32.xlu1 %v3448_v19 }
 0xf27   : > { %v3450_v31 = vpop.xlane.xlu1 %3449 }
 0xf28   : > { %v3451_v55 = vmul.f32 %v3450_v31, %v6727_v52 }
 0xf2a   : > { %v3452_v32 = vadd.f32 1e-05, %v3451_v55 }
 0xf2c   : > { %4694 = vrsqrt.f32 %v3452_v32  ;;  %vm3459_vm12 = vweird.f32 %v3452_v32 }
 0xf32   : > { %v4695_v59 = vpop.eup %4694 }
 0xf33   : > { %v3454_v34 = vmul.f32 %v4695_v59, %v3452_v32  ;;  %vm3460_vm8 = vweird.f32 %v4695_v59 }
 0xf34   : > { %vm3461_vm13 = vmor %vm3459_vm12, %vm3460_vm8 }
 0xf35   : > { %v3455_v36 = vmul.f32 %v4695_v59, %v3454_v34 }
 0xf37   : > { %v3456_v37 = vmul.f32 0.5, %v3455_v36 }
 0xf39   : > { %v3457_v16 = vsub.f32 1.5, %v3456_v37 }
 0xf3b   : > { %v3458_v38 = vmul.f32 %v4695_v59, %v3457_v16 }
 0xf3d   : > { %v3462_v40 = vsel %vm3461_vm13, %v4695_v59, %v3458_v38 }
 0xf3e   : > { %v3463_v42 = vmul.f32 %v3462_v40, %v3446_v41 }
 0xf40   : > { %v3468_v44 = vmul.f32 %v4652_v39, %v3463_v42 }
 0xf42   : > { %v3473_v45 = vadd.f32 %v4653_v43, %v3468_v44 }
 0xf44   : > { %4304 = vmatmul.msk.f32.vlgmr.msrb.gmra.mxu3 %vm1832_vm0, %v3473_v45 }
 0xfc7   : > { %v3530_v46 = vpop.f32.mrf.mxu3 }
 0xfc8   : > { %v3531_v47 = vadd.f32 %v4654_v25, %v3530_v46 }
 0xfca   : > { %v3533_v48 = vmax.f32 %v3531_v47, 0.0 }
 0xfcc   : > { %4309 = vmatmul.msk.f32.vlgmr.msra.gmra.mxu0 %vm3542_vm1, %v3533_v48 }
0x1049   : > { %v3575_v50 = vpop.f32.mrf.mxu0 }
0x104a   : > { %v3576_v51 = vadd.f32 %v4655_v49, %v3575_v50 }
0x104c   : > { %v3578_v53 = vadd.f32 %v3576_v51, %v3473_v45 }
0x104e   : > { %v3579_v28 = vsel %vm1832_vm0, %v3578_v53, 0.0 }
0x104f   : > { %3580 = vadd.xlane.f32.xlu0 %v3579_v28 }
0x10c2   : > { %v3581_v57 = vpop.xlane.xlu0 %3580 }
0x10c3   : > { %v3582_v56 = vmul.f32 %v3581_v57, %v6727_v52 }
0x10c5   : > { %v3583_v58 = vsub.f32 %v3578_v53, %v3582_v56 }
0x10c7   : > { %v3584_v15 = vmul.f32 %v3583_v58, %v3583_v58 }
0x10c9   : > { %v3585_v26 = vsel %vm1832_vm0, %v3584_v15, 0.0 }
0x10ca   : > { %3586 = vadd.xlane.f32.xlu2 %v3585_v26 }
0x113d   : > { %v3587_v54 = vpop.xlane.xlu2 %3586 }
0x113e   : > { %v3588_v60 = vmul.f32 %v3587_v54, %v6727_v52 }
0x1140   : > { %v3589_v61 = vadd.f32 1e-05, %v3588_v60 }
0x1142   : > { %4696 = vrsqrt.f32 %v3589_v61  ;;  %vm3596_vm15 = vweird.f32 %v3589_v61 }
0x1148   : > { %v4697_v62 = vpop.eup %4696 }
0x1149   : > { %v3591_v2 = vmul.f32 %v4697_v62, %v3589_v61  ;;  %vm3597_vm14 = vweird.f32 %v4697_v62 }
0x114a   : > { %vm3598_vm2 = vmor %vm3596_vm15, %vm3597_vm14 }
0x114b   : > { %v3592_v3 = vmul.f32 %v4697_v62, %v3591_v2 }
0x114d   : > { %v3593_v4 = vmul.f32 0.5, %v3592_v3 }
0x114f   : > { %v3594_v5 = vsub.f32 1.5, %v3593_v4 }
0x1151   : > { %v3595_v6 = vmul.f32 %v4697_v62, %v3594_v5 }
0x1153   : > { %v3599_v8 = vsel %vm3598_vm2, %v4697_v62, %v3595_v6 }
0x1154   : > { %v3600_v52 = vmul.f32 %v3599_v8, %v3583_v58 }
0x1156   : > { %v3605_v10 = vmul.f32 %v4656_v7, %v3600_v52 }
0x1158   : > { %v3610_v11 = vadd.f32 %v4657_v9, %v3605_v10 }
0x115a   : > { %3611 = vst.msk [vmem:[%s1807_s4] sm:$0xff] %vm1832_vm0, %v3610_v11 }
0x115b   : > { %5627 = shalt.err (!%p5624_p10)
}
0x115c   : > { %4438 = dma.vmem_to_hbm [thread:$0]  (%p6075_p11), %s3626_s3, 128, %s3628_s23, %s3613_s15  }
0x115d PF: > { %s7138_s19 = sld [smem:[#allocation106_spill]]  ;;  %p7140_p0 = scmp.ge.s32.totalorder %s5730_s11, 2 }
0x115f   : > { %p4451_p1 = pnand %p7140_p0, %p6079_p12 }
0x1161   : > { %p4452_p2 = pneg %p4451_p1 }
0x1163   : > { %s3639_s2 = sand.u32 1, %s7138_s19  }
0x1164   : > { %s3640_s28 = scalar_lea.sflag [#allocation4], %s3639_s2 }
0x1165   : > { %5713 = dma.done.wait (%p4452_p2), %s3640_s28, 128  }
0x1166   : > { %5715 = vsyncadd (%p4452_p2), %s3640_s28, 4294967168  ;;  %s7141_s11 = sld [smem:[#allocation107_spill]]  ;;  %s7143_s0 = smov %s5722_s7 }
0x1167   : > { %s7142_s14 = sld [smem:[#allocation108_spill]]  ;;  %s7144_s7 = smov %s5726_s10 }
0x116c   : > { %p114_p3 = scmp.ge.s32.totalorder %s7141_s11, 4  }
0x116d   : > { %s7145_s10 = smov %s7142_s14 }
0x116e   :  { %116 = sbr.rel (!%p114_p3) target bundleno = 103 (0x67), region = 416 }
0x1173   :  { %3646 = vsyncpa [#allocation3], 1 }
0x1174   :  { %3648 = vsyncpa [#allocation3 + $0x1], 1 }
0x1175   :  { %3649 = vsyncpa [#allocation6], 1 }
0x1176   :  { %3651 = vsyncpa [#allocation6 + $0x1], 1 }
0x1177   :  { %3652 = vsyncpa [#allocation9], 1 }
0x1178   :  { %3653 = vsyncpa [#allocation12], 1 }
0x1179   :  { %3654 = vsyncpa [#allocation15], 1 }
0x117a   :  { %3655 = vsyncpa [#allocation18], 1 }
0x117b   :  { %3656 = vsyncpa [#allocation21], 1 }
0x117c   :  { %3657 = vsyncpa [#allocation24], 1 }
0x117d   :  { %3658 = vsyncpa [#allocation27], 1 }
0x117e   :  { %3659 = vsyncpa [#allocation30], 1 }
0x117f   :  { %3660 = vsyncpa [#allocation33], 1 }
0x1180   :  { %3661 = vsyncpa [#allocation36], 1 }
0x1181   :  { %3662 = vsyncpa [#allocation39], 1 }
0x1182   :  { %3663 = vsyncpa [#allocation42], 1 }
0x1183   :  { %3664 = vsyncpa [#allocation45], 1 }
0x1184   :  { %3665 = vsyncpa [#allocation48], 1 }
0x1185   :  { %3666 = vsyncpa [#allocation51], 1 }
0x1186   :  { %3667 = vsyncpa [#allocation4], 1 }
0x1187   :  { %3669 = vsyncpa [#allocation4 + $0x1], 1 }

</bundles_post_ra>
